<compile_context>
chip_gen: v5e
topology: v5e:2x2
jax: 0.10.0
libtpu: 0.0.40
codegen_flags: <defaults>
</compile_context>

<pallas_src>
import functools
import math

import jax
import jax.numpy as jnp
from jax.experimental import pallas as pl
from jax.experimental.pallas import tpu as pltpu

N_NODES = 12                 # 192 / 16
GCN_IN = 2
GCN_HID = 16
IN_DIM = N_NODES * GCN_HID   # 192
CONV_HID = 64
CLS_OUT = 3 + 3 + 2 + 2      # 10
EPS = 1e-5
NEG_SLOPE = 0.01             # F.leaky_relu default


def _lrelu(v):
    return jnp.where(v > 0, v, NEG_SLOPE * v)


# --------------- kernel 1: GCN + BN0 + ReLU + attention + conv1(k=1) + BN1 partial stats -------
def _gcn_attn_conv1_kernel(x_ref, wg_ref, bg_ref, wa_ref, aa_ref, emat_ref,
                           sum12_ref, rep16_ref, tile16_ref, w1_ref,
                           out_ref, bnst_ref, *, rows_total):
    rt = x_ref.shape[0]
    x = x_ref[...]                                                       # (rt, 24)

    # GCN (adjacency + weight + BN0 folded into wg/bg) + ReLU -> lane-dense (rt, 192)
    h = jnp.dot(x, wg_ref[...], preferred_element_type=jnp.float32) + bg_ref[...]
    h = jnp.maximum(h, 0.0)

    # GraphAttention projections (block-diagonal weights, all lane-dense)
    wh = jnp.dot(h, wa_ref[...], preferred_element_type=jnp.float32)     # (rt, 192)
    f = jnp.dot(wh, aa_ref[...], preferred_element_type=jnp.float32)     # (rt, 24)
    f1 = f[:, :N_NODES]                                                  # (rt, 12)
    f2 = f[:, N_NODES:]

    # e lane-dense (rt, 144): column 12*j + i = leaky_relu(f1[i] + f2[j])
    e = _lrelu(jnp.dot(f, emat_ref[...], preferred_element_type=jnp.float32))

    # exact per-column softmax shift (softmax over i for each j):
    #   max_i lrelu(f1[i] + f2[j]) == lrelu(max_i f1 + f2[j])  (lrelu is monotone)
    f2rep = jnp.dot(f2, emat_ref[N_NODES:2 * N_NODES, :],
                    preferred_element_type=jnp.float32)                  # col 12j+i = f2[j]
    m1 = jnp.max(f1, axis=1, keepdims=True)                              # (rt, 1)
    mcol = _lrelu(m1 + f2rep)                                            # (rt, 144)
    p = jnp.exp(e - mcol)                                                # <= 1 everywhere

    # softmax denominators (sum over i, per j) via constant 0/1 matmul on the MXU
    denom = jnp.dot(p, sum12_ref[...], preferred_element_type=jnp.float32)   # (rt, 12)
    rden = 1.0 / denom                                                   # exact (tiny)

    # scale Wh by 1/denom[j] per node-block j
    wh_s = wh * jnp.dot(rden, rep16_ref[...], preferred_element_type=jnp.float32)

    # apply: h_prime[:, 16i+f] = sum_j p[:, 12j+i] * wh_s[:, 16j+f]   (lane-dense FMA loop)
    acc = jnp.zeros((rt, IN_DIM), jnp.float32)
    for j in range(N_NODES):
        pj = p[:, N_NODES * j:N_NODES * (j + 1)]                         # (rt, 12), lane = i
        pj_rep = jnp.dot(pj, rep16_ref[...], preferred_element_type=jnp.float32)    # -> 16i+f
        whj = wh_s[:, GCN_HID * j:GCN_HID * (j + 1)]                     # (rt, 16), lane = f
        whj_rep = jnp.dot(whj, tile16_ref[...], preferred_element_type=jnp.float32)  # -> 16i+f
        acc = acc + pj_rep * whj_rep

    # fused Conv1d(192 -> 64, k=1, bias=False): ONE K=192 matmul
    h1 = jnp.dot(acc, w1_ref[...], preferred_element_type=jnp.float32)   # (rt, 64)
    out_ref[...] = h1

    # BN1 partial statistics for this tile (mask padded rows)
    row = pl.program_id(0) * rt + jax.lax.broadcasted_iota(jnp.int32, (rt, 1), 0)
    h1m = jnp.where(row < rows_total, h1, 0.0)
    bnst_ref[0, 0:1, :] = jnp.sum(h1m, axis=0, keepdims=True)
    bnst_ref[0, 1:2, :] = jnp.sum(h1m * h1m, axis=0, keepdims=True)


# --------------------------- shared k=3 conv (zero-haloed VMEM scratch) ------------------------
def _conv3(pad_ref, a, w_ref, d):
    # pad_ref: (T+4, 64) with halo rows [0:2] and [T+2:T+4] already zeroed.
    T = a.shape[0]
    pad_ref[2:2 + T, :] = a
    y = jnp.dot(pad_ref[2 - d:2 - d + T, :], w_ref[0], preferred_element_type=jnp.float32)
    y = y + jnp.dot(a, w_ref[1], preferred_element_type=jnp.float32)
    y = y + jnp.dot(pad_ref[2 + d:2 + d + T, :], w_ref[2], preferred_element_type=jnp.float32)
    return y


# --------------------- kernel A: exact BN2 / BN3 batch statistics (grid = (2, b)) --------------
def _bn_stats_kernel(bn_ref, w2_ref, w3_ref, h1_ref, stats_ref, pad_ref, *, inv_n):
    p = pl.program_id(0)
    i = pl.program_id(1)
    T = h1_ref.shape[1]

    @pl.when((p == 0) & (i == 0))
    def _init():
        stats_ref[...] = jnp.zeros_like(stats_ref)

    pad_ref[0:2, :] = jnp.zeros((2, CONV_HID), jnp.float32)
    pad_ref[T + 2:T + 4, :] = jnp.zeros((2, CONV_HID), jnp.float32)

    h1 = h1_ref[0]                                                       # (T, 64)
    # BN1 (scale/shift from kernel-1 partial stats) + ReLU
    a1 = jnp.maximum(h1 * bn_ref[0:1, :] + bn_ref[1:2, :], 0.0)
    # Conv1d(64, 64, k=3, pad=1)
    h2 = _conv3(pad_ref, a1, w2_ref, 1)

    @pl.when(p == 0)
    def _acc_bn2():
        stats_ref[0:1, :] = stats_ref[0:1, :] + jnp.sum(h2, axis=0, keepdims=True)
        stats_ref[1:2, :] = stats_ref[1:2, :] + jnp.sum(h2 * h2, axis=0, keepdims=True)

    @pl.when(p == 1)
    def _acc_bn3():
        # BN2 stats are complete (phase 0 finished for the whole batch)
        m2 = stats_ref[0:1, :] * inv_n
        v2 = stats_ref[1:2, :] * inv_n - m2 * m2
        s2 = bn_ref[2:3, :] * jax.lax.rsqrt(v2 + EPS)
        t2 = bn_ref[3:4, :] - m2 * s2
        a2 = jnp.maximum(h2 * s2 + t2, 0.0)
        # Conv1d(64, 64, k=3, pad=2, dilation=2)
        h3 = _conv3(pad_ref, a2, w3_ref, 2)
        stats_ref[2:3, :] = stats_ref[2:3, :] + jnp.sum(h3, axis=0, keepdims=True)
        stats_ref[3:4, :] = stats_ref[3:4, :] + jnp.sum(h3 * h3, axis=0, keepdims=True)


# --------------------- kernel B: final conv stack + classifier (batch-parallel) ----------------
def _conv_final_kernel(bn_ref, w2_ref, w3_ref, wc_ref, h1_ref, out_ref, pad_ref):
    T = h1_ref.shape[1]
    pad_ref[0:2, :] = jnp.zeros((2, CONV_HID), jnp.float32)
    pad_ref[T + 2:T + 4, :] = jnp.zeros((2, CONV_HID), jnp.float32)

    h1 = h1_ref[0]                                                       # (T, 64)
    a1 = jnp.maximum(h1 * bn_ref[0:1, :] + bn_ref[1:2, :], 0.0)          # BN1 + ReLU
    h2 = _conv3(pad_ref, a1, w2_ref, 1)                                  # conv k3 p1
    a2 = jnp.maximum(h2 * bn_ref[2:3, :] + bn_ref[3:4, :], 0.0)          # BN2 + ReLU
    h3 = _conv3(pad_ref, a2, w3_ref, 2)                                  # conv k3 p2 d2
    a3 = jnp.maximum(h3 * bn_ref[4:5, :] + bn_ref[5:6, :], 0.0)          # BN3 + ReLU
    y = _conv3(pad_ref, a3, wc_ref, 2)                                   # classifier (T, 10)
    out_ref[0] = y.T                                                     # NCW: (10, T)


# ----------------------------------------- wrapper ---------------------------------------------
def _round_up(v, m):
    return ((v + m - 1) // m) * m


@jax.jit
def auwgcn_forward(x, params):
    """x: (b, t, n, c) float32, same as the PyTorch module input. Returns (b, 10, t)."""
    b, t, n, c = x.shape
    R = b * t
    x_flat = x.reshape(R, n * c)                                          # (R, 24)

    # ---- BN0 batch statistics from a (24,24) Gram matrix (exact; no 192-wide pre-pass) ----
    adj, gc_w, gc_b = params['adj'], params['gc_w'], params['gc_b']
    gram = x_flat.T @ x_flat                                              # (24, 24)
    colsum_x = jnp.sum(x_flat, axis=0)                                    # (24,)
    adj_colsum = jnp.sum(adj, axis=0)                                     # (12,)
    wsum = jnp.repeat(adj_colsum, GCN_IN) * colsum_x                      # (24,)
    mu_lin = (wsum.reshape(n, c).sum(axis=0) @ gc_w) / (R * n)            # (16,)
    a2e = jnp.kron(adj.T @ adj, jnp.ones((GCN_IN, GCN_IN), jnp.float32))  # (24, 24)
    w_big = jnp.tile(gc_w, (n, 1))                                        # (24, 16)
    quad = jnp.sum(w_big * ((gram * a2e) @ w_big), axis=0)                # (16,)
    mu0 = gc_b + mu_lin
    var0 = quad / (R * n) - mu_lin * mu_lin
    s0 = params['bn0_g'] * jax.lax.rsqrt(var0 + EPS)
    sh0 = params['bn0_b'] - mu0 * s0
    s0t = jnp.tile(s0, n)[None, :]                                        # (1, 192)
    sh0t = jnp.tile(sh0, n)[None, :]
    wg_bn = params['gcn_w'] * s0t
    bg_bn = params['gcn_b'] * s0t + sh0t

    # ---- kernel 1: row-tiled over b*t ("parallel") ----
    rt = min(512, _round_up(R, 8))
    Rp = _round_up(R, rt)
    nt = Rp // rt
    x_pad = jnp.pad(x_flat, ((0, Rp - R), (0, 0)))

    k1 = functools.partial(_gcn_attn_conv1_kernel, rows_total=R)
    h1_full, bn1_parts = pl.pallas_call(
        k1,
        out_shape=(jax.ShapeDtypeStruct((Rp, CONV_HID), jnp.float32),
                   jax.ShapeDtypeStruct((nt, 2, CONV_HID), jnp.float32)),
        grid=(nt,),
        in_specs=[
            pl.BlockSpec((rt, n * c), lambda i: (i, 0)),
            pl.BlockSpec((n * c, IN_DIM), lambda i: (0, 0)),
            pl.BlockSpec((1, IN_DIM), lambda i: (0, 0)),
            pl.BlockSpec((IN_DIM, IN_DIM), lambda i: (0, 0)),
            pl.BlockSpec((IN_DIM, 2 * N_NODES), lambda i: (0, 0)),
            pl.BlockSpec((2 * N_NODES, N_NODES * N_NODES), lambda i: (0, 0)),
            pl.BlockSpec((N_NODES * N_NODES, N_NODES), lambda i: (0, 0)),
            pl.BlockSpec((N_NODES, IN_DIM), lambda i: (0, 0)),
            pl.BlockSpec((GCN_HID, IN_DIM), lambda i: (0, 0)),
            pl.BlockSpec((IN_DIM, CONV_HID), lambda i: (0, 0)),
        ],
        out_specs=(pl.BlockSpec((rt, CONV_HID), lambda i: (i, 0)),
                   pl.BlockSpec((1, 2, CONV_HID), lambda i: (i, 0, 0))),
        compiler_params=pltpu.CompilerParams(
            dimension_semantics=("parallel",),
            vmem_limit_bytes=32 * 1024 * 1024),
    )(x_pad, wg_bn, bg_bn, params['att_w_blk'], params['att_a_blk'],
      params['emat'], params['sum12'], params['rep16'], params['tile16'], params['w1t'])

    h1 = h1_full[:R]                                                      # (R, 64)

    # ---- BN1 scale/shift from in-kernel partial sums (no extra HBM pass over h1) ----
    mu1 = jnp.sum(bn1_parts[:, 0, :], axis=0) / R
    var1 = jnp.sum(bn1_parts[:, 1, :], axis=0) / R - mu1 * mu1
    s1 = params['bn1_g'] * jax.lax.rsqrt(var1 + EPS)
    sh1 = params['bn1_b'] - mu1 * s1

    h1r = h1.reshape(b, t, CONV_HID)

    # ---- kernel A: exact BN2 / BN3 batch statistics (sequential phases over the batch) ----
    bn_in = jnp.stack([s1, sh1, params['bn2_g'], params['bn2_b']], axis=0)    # (4, 64)
    kA = functools.partial(_bn_stats_kernel, inv_n=1.0 / float(R))
    stats = pl.pallas_call(
        kA,
        out_shape=jax.ShapeDtypeStruct((4, CONV_HID), jnp.float32),
        grid=(2, b),
        in_specs=[
            pl.BlockSpec((4, CONV_HID), lambda p, i: (0, 0)),
            pl.BlockSpec((3, CONV_HID, CONV_HID), lambda p, i: (0, 0, 0)),
            pl.BlockSpec((3, CONV_HID, CONV_HID), lambda p, i: (0, 0, 0)),
            pl.BlockSpec((1, t, CONV_HID), lambda p, i: (i, 0, 0)),
        ],
        out_specs=pl.BlockSpec((4, CONV_HID), lambda p, i: (0, 0)),
        scratch_shapes=[pltpu.VMEM((t + 4, CONV_HID), jnp.float32)],
        compiler_params=pltpu.CompilerParams(
            dimension_semantics=("arbitrary", "arbitrary"),
            vmem_limit_bytes=32 * 1024 * 1024),
    )(bn_in, params['w2taps'], params['w3taps'], h1r)

    # fold BN2 / BN3 batch stats into per-channel scale/shift
    m2 = stats[0] / R
    v2 = stats[1] / R - m2 * m2
    s2 = params['bn2_g'] * jax.lax.rsqrt(v2 + EPS)
    sh2 = params['bn2_b'] - m2 * s2
    m3 = stats[2] / R
    v3 = stats[3] / R - m3 * m3
    s3 = params['bn3_g'] * jax.lax.rsqrt(v3 + EPS)
    sh3 = params['bn3_b'] - m3 * s3
    bn_all = jnp.stack([s1, sh1, s2, sh2, s3, sh3], axis=0)               # (6, 64)

    # ---- kernel B: final conv stack + classifier, batch-parallel (uses both v7x cores) ----
    out = pl.pallas_call(
        _conv_final_kernel,
        out_shape=jax.ShapeDtypeStruct((b, CLS_OUT, t), jnp.float32),
        grid=(b,),
        in_specs=[
            pl.BlockSpec((6, CONV_HID), lambda i: (0, 0)),
            pl.BlockSpec((3, CONV_HID, CONV_HID), lambda i: (0, 0, 0)),
            pl.BlockSpec((3, CONV_HID, CONV_HID), lambda i: (0, 0, 0)),
            pl.BlockSpec((3, CONV_HID, CLS_OUT), lambda i: (0, 0, 0)),
            pl.BlockSpec((1, t, CONV_HID), lambda i: (i, 0, 0)),
        ],
        out_specs=pl.BlockSpec((1, CLS_OUT, t), lambda i: (i, 0, 0)),
        scratch_shapes=[pltpu.VMEM((t + 4, CONV_HID), jnp.float32)],
        compiler_params=pltpu.CompilerParams(
            dimension_semantics=("parallel",),
            vmem_limit_bytes=32 * 1024 * 1024),
    )(bn_all, params['w2taps'], params['w3taps'], params['wctaps'], h1r)

    return out                                                            # (b, 10, t)


def init_params(key):
    ks = jax.random.split(key, 9)
    stdv = 1.0 / math.sqrt(GCN_HID)

    # GraphConvolution(2, 16)
    gc_w = jax.random.uniform(ks[0], (GCN_IN, GCN_HID), jnp.float32, -stdv, stdv)
    gc_b = jax.random.uniform(ks[1], (GCN_HID,), jnp.float32, -stdv, stdv)

    # synthetic deterministic normalized adjacency (stand-in for assets/{dataset}.npy)
    a = jax.random.uniform(ks[2], (N_NODES, N_NODES), jnp.float32, 0.0, 1.0)
    a = 0.5 * (a + a.T) + jnp.eye(N_NODES, dtype=jnp.float32)
    adj = a / jnp.sum(a, axis=1, keepdims=True)

    # GraphAttentionLayer(16, 16)
    att_w = jax.random.uniform(ks[3], (GCN_HID, GCN_HID), jnp.float32, -stdv, stdv)
    att_a = jax.random.uniform(ks[4], (2 * GCN_HID, 1), jnp.float32, -stdv, stdv)

    def kaiming(k, shape):          # PyTorch conv weight (O, C, K), kaiming_normal_ fan_in
        fan_in = shape[1] * shape[2]
        return math.sqrt(2.0 / fan_in) * jax.random.normal(k, shape, jnp.float32)

    w1 = kaiming(ks[5], (CONV_HID, IN_DIM, 1))
    w2 = kaiming(ks[6], (CONV_HID, CONV_HID, 3))
    w3 = kaiming(ks[7], (CONV_HID, CONV_HID, 3))
    wc = kaiming(ks[8], (CLS_OUT, CONV_HID, 3))

    eye_n = jnp.eye(N_NODES, dtype=jnp.float32)
    eye_f = jnp.eye(GCN_HID, dtype=jnp.float32)

    # ----- fused / lane-dense weight layouts used by the kernels (all f32) -----
    gcn_w = jnp.kron(adj.T, gc_w)                                         # (24, 192)
    gcn_b = jnp.tile(gc_b, N_NODES)[None, :]                              # (1, 192)
    att_w_blk = jnp.kron(eye_n, att_w)                                    # (192, 192)
    a1v = att_a[:GCN_HID]
    a2v = att_a[GCN_HID:]
    att_a_blk = jnp.concatenate([jnp.kron(eye_n, a1v), jnp.kron(eye_n, a2v)], axis=1)  # (192,24)

    # constant 0/1 lane-expansion matrices (keep attention broadcasts on the MXU)
    emat = jnp.concatenate([jnp.tile(eye_n, (1, N_NODES)),
                            jnp.repeat(eye_n, N_NODES, axis=1)], axis=0)  # (24, 144)
    sum12 = jnp.repeat(eye_n, N_NODES, axis=1).T                          # (144, 12)
    rep16 = jnp.repeat(eye_n, GCN_HID, axis=1)                            # (12, 192)
    tile16 = jnp.tile(eye_f, (1, N_NODES))                                # (16, 192)

    # conv weights: k=1 as (192,64); k=3 as (3, C_in, C_out) tap stacks
    w1t = w1[:, :, 0].T                                                   # (192, 64)
    w2taps = jnp.transpose(w2, (2, 1, 0))                                 # (3, 64, 64)
    w3taps = jnp.transpose(w3, (2, 1, 0))                                 # (3, 64, 64)
    wctaps = jnp.transpose(wc, (2, 1, 0))                                 # (3, 64, 10)

    ones16 = jnp.ones((GCN_HID,), jnp.float32)
    zeros16 = jnp.zeros((GCN_HID,), jnp.float32)
    ones64 = jnp.ones((CONV_HID,), jnp.float32)
    zeros64 = jnp.zeros((CONV_HID,), jnp.float32)

    return dict(adj=adj, gc_w=gc_w, gc_b=gc_b,
                gcn_w=gcn_w, gcn_b=gcn_b,
                att_w_blk=att_w_blk, att_a_blk=att_a_blk,
                emat=emat, sum12=sum12, rep16=rep16, tile16=tile16,
                w1t=w1t, w2taps=w2taps, w3taps=w3taps, wctaps=wctaps,
                bn0_g=ones16, bn0_b=zeros16,
                bn1_g=ones64, bn1_b=zeros64,
                bn2_g=ones64, bn2_b=zeros64,
                bn3_g=ones64, bn3_b=zeros64)


if __name__ == "__main__":
    key = jax.random.PRNGKey(0)
    pkey, xkey = jax.random.split(key)
    params = init_params(pkey)

    b, t = 2, 8
    x = jax.random.normal(xkey, (b, t, N_NODES, GCN_IN), jnp.float32)

    y = auwgcn_forward(x, params)
    jax.block_until_ready(y)
    assert y.shape == (b, CLS_OUT, t), y.shape
    print("KERNEL_OK")
</pallas_src>

<mosaic_0001>
module attributes {stable_mosaic.version = 11 : i64} {
  func.func @_gcn_attn_conv1_kernel(%arg0: i32, %arg1: memref<16x24xf32, #tpu.memory_space<vmem>>, %arg2: memref<24x192xf32, #tpu.memory_space<vmem>>, %arg3: memref<1x192xf32, #tpu.memory_space<vmem>>, %arg4: memref<192x192xf32, #tpu.memory_space<vmem>>, %arg5: memref<192x24xf32, #tpu.memory_space<vmem>>, %arg6: memref<24x144xf32, #tpu.memory_space<vmem>>, %arg7: memref<144x12xf32, #tpu.memory_space<vmem>>, %arg8: memref<12x192xf32, #tpu.memory_space<vmem>>, %arg9: memref<16x192xf32, #tpu.memory_space<vmem>>, %arg10: memref<192x64xf32, #tpu.memory_space<vmem>>, %arg11: memref<16x64xf32, #tpu.memory_space<vmem>>, %arg12: memref<1x2x64xf32, #tpu.memory_space<vmem>>) attributes {dimension_semantics = [#tpu.dimension_semantics<parallel>], iteration_bounds = array<i64: 1>, scalar_prefetch = 0 : i64, scratch_operands = 0 : i64, tpu.core_type = #tpu.core_type<tc>, window_params = [{transform_indices = @transform_0, window_bounds = array<i64: 16, 24>}, {pipeline_mode = #tpu.pipeline_mode<synchronous>, transform_indices = @transform_1, window_bounds = array<i64: 24, 192>}, {pipeline_mode = #tpu.pipeline_mode<synchronous>, transform_indices = @transform_2, window_bounds = array<i64: 1, 192>}, {pipeline_mode = #tpu.pipeline_mode<synchronous>, transform_indices = @transform_3, window_bounds = array<i64: 192, 192>}, {pipeline_mode = #tpu.pipeline_mode<synchronous>, transform_indices = @transform_4, window_bounds = array<i64: 192, 24>}, {pipeline_mode = #tpu.pipeline_mode<synchronous>, transform_indices = @transform_5, window_bounds = array<i64: 24, 144>}, {pipeline_mode = #tpu.pipeline_mode<synchronous>, transform_indices = @transform_6, window_bounds = array<i64: 144, 12>}, {pipeline_mode = #tpu.pipeline_mode<synchronous>, transform_indices = @transform_7, window_bounds = array<i64: 12, 192>}, {pipeline_mode = #tpu.pipeline_mode<synchronous>, transform_indices = @transform_8, window_bounds = array<i64: 16, 192>}, {pipeline_mode = #tpu.pipeline_mode<synchronous>, transform_indices = @transform_9, window_bounds = array<i64: 192, 64>}, {transform_indices = @transform_10, window_bounds = array<i64: 16, 64>}, {transform_indices = @transform_11, window_bounds = array<i64: 1, 2, 64>}]} {
    %c0 = arith.constant 0 : index
    %c0_0 = arith.constant 0 : index
    %0 = vector.load %arg1[%c0, %c0_0] : memref<16x24xf32, #tpu.memory_space<vmem>>, vector<16x24xf32>
    %c0_1 = arith.constant 0 : index
    %c0_2 = arith.constant 0 : index
    %1 = vector.load %arg2[%c0_1, %c0_2] : memref<24x192xf32, #tpu.memory_space<vmem>>, vector<24x192xf32>
    %cst = arith.constant dense<0.000000e+00> : vector<16x192xf32>
    %2 = tpu.matmul %0, %1, %cst {dimension_numbers = #tpu.dot_dimension_numbers<[1], [0], [0], [1], [0, 0, 1, 1], [], []>} : vector<16x24xf32>, vector<24x192xf32>, vector<16x192xf32> -> vector<16x192xf32>
    %c0_3 = arith.constant 0 : index
    %c0_4 = arith.constant 0 : index
    %3 = vector.load %arg3[%c0_3, %c0_4] : memref<1x192xf32, #tpu.memory_space<vmem>>, vector<1x192xf32>
    %4 = vector.broadcast %3 : vector<1x192xf32> to vector<16x192xf32>
    %5 = arith.addf %2, %4 : vector<16x192xf32>
    %cst_5 = arith.constant 0.000000e+00 : f32
    %6 = vector.broadcast %cst_5 : f32 to vector<16x192xf32>
    %7 = arith.maximumf %5, %6 : vector<16x192xf32>
    %c0_6 = arith.constant 0 : index
    %c0_7 = arith.constant 0 : index
    %8 = vector.load %arg4[%c0_6, %c0_7] : memref<192x192xf32, #tpu.memory_space<vmem>>, vector<192x192xf32>
    %cst_8 = arith.constant dense<0.000000e+00> : vector<16x192xf32>
    %9 = tpu.matmul %7, %8, %cst_8 {dimension_numbers = #tpu.dot_dimension_numbers<[1], [0], [0], [1], [0, 0, 1, 1], [], []>} : vector<16x192xf32>, vector<192x192xf32>, vector<16x192xf32> -> vector<16x192xf32>
    %c0_9 = arith.constant 0 : index
    %c0_10 = arith.constant 0 : index
    %10 = vector.load %arg5[%c0_9, %c0_10] : memref<192x24xf32, #tpu.memory_space<vmem>>, vector<192x24xf32>
    %cst_11 = arith.constant dense<0.000000e+00> : vector<16x24xf32>
    %11 = tpu.matmul %9, %10, %cst_11 {dimension_numbers = #tpu.dot_dimension_numbers<[1], [0], [0], [1], [0, 0, 1, 1], [], []>} : vector<16x192xf32>, vector<192x24xf32>, vector<16x24xf32> -> vector<16x24xf32>
    %12 = vector.extract_strided_slice %11 {offsets = [0, 0], sizes = [16, 12], strides = [1, 1]} : vector<16x24xf32> to vector<16x12xf32>
    %13 = vector.extract_strided_slice %11 {offsets = [0, 12], sizes = [16, 12], strides = [1, 1]} : vector<16x24xf32> to vector<16x12xf32>
    %c0_12 = arith.constant 0 : index
    %c0_13 = arith.constant 0 : index
    %14 = vector.load %arg6[%c0_12, %c0_13] : memref<24x144xf32, #tpu.memory_space<vmem>>, vector<24x144xf32>
    %cst_14 = arith.constant dense<0.000000e+00> : vector<16x144xf32>
    %15 = tpu.matmul %11, %14, %cst_14 {dimension_numbers = #tpu.dot_dimension_numbers<[1], [0], [0], [1], [0, 0, 1, 1], [], []>} : vector<16x24xf32>, vector<24x144xf32>, vector<16x144xf32> -> vector<16x144xf32>
    %cst_15 = arith.constant 0.000000e+00 : f32
    %16 = vector.broadcast %cst_15 : f32 to vector<16x144xf32>
    %17 = arith.cmpf ogt, %15, %16 : vector<16x144xf32>
    %cst_16 = arith.constant 0.00999999977 : f32
    %18 = vector.broadcast %cst_16 : f32 to vector<16x144xf32>
    %19 = arith.mulf %18, %15 : vector<16x144xf32>
    %20 = arith.select %17, %15, %19 : vector<16x144xi1>, vector<16x144xf32>
    %c12 = arith.constant 12 : index
    %c0_17 = arith.constant 0 : index
    %21 = vector.load %arg6[%c12, %c0_17] : memref<24x144xf32, #tpu.memory_space<vmem>>, vector<12x144xf32>
    %cst_18 = arith.constant dense<0.000000e+00> : vector<16x144xf32>
    %22 = tpu.matmul %13, %21, %cst_18 {dimension_numbers = #tpu.dot_dimension_numbers<[1], [0], [0], [1], [0, 0, 1, 1], [], []>} : vector<16x12xf32>, vector<12x144xf32>, vector<16x144xf32> -> vector<16x144xf32>
    %cst_19 = arith.constant dense<0xFF800000> : vector<16xf32>
    %23 = vector.multi_reduction <maximumf>, %12, %cst_19 [1] : vector<16x12xf32> to vector<16xf32>
    %24 = vector.shape_cast %23 : vector<16xf32> to vector<16x1xf32>
    %25 = vector.broadcast %24 : vector<16x1xf32> to vector<16x144xf32>
    %26 = arith.addf %25, %22 : vector<16x144xf32>
    %cst_20 = arith.constant 0.000000e+00 : f32
    %27 = vector.broadcast %cst_20 : f32 to vector<16x144xf32>
    %28 = arith.cmpf ogt, %26, %27 : vector<16x144xf32>
    %cst_21 = arith.constant 0.00999999977 : f32
    %29 = vector.broadcast %cst_21 : f32 to vector<16x144xf32>
    %30 = arith.mulf %29, %26 : vector<16x144xf32>
    %31 = arith.select %28, %26, %30 : vector<16x144xi1>, vector<16x144xf32>
    %32 = arith.subf %20, %31 : vector<16x144xf32>
    %33 = math.exp %32 : vector<16x144xf32>
    %c0_22 = arith.constant 0 : index
    %c0_23 = arith.constant 0 : index
    %34 = vector.load %arg7[%c0_22, %c0_23] : memref<144x12xf32, #tpu.memory_space<vmem>>, vector<144x12xf32>
    %cst_24 = arith.constant dense<0.000000e+00> : vector<16x12xf32>
    %35 = tpu.matmul %33, %34, %cst_24 {dimension_numbers = #tpu.dot_dimension_numbers<[1], [0], [0], [1], [0, 0, 1, 1], [], []>} : vector<16x144xf32>, vector<144x12xf32>, vector<16x12xf32> -> vector<16x12xf32>
    %cst_25 = arith.constant 1.000000e+00 : f32
    %36 = vector.broadcast %cst_25 : f32 to vector<16x12xf32>
    %37 = arith.divf %36, %35 : vector<16x12xf32>
    %c0_26 = arith.constant 0 : index
    %c0_27 = arith.constant 0 : index
    %38 = vector.load %arg8[%c0_26, %c0_27] : memref<12x192xf32, #tpu.memory_space<vmem>>, vector<12x192xf32>
    %cst_28 = arith.constant dense<0.000000e+00> : vector<16x192xf32>
    %39 = tpu.matmul %37, %38, %cst_28 {dimension_numbers = #tpu.dot_dimension_numbers<[1], [0], [0], [1], [0, 0, 1, 1], [], []>} : vector<16x12xf32>, vector<12x192xf32>, vector<16x192xf32> -> vector<16x192xf32>
    %40 = arith.mulf %9, %39 : vector<16x192xf32>
    %cst_29 = arith.constant 0.000000e+00 : f32
    %41 = vector.broadcast %cst_29 : f32 to vector<16x192xf32>
    %42 = vector.extract_strided_slice %33 {offsets = [0, 0], sizes = [16, 12], strides = [1, 1]} : vector<16x144xf32> to vector<16x12xf32>
    %c0_30 = arith.constant 0 : index
    %c0_31 = arith.constant 0 : index
    %43 = vector.load %arg8[%c0_30, %c0_31] : memref<12x192xf32, #tpu.memory_space<vmem>>, vector<12x192xf32>
    %cst_32 = arith.constant dense<0.000000e+00> : vector<16x192xf32>
    %44 = tpu.matmul %42, %43, %cst_32 {dimension_numbers = #tpu.dot_dimension_numbers<[1], [0], [0], [1], [0, 0, 1, 1], [], []>} : vector<16x12xf32>, vector<12x192xf32>, vector<16x192xf32> -> vector<16x192xf32>
    %45 = vector.extract_strided_slice %40 {offsets = [0, 0], sizes = [16, 16], strides = [1, 1]} : vector<16x192xf32> to vector<16x16xf32>
    %c0_33 = arith.constant 0 : index
    %c0_34 = arith.constant 0 : index
    %46 = vector.load %arg9[%c0_33, %c0_34] : memref<16x192xf32, #tpu.memory_space<vmem>>, vector<16x192xf32>
    %cst_35 = arith.constant dense<0.000000e+00> : vector<16x192xf32>
    %47 = tpu.matmul %45, %46, %cst_35 {dimension_numbers = #tpu.dot_dimension_numbers<[1], [0], [0], [1], [0, 0, 1, 1], [], []>} : vector<16x16xf32>, vector<16x192xf32>, vector<16x192xf32> -> vector<16x192xf32>
    %48 = arith.mulf %44, %47 : vector<16x192xf32>
    %49 = arith.addf %41, %48 : vector<16x192xf32>
    %50 = vector.extract_strided_slice %33 {offsets = [0, 12], sizes = [16, 12], strides = [1, 1]} : vector<16x144xf32> to vector<16x12xf32>
    %c0_36 = arith.constant 0 : index
    %c0_37 = arith.constant 0 : index
    %51 = vector.load %arg8[%c0_36, %c0_37] : memref<12x192xf32, #tpu.memory_space<vmem>>, vector<12x192xf32>
    %cst_38 = arith.constant dense<0.000000e+00> : vector<16x192xf32>
    %52 = tpu.matmul %50, %51, %cst_38 {dimension_numbers = #tpu.dot_dimension_numbers<[1], [0], [0], [1], [0, 0, 1, 1], [], []>} : vector<16x12xf32>, vector<12x192xf32>, vector<16x192xf32> -> vector<16x192xf32>
    %53 = vector.extract_strided_slice %40 {offsets = [0, 16], sizes = [16, 16], strides = [1, 1]} : vector<16x192xf32> to vector<16x16xf32>
    %c0_39 = arith.constant 0 : index
    %c0_40 = arith.constant 0 : index
    %54 = vector.load %arg9[%c0_39, %c0_40] : memref<16x192xf32, #tpu.memory_space<vmem>>, vector<16x192xf32>
    %cst_41 = arith.constant dense<0.000000e+00> : vector<16x192xf32>
    %55 = tpu.matmul %53, %54, %cst_41 {dimension_numbers = #tpu.dot_dimension_numbers<[1], [0], [0], [1], [0, 0, 1, 1], [], []>} : vector<16x16xf32>, vector<16x192xf32>, vector<16x192xf32> -> vector<16x192xf32>
    %56 = arith.mulf %52, %55 : vector<16x192xf32>
    %57 = arith.addf %49, %56 : vector<16x192xf32>
    %58 = vector.extract_strided_slice %33 {offsets = [0, 24], sizes = [16, 12], strides = [1, 1]} : vector<16x144xf32> to vector<16x12xf32>
    %c0_42 = arith.constant 0 : index
    %c0_43 = arith.constant 0 : index
    %59 = vector.load %arg8[%c0_42, %c0_43] : memref<12x192xf32, #tpu.memory_space<vmem>>, vector<12x192xf32>
    %cst_44 = arith.constant dense<0.000000e+00> : vector<16x192xf32>
    %60 = tpu.matmul %58, %59, %cst_44 {dimension_numbers = #tpu.dot_dimension_numbers<[1], [0], [0], [1], [0, 0, 1, 1], [], []>} : vector<16x12xf32>, vector<12x192xf32>, vector<16x192xf32> -> vector<16x192xf32>
    %61 = vector.extract_strided_slice %40 {offsets = [0, 32], sizes = [16, 16], strides = [1, 1]} : vector<16x192xf32> to vector<16x16xf32>
    %c0_45 = arith.constant 0 : index
    %c0_46 = arith.constant 0 : index
    %62 = vector.load %arg9[%c0_45, %c0_46] : memref<16x192xf32, #tpu.memory_space<vmem>>, vector<16x192xf32>
    %cst_47 = arith.constant dense<0.000000e+00> : vector<16x192xf32>
    %63 = tpu.matmul %61, %62, %cst_47 {dimension_numbers = #tpu.dot_dimension_numbers<[1], [0], [0], [1], [0, 0, 1, 1], [], []>} : vector<16x16xf32>, vector<16x192xf32>, vector<16x192xf32> -> vector<16x192xf32>
    %64 = arith.mulf %60, %63 : vector<16x192xf32>
    %65 = arith.addf %57, %64 : vector<16x192xf32>
    %66 = vector.extract_strided_slice %33 {offsets = [0, 36], sizes = [16, 12], strides = [1, 1]} : vector<16x144xf32> to vector<16x12xf32>
    %c0_48 = arith.constant 0 : index
    %c0_49 = arith.constant 0 : index
    %67 = vector.load %arg8[%c0_48, %c0_49] : memref<12x192xf32, #tpu.memory_space<vmem>>, vector<12x192xf32>
    %cst_50 = arith.constant dense<0.000000e+00> : vector<16x192xf32>
    %68 = tpu.matmul %66, %67, %cst_50 {dimension_numbers = #tpu.dot_dimension_numbers<[1], [0], [0], [1], [0, 0, 1, 1], [], []>} : vector<16x12xf32>, vector<12x192xf32>, vector<16x192xf32> -> vector<16x192xf32>
    %69 = vector.extract_strided_slice %40 {offsets = [0, 48], sizes = [16, 16], strides = [1, 1]} : vector<16x192xf32> to vector<16x16xf32>
    %c0_51 = arith.constant 0 : index
    %c0_52 = arith.constant 0 : index
    %70 = vector.load %arg9[%c0_51, %c0_52] : memref<16x192xf32, #tpu.memory_space<vmem>>, vector<16x192xf32>
    %cst_53 = arith.constant dense<0.000000e+00> : vector<16x192xf32>
    %71 = tpu.matmul %69, %70, %cst_53 {dimension_numbers = #tpu.dot_dimension_numbers<[1], [0], [0], [1], [0, 0, 1, 1], [], []>} : vector<16x16xf32>, vector<16x192xf32>, vector<16x192xf32> -> vector<16x192xf32>
    %72 = arith.mulf %68, %71 : vector<16x192xf32>
    %73 = arith.addf %65, %72 : vector<16x192xf32>
    %74 = vector.extract_strided_slice %33 {offsets = [0, 48], sizes = [16, 12], strides = [1, 1]} : vector<16x144xf32> to vector<16x12xf32>
    %c0_54 = arith.constant 0 : index
    %c0_55 = arith.constant 0 : index
    %75 = vector.load %arg8[%c0_54, %c0_55] : memref<12x192xf32, #tpu.memory_space<vmem>>, vector<12x192xf32>
    %cst_56 = arith.constant dense<0.000000e+00> : vector<16x192xf32>
    %76 = tpu.matmul %74, %75, %cst_56 {dimension_numbers = #tpu.dot_dimension_numbers<[1], [0], [0], [1], [0, 0, 1, 1], [], []>} : vector<16x12xf32>, vector<12x192xf32>, vector<16x192xf32> -> vector<16x192xf32>
    %77 = vector.extract_strided_slice %40 {offsets = [0, 64], sizes = [16, 16], strides = [1, 1]} : vector<16x192xf32> to vector<16x16xf32>
    %c0_57 = arith.constant 0 : index
    %c0_58 = arith.constant 0 : index
    %78 = vector.load %arg9[%c0_57, %c0_58] : memref<16x192xf32, #tpu.memory_space<vmem>>, vector<16x192xf32>
    %cst_59 = arith.constant dense<0.000000e+00> : vector<16x192xf32>
    %79 = tpu.matmul %77, %78, %cst_59 {dimension_numbers = #tpu.dot_dimension_numbers<[1], [0], [0], [1], [0, 0, 1, 1], [], []>} : vector<16x16xf32>, vector<16x192xf32>, vector<16x192xf32> -> vector<16x192xf32>
    %80 = arith.mulf %76, %79 : vector<16x192xf32>
    %81 = arith.addf %73, %80 : vector<16x192xf32>
    %82 = vector.extract_strided_slice %33 {offsets = [0, 60], sizes = [16, 12], strides = [1, 1]} : vector<16x144xf32> to vector<16x12xf32>
    %c0_60 = arith.constant 0 : index
    %c0_61 = arith.constant 0 : index
    %83 = vector.load %arg8[%c0_60, %c0_61] : memref<12x192xf32, #tpu.memory_space<vmem>>, vector<12x192xf32>
    %cst_62 = arith.constant dense<0.000000e+00> : vector<16x192xf32>
    %84 = tpu.matmul %82, %83, %cst_62 {dimension_numbers = #tpu.dot_dimension_numbers<[1], [0], [0], [1], [0, 0, 1, 1], [], []>} : vector<16x12xf32>, vector<12x192xf32>, vector<16x192xf32> -> vector<16x192xf32>
    %85 = vector.extract_strided_slice %40 {offsets = [0, 80], sizes = [16, 16], strides = [1, 1]} : vector<16x192xf32> to vector<16x16xf32>
    %c0_63 = arith.constant 0 : index
    %c0_64 = arith.constant 0 : index
    %86 = vector.load %arg9[%c0_63, %c0_64] : memref<16x192xf32, #tpu.memory_space<vmem>>, vector<16x192xf32>
    %cst_65 = arith.constant dense<0.000000e+00> : vector<16x192xf32>
    %87 = tpu.matmul %85, %86, %cst_65 {dimension_numbers = #tpu.dot_dimension_numbers<[1], [0], [0], [1], [0, 0, 1, 1], [], []>} : vector<16x16xf32>, vector<16x192xf32>, vector<16x192xf32> -> vector<16x192xf32>
    %88 = arith.mulf %84, %87 : vector<16x192xf32>
    %89 = arith.addf %81, %88 : vector<16x192xf32>
    %90 = vector.extract_strided_slice %33 {offsets = [0, 72], sizes = [16, 12], strides = [1, 1]} : vector<16x144xf32> to vector<16x12xf32>
    %c0_66 = arith.constant 0 : index
    %c0_67 = arith.constant 0 : index
    %91 = vector.load %arg8[%c0_66, %c0_67] : memref<12x192xf32, #tpu.memory_space<vmem>>, vector<12x192xf32>
    %cst_68 = arith.constant dense<0.000000e+00> : vector<16x192xf32>
    %92 = tpu.matmul %90, %91, %cst_68 {dimension_numbers = #tpu.dot_dimension_numbers<[1], [0], [0], [1], [0, 0, 1, 1], [], []>} : vector<16x12xf32>, vector<12x192xf32>, vector<16x192xf32> -> vector<16x192xf32>
    %93 = vector.extract_strided_slice %40 {offsets = [0, 96], sizes = [16, 16], strides = [1, 1]} : vector<16x192xf32> to vector<16x16xf32>
    %c0_69 = arith.constant 0 : index
    %c0_70 = arith.constant 0 : index
    %94 = vector.load %arg9[%c0_69, %c0_70] : memref<16x192xf32, #tpu.memory_space<vmem>>, vector<16x192xf32>
    %cst_71 = arith.constant dense<0.000000e+00> : vector<16x192xf32>
    %95 = tpu.matmul %93, %94, %cst_71 {dimension_numbers = #tpu.dot_dimension_numbers<[1], [0], [0], [1], [0, 0, 1, 1], [], []>} : vector<16x16xf32>, vector<16x192xf32>, vector<16x192xf32> -> vector<16x192xf32>
    %96 = arith.mulf %92, %95 : vector<16x192xf32>
    %97 = arith.addf %89, %96 : vector<16x192xf32>
    %98 = vector.extract_strided_slice %33 {offsets = [0, 84], sizes = [16, 12], strides = [1, 1]} : vector<16x144xf32> to vector<16x12xf32>
    %c0_72 = arith.constant 0 : index
    %c0_73 = arith.constant 0 : index
    %99 = vector.load %arg8[%c0_72, %c0_73] : memref<12x192xf32, #tpu.memory_space<vmem>>, vector<12x192xf32>
    %cst_74 = arith.constant dense<0.000000e+00> : vector<16x192xf32>
    %100 = tpu.matmul %98, %99, %cst_74 {dimension_numbers = #tpu.dot_dimension_numbers<[1], [0], [0], [1], [0, 0, 1, 1], [], []>} : vector<16x12xf32>, vector<12x192xf32>, vector<16x192xf32> -> vector<16x192xf32>
    %101 = vector.extract_strided_slice %40 {offsets = [0, 112], sizes = [16, 16], strides = [1, 1]} : vector<16x192xf32> to vector<16x16xf32>
    %c0_75 = arith.constant 0 : index
    %c0_76 = arith.constant 0 : index
    %102 = vector.load %arg9[%c0_75, %c0_76] : memref<16x192xf32, #tpu.memory_space<vmem>>, vector<16x192xf32>
    %cst_77 = arith.constant dense<0.000000e+00> : vector<16x192xf32>
    %103 = tpu.matmul %101, %102, %cst_77 {dimension_numbers = #tpu.dot_dimension_numbers<[1], [0], [0], [1], [0, 0, 1, 1], [], []>} : vector<16x16xf32>, vector<16x192xf32>, vector<16x192xf32> -> vector<16x192xf32>
    %104 = arith.mulf %100, %103 : vector<16x192xf32>
    %105 = arith.addf %97, %104 : vector<16x192xf32>
    %106 = vector.extract_strided_slice %33 {offsets = [0, 96], sizes = [16, 12], strides = [1, 1]} : vector<16x144xf32> to vector<16x12xf32>
    %c0_78 = arith.constant 0 : index
    %c0_79 = arith.constant 0 : index
    %107 = vector.load %arg8[%c0_78, %c0_79] : memref<12x192xf32, #tpu.memory_space<vmem>>, vector<12x192xf32>
    %cst_80 = arith.constant dense<0.000000e+00> : vector<16x192xf32>
    %108 = tpu.matmul %106, %107, %cst_80 {dimension_numbers = #tpu.dot_dimension_numbers<[1], [0], [0], [1], [0, 0, 1, 1], [], []>} : vector<16x12xf32>, vector<12x192xf32>, vector<16x192xf32> -> vector<16x192xf32>
    %109 = vector.extract_strided_slice %40 {offsets = [0, 128], sizes = [16, 16], strides = [1, 1]} : vector<16x192xf32> to vector<16x16xf32>
    %c0_81 = arith.constant 0 : index
    %c0_82 = arith.constant 0 : index
    %110 = vector.load %arg9[%c0_81, %c0_82] : memref<16x192xf32, #tpu.memory_space<vmem>>, vector<16x192xf32>
    %cst_83 = arith.constant dense<0.000000e+00> : vector<16x192xf32>
    %111 = tpu.matmul %109, %110, %cst_83 {dimension_numbers = #tpu.dot_dimension_numbers<[1], [0], [0], [1], [0, 0, 1, 1], [], []>} : vector<16x16xf32>, vector<16x192xf32>, vector<16x192xf32> -> vector<16x192xf32>
    %112 = arith.mulf %108, %111 : vector<16x192xf32>
    %113 = arith.addf %105, %112 : vector<16x192xf32>
    %114 = vector.extract_strided_slice %33 {offsets = [0, 108], sizes = [16, 12], strides = [1, 1]} : vector<16x144xf32> to vector<16x12xf32>
    %c0_84 = arith.constant 0 : index
    %c0_85 = arith.constant 0 : index
    %115 = vector.load %arg8[%c0_84, %c0_85] : memref<12x192xf32, #tpu.memory_space<vmem>>, vector<12x192xf32>
    %cst_86 = arith.constant dense<0.000000e+00> : vector<16x192xf32>
    %116 = tpu.matmul %114, %115, %cst_86 {dimension_numbers = #tpu.dot_dimension_numbers<[1], [0], [0], [1], [0, 0, 1, 1], [], []>} : vector<16x12xf32>, vector<12x192xf32>, vector<16x192xf32> -> vector<16x192xf32>
    %117 = vector.extract_strided_slice %40 {offsets = [0, 144], sizes = [16, 16], strides = [1, 1]} : vector<16x192xf32> to vector<16x16xf32>
    %c0_87 = arith.constant 0 : index
    %c0_88 = arith.constant 0 : index
    %118 = vector.load %arg9[%c0_87, %c0_88] : memref<16x192xf32, #tpu.memory_space<vmem>>, vector<16x192xf32>
    %cst_89 = arith.constant dense<0.000000e+00> : vector<16x192xf32>
    %119 = tpu.matmul %117, %118, %cst_89 {dimension_numbers = #tpu.dot_dimension_numbers<[1], [0], [0], [1], [0, 0, 1, 1], [], []>} : vector<16x16xf32>, vector<16x192xf32>, vector<16x192xf32> -> vector<16x192xf32>
    %120 = arith.mulf %116, %119 : vector<16x192xf32>
    %121 = arith.addf %113, %120 : vector<16x192xf32>
    %122 = vector.extract_strided_slice %33 {offsets = [0, 120], sizes = [16, 12], strides = [1, 1]} : vector<16x144xf32> to vector<16x12xf32>
    %c0_90 = arith.constant 0 : index
    %c0_91 = arith.constant 0 : index
    %123 = vector.load %arg8[%c0_90, %c0_91] : memref<12x192xf32, #tpu.memory_space<vmem>>, vector<12x192xf32>
    %cst_92 = arith.constant dense<0.000000e+00> : vector<16x192xf32>
    %124 = tpu.matmul %122, %123, %cst_92 {dimension_numbers = #tpu.dot_dimension_numbers<[1], [0], [0], [1], [0, 0, 1, 1], [], []>} : vector<16x12xf32>, vector<12x192xf32>, vector<16x192xf32> -> vector<16x192xf32>
    %125 = vector.extract_strided_slice %40 {offsets = [0, 160], sizes = [16, 16], strides = [1, 1]} : vector<16x192xf32> to vector<16x16xf32>
    %c0_93 = arith.constant 0 : index
    %c0_94 = arith.constant 0 : index
    %126 = vector.load %arg9[%c0_93, %c0_94] : memref<16x192xf32, #tpu.memory_space<vmem>>, vector<16x192xf32>
    %cst_95 = arith.constant dense<0.000000e+00> : vector<16x192xf32>
    %127 = tpu.matmul %125, %126, %cst_95 {dimension_numbers = #tpu.dot_dimension_numbers<[1], [0], [0], [1], [0, 0, 1, 1], [], []>} : vector<16x16xf32>, vector<16x192xf32>, vector<16x192xf32> -> vector<16x192xf32>
    %128 = arith.mulf %124, %127 : vector<16x192xf32>
    %129 = arith.addf %121, %128 : vector<16x192xf32>
    %130 = vector.extract_strided_slice %33 {offsets = [0, 132], sizes = [16, 12], strides = [1, 1]} : vector<16x144xf32> to vector<16x12xf32>
    %c0_96 = arith.constant 0 : index
    %c0_97 = arith.constant 0 : index
    %131 = vector.load %arg8[%c0_96, %c0_97] : memref<12x192xf32, #tpu.memory_space<vmem>>, vector<12x192xf32>
    %cst_98 = arith.constant dense<0.000000e+00> : vector<16x192xf32>
    %132 = tpu.matmul %130, %131, %cst_98 {dimension_numbers = #tpu.dot_dimension_numbers<[1], [0], [0], [1], [0, 0, 1, 1], [], []>} : vector<16x12xf32>, vector<12x192xf32>, vector<16x192xf32> -> vector<16x192xf32>
    %133 = vector.extract_strided_slice %40 {offsets = [0, 176], sizes = [16, 16], strides = [1, 1]} : vector<16x192xf32> to vector<16x16xf32>
    %c0_99 = arith.constant 0 : index
    %c0_100 = arith.constant 0 : index
    %134 = vector.load %arg9[%c0_99, %c0_100] : memref<16x192xf32, #tpu.memory_space<vmem>>, vector<16x192xf32>
    %cst_101 = arith.constant dense<0.000000e+00> : vector<16x192xf32>
    %135 = tpu.matmul %133, %134, %cst_101 {dimension_numbers = #tpu.dot_dimension_numbers<[1], [0], [0], [1], [0, 0, 1, 1], [], []>} : vector<16x16xf32>, vector<16x192xf32>, vector<16x192xf32> -> vector<16x192xf32>
    %136 = arith.mulf %132, %135 : vector<16x192xf32>
    %137 = arith.addf %129, %136 : vector<16x192xf32>
    %c0_102 = arith.constant 0 : index
    %c0_103 = arith.constant 0 : index
    %138 = vector.load %arg10[%c0_102, %c0_103] : memref<192x64xf32, #tpu.memory_space<vmem>>, vector<192x64xf32>
    %cst_104 = arith.constant dense<0.000000e+00> : vector<16x64xf32>
    %139 = tpu.matmul %137, %138, %cst_104 {dimension_numbers = #tpu.dot_dimension_numbers<[1], [0], [0], [1], [0, 0, 1, 1], [], []>} : vector<16x192xf32>, vector<192x64xf32>, vector<16x64xf32> -> vector<16x64xf32>
    %c0_105 = arith.constant 0 : index
    %c0_106 = arith.constant 0 : index
    %140 = vector.load %arg11[%c0_105, %c0_106] : memref<16x64xf32, #tpu.memory_space<vmem>>, vector<16x64xf32>
    tpu.vector_store %arg11[%c0_105, %c0_106], %139 {strides = array<i32>} : memref<16x64xf32, #tpu.memory_space<vmem>>, vector<16x64xf32>,
    %c16_i32 = arith.constant 16 : i32
    %141 = arith.muli %arg0, %c16_i32 : i32
    %142 = tpu.iota {dimensions = array<i32: 0>} : vector<16x1xi32>
    %143 = vector.broadcast %141 : i32 to vector<16x1xi32>
    %144 = arith.addi %143, %142 : vector<16x1xi32>
    %c16_i32_107 = arith.constant 16 : i32
    %145 = vector.broadcast %c16_i32_107 : i32 to vector<16x1xi32>
    %146 = arith.cmpi slt, %144, %145 : vector<16x1xi32>
    %cst_108 = arith.constant 0.000000e+00 : f32
    %147 = vector.shape_cast %146 : vector<16x1xi1> to vector<16x1xi1>
    %148 = vector.broadcast %147 : vector<16x1xi1> to vector<16x64xi1>
    %149 = vector.broadcast %cst_108 : f32 to vector<16x64xf32>
    %150 = arith.select %148, %139, %149 : vector<16x64xi1>, vector<16x64xf32>
    %cst_109 = arith.constant dense<0.000000e+00> : vector<64xf32>
    %151 = vector.multi_reduction <add>, %150, %cst_109 [0] : vector<16x64xf32> to vector<64xf32>
    %152 = vector.shape_cast %151 : vector<64xf32> to vector<1x64xf32>
    %c0_110 = arith.constant 0 : index
    %c0_111 = arith.constant 0 : index
    %c0_112 = arith.constant 0 : index
    %153 = vector.load %arg12[%c0_110, %c0_111, %c0_112] : memref<1x2x64xf32, #tpu.memory_space<vmem>>, vector<1x1x64xf32>
    %154 = vector.shape_cast %153 : vector<1x1x64xf32> to vector<1x64xf32>
    %155 = vector.shape_cast %152 : vector<1x64xf32> to vector<1x1x64xf32>
    tpu.vector_store %arg12[%c0_110, %c0_111, %c0_112], %155 {strides = array<i32>} : memref<1x2x64xf32, #tpu.memory_space<vmem>>, vector<1x1x64xf32>,
    %156 = arith.mulf %150, %150 : vector<16x64xf32>
    %cst_113 = arith.constant dense<0.000000e+00> : vector<64xf32>
    %157 = vector.multi_reduction <add>, %156, %cst_113 [0] : vector<16x64xf32> to vector<64xf32>
    %158 = vector.shape_cast %157 : vector<64xf32> to vector<1x64xf32>
    %c0_114 = arith.constant 0 : index
    %c1 = arith.constant 1 : index
    %c0_115 = arith.constant 0 : index
    %159 = vector.load %arg12[%c0_114, %c1, %c0_115] : memref<1x2x64xf32, #tpu.memory_space<vmem>>, vector<1x1x64xf32>
    %160 = vector.shape_cast %159 : vector<1x1x64xf32> to vector<1x64xf32>
    %161 = vector.shape_cast %158 : vector<1x64xf32> to vector<1x1x64xf32>
    tpu.vector_store %arg12[%c0_114, %c1, %c0_115], %161 {strides = array<i32>} : memref<1x2x64xf32, #tpu.memory_space<vmem>>, vector<1x1x64xf32>,
    return
  }
  func.func @transform_0(%arg0: i32) -> (i32, i32) {
    %c0_i32 = arith.constant 0 : i32
    %c0_i32_0 = arith.constant 0 : i32
    return %arg0, %c0_i32 : i32, i32
  }
  func.func @transform_1(%arg0: i32) -> (i32, i32) {
    %c0_i32 = arith.constant 0 : i32
    %c0_i32_0 = arith.constant 0 : i32
    %c0_i32_1 = arith.constant 0 : i32
    return %c0_i32, %c0_i32_0 : i32, i32
  }
  func.func @transform_2(%arg0: i32) -> (i32, i32) {
    %c0_i32 = arith.constant 0 : i32
    %c0_i32_0 = arith.constant 0 : i32
    %c0_i32_1 = arith.constant 0 : i32
    return %c0_i32, %c0_i32_0 : i32, i32
  }
  func.func @transform_3(%arg0: i32) -> (i32, i32) {
    %c0_i32 = arith.constant 0 : i32
    %c0_i32_0 = arith.constant 0 : i32
    %c0_i32_1 = arith.constant 0 : i32
    return %c0_i32, %c0_i32_0 : i32, i32
  }
  func.func @transform_4(%arg0: i32) -> (i32, i32) {
    %c0_i32 = arith.constant 0 : i32
    %c0_i32_0 = arith.constant 0 : i32
    %c0_i32_1 = arith.constant 0 : i32
    return %c0_i32, %c0_i32_0 : i32, i32
  }
  func.func @transform_5(%arg0: i32) -> (i32, i32) {
    %c0_i32 = arith.constant 0 : i32
    %c0_i32_0 = arith.constant 0 : i32
    %c0_i32_1 = arith.constant 0 : i32
    return %c0_i32, %c0_i32_0 : i32, i32
  }
  func.func @transform_6(%arg0: i32) -> (i32, i32) {
    %c0_i32 = arith.constant 0 : i32
    %c0_i32_0 = arith.constant 0 : i32
    %c0_i32_1 = arith.constant 0 : i32
    return %c0_i32, %c0_i32_0 : i32, i32
  }
  func.func @transform_7(%arg0: i32) -> (i32, i32) {
    %c0_i32 = arith.constant 0 : i32
    %c0_i32_0 = arith.constant 0 : i32
    %c0_i32_1 = arith.constant 0 : i32
    return %c0_i32, %c0_i32_0 : i32, i32
  }
  func.func @transform_8(%arg0: i32) -> (i32, i32) {
    %c0_i32 = arith.constant 0 : i32
    %c0_i32_0 = arith.constant 0 : i32
    %c0_i32_1 = arith.constant 0 : i32
    return %c0_i32, %c0_i32_0 : i32, i32
  }
  func.func @transform_9(%arg0: i32) -> (i32, i32) {
    %c0_i32 = arith.constant 0 : i32
    %c0_i32_0 = arith.constant 0 : i32
    %c0_i32_1 = arith.constant 0 : i32
    return %c0_i32, %c0_i32_0 : i32, i32
  }
  func.func @transform_10(%arg0: i32) -> (i32, i32) {
    %c0_i32 = arith.constant 0 : i32
    %c0_i32_0 = arith.constant 0 : i32
    return %arg0, %c0_i32 : i32, i32
  }
  func.func @transform_11(%arg0: i32) -> (i32, i32, i32) {
    %c0_i32 = arith.constant 0 : i32
    %c0_i32_0 = arith.constant 0 : i32
    %c0_i32_1 = arith.constant 0 : i32
    return %arg0, %c0_i32, %c0_i32_0 : i32, i32, i32
  }
}

module attributes {stable_mosaic.version = 11 : i64} {
  func.func @_bn_stats_kernel(%arg0: i32, %arg1: i32, %arg2: memref<4x64xf32, #tpu.memory_space<vmem>>, %arg3: memref<3x64x64xf32, #tpu.memory_space<vmem>>, %arg4: memref<3x64x64xf32, #tpu.memory_space<vmem>>, %arg5: memref<1x8x64xf32, #tpu.memory_space<vmem>>, %arg6: memref<4x64xf32, #tpu.memory_space<vmem>>, %arg7: memref<12x64xf32, #tpu.memory_space<vmem>>) attributes {dimension_semantics = [#tpu.dimension_semantics<arbitrary>, #tpu.dimension_semantics<arbitrary>], iteration_bounds = array<i64: 2, 2>, scalar_prefetch = 0 : i64, scratch_operands = 1 : i64, tpu.core_type = #tpu.core_type<tc>, window_params = [{pipeline_mode = #tpu.pipeline_mode<synchronous>, transform_indices = @transform_0, window_bounds = array<i64: 4, 64>}, {pipeline_mode = #tpu.pipeline_mode<synchronous>, transform_indices = @transform_1, window_bounds = array<i64: 3, 64, 64>}, {pipeline_mode = #tpu.pipeline_mode<synchronous>, transform_indices = @transform_2, window_bounds = array<i64: 3, 64, 64>}, {transform_indices = @transform_3, window_bounds = array<i64: 1, 8, 64>}, {pipeline_mode = #tpu.pipeline_mode<synchronous>, transform_indices = @transform_4, window_bounds = array<i64: 4, 64>}]} {
    %c0_i32 = arith.constant 0 : i32
    %0 = arith.cmpi eq, %arg0, %c0_i32 : i32
    %c0_i32_0 = arith.constant 0 : i32
    %1 = arith.cmpi eq, %arg1, %c0_i32_0 : i32
    %2 = arith.andi %0, %1 : i1
    %3 = arith.extui %2 : i1 to i32
    %c0_i32_1 = arith.constant 0 : i32
    %4 = arith.cmpi ne, %3, %c0_i32_1 : i32
    scf.if %4 {
      %cst_31 = arith.constant 0.000000e+00 : f32
      %39 = vector.broadcast %cst_31 : f32 to vector<4x64xf32>
      %c0_32 = arith.constant 0 : index
      %c0_33 = arith.constant 0 : index
      %40 = vector.load %arg6[%c0_32, %c0_33] : memref<4x64xf32, #tpu.memory_space<vmem>>, vector<4x64xf32>
      tpu.vector_store %arg6[%c0_32, %c0_33], %39 {strides = array<i32>} : memref<4x64xf32, #tpu.memory_space<vmem>>, vector<4x64xf32>,
    } else {
    }
    %cst = arith.constant 0.000000e+00 : f32
    %5 = vector.broadcast %cst : f32 to vector<2x64xf32>
    %c0 = arith.constant 0 : index
    %c0_2 = arith.constant 0 : index
    %6 = vector.load %arg7[%c0, %c0_2] : memref<12x64xf32, #tpu.memory_space<vmem>>, vector<2x64xf32>
    tpu.vector_store %arg7[%c0, %c0_2], %5 {strides = array<i32>} : memref<12x64xf32, #tpu.memory_space<vmem>>, vector<2x64xf32>,
    %cst_3 = arith.constant 0.000000e+00 : f32
    %7 = vector.broadcast %cst_3 : f32 to vector<2x64xf32>
    %c10 = arith.constant 10 : index
    %c0_4 = arith.constant 0 : index
    %8 = vector.load %arg7[%c10, %c0_4] : memref<12x64xf32, #tpu.memory_space<vmem>>, vector<2x64xf32>
    tpu.vector_store %arg7[%c10, %c0_4], %7 {strides = array<i32>} : memref<12x64xf32, #tpu.memory_space<vmem>>, vector<2x64xf32>,
    %c0_5 = arith.constant 0 : index
    %c0_6 = arith.constant 0 : index
    %c0_7 = arith.constant 0 : index
    %9 = vector.load %arg5[%c0_5, %c0_6, %c0_7] : memref<1x8x64xf32, #tpu.memory_space<vmem>>, vector<1x8x64xf32>
    %10 = vector.shape_cast %9 : vector<1x8x64xf32> to vector<8x64xf32>
    %c0_8 = arith.constant 0 : index
    %c0_9 = arith.constant 0 : index
    %11 = vector.load %arg2[%c0_8, %c0_9] : memref<4x64xf32, #tpu.memory_space<vmem>>, vector<1x64xf32>
    %12 = vector.broadcast %11 : vector<1x64xf32> to vector<8x64xf32>
    %13 = arith.mulf %10, %12 : vector<8x64xf32>
    %c1 = arith.constant 1 : index
    %c0_10 = arith.constant 0 : index
    %14 = vector.load %arg2[%c1, %c0_10] : memref<4x64xf32, #tpu.memory_space<vmem>>, vector<1x64xf32>
    %15 = vector.broadcast %14 : vector<1x64xf32> to vector<8x64xf32>
    %16 = arith.addf %13, %15 : vector<8x64xf32>
    %cst_11 = arith.constant 0.000000e+00 : f32
    %17 = vector.broadcast %cst_11 : f32 to vector<8x64xf32>
    %18 = arith.maximumf %16, %17 : vector<8x64xf32>
    %c2 = arith.constant 2 : index
    %c0_12 = arith.constant 0 : index
    %19 = vector.load %arg7[%c2, %c0_12] : memref<12x64xf32, #tpu.memory_space<vmem>>, vector<8x64xf32>
    tpu.vector_store %arg7[%c2, %c0_12], %18 {strides = array<i32>} : memref<12x64xf32, #tpu.memory_space<vmem>>, vector<8x64xf32>,
    %c1_13 = arith.constant 1 : index
    %c0_14 = arith.constant 0 : index
    %20 = vector.load %arg7[%c1_13, %c0_14] : memref<12x64xf32, #tpu.memory_space<vmem>>, vector<8x64xf32>
    %c0_15 = arith.constant 0 : index
    %c0_16 = arith.constant 0 : index
    %c0_17 = arith.constant 0 : index
    %21 = vector.load %arg3[%c0_15, %c0_16, %c0_17] : memref<3x64x64xf32, #tpu.memory_space<vmem>>, vector<1x64x64xf32>
    %22 = vector.shape_cast %21 : vector<1x64x64xf32> to vector<64x64xf32>
    %cst_18 = arith.constant dense<0.000000e+00> : vector<8x64xf32>
    %23 = tpu.matmul %20, %22, %cst_18 {dimension_numbers = #tpu.dot_dimension_numbers<[1], [0], [0], [1], [0, 0, 1, 1], [], []>} : vector<8x64xf32>, vector<64x64xf32>, vector<8x64xf32> -> vector<8x64xf32>
    %c1_19 = arith.constant 1 : index
    %c0_20 = arith.constant 0 : index
    %c0_21 = arith.constant 0 : index
    %24 = vector.load %arg3[%c1_19, %c0_20, %c0_21] : memref<3x64x64xf32, #tpu.memory_space<vmem>>, vector<1x64x64xf32>
    %25 = vector.shape_cast %24 : vector<1x64x64xf32> to vector<64x64xf32>
    %cst_22 = arith.constant dense<0.000000e+00> : vector<8x64xf32>
    %26 = tpu.matmul %18, %25, %cst_22 {dimension_numbers = #tpu.dot_dimension_numbers<[1], [0], [0], [1], [0, 0, 1, 1], [], []>} : vector<8x64xf32>, vector<64x64xf32>, vector<8x64xf32> -> vector<8x64xf32>
    %27 = arith.addf %23, %26 : vector<8x64xf32>
    %c3 = arith.constant 3 : index
    %c0_23 = arith.constant 0 : index
    %28 = vector.load %arg7[%c3, %c0_23] : memref<12x64xf32, #tpu.memory_space<vmem>>, vector<8x64xf32>
    %c2_24 = arith.constant 2 : index
    %c0_25 = arith.constant 0 : index
    %c0_26 = arith.constant 0 : index
    %29 = vector.load %arg3[%c2_24, %c0_25, %c0_26] : memref<3x64x64xf32, #tpu.memory_space<vmem>>, vector<1x64x64xf32>
    %30 = vector.shape_cast %29 : vector<1x64x64xf32> to vector<64x64xf32>
    %cst_27 = arith.constant dense<0.000000e+00> : vector<8x64xf32>
    %31 = tpu.matmul %28, %30, %cst_27 {dimension_numbers = #tpu.dot_dimension_numbers<[1], [0], [0], [1], [0, 0, 1, 1], [], []>} : vector<8x64xf32>, vector<64x64xf32>, vector<8x64xf32> -> vector<8x64xf32>
    %32 = arith.addf %27, %31 : vector<8x64xf32>
    %c0_i32_28 = arith.constant 0 : i32
    %33 = arith.cmpi eq, %arg0, %c0_i32_28 : i32
    %34 = arith.extui %33 : i1 to i32
    %c0_i32_29 = arith.constant 0 : i32
    %35 = arith.cmpi ne, %34, %c0_i32_29 : i32
    scf.if %35 {
      %c0_31 = arith.constant 0 : index
      %c0_32 = arith.constant 0 : index
      %39 = vector.load %arg6[%c0_31, %c0_32] : memref<4x64xf32, #tpu.memory_space<vmem>>, vector<1x64xf32>
      %cst_33 = arith.constant dense<0.000000e+00> : vector<64xf32>
      %40 = vector.multi_reduction <add>, %32, %cst_33 [0] : vector<8x64xf32> to vector<64xf32>
      %41 = vector.shape_cast %40 : vector<64xf32> to vector<1x64xf32>
      %42 = arith.addf %39, %41 : vector<1x64xf32>
      %c0_34 = arith.constant 0 : index
      %c0_35 = arith.constant 0 : index
      %43 = vector.load %arg6[%c0_34, %c0_35] : memref<4x64xf32, #tpu.memory_space<vmem>>, vector<1x64xf32>
      tpu.vector_store %arg6[%c0_34, %c0_35], %42 {strides = array<i32>} : memref<4x64xf32, #tpu.memory_space<vmem>>, vector<1x64xf32>,
      %c1_36 = arith.constant 1 : index
      %c0_37 = arith.constant 0 : index
      %44 = vector.load %arg6[%c1_36, %c0_37] : memref<4x64xf32, #tpu.memory_space<vmem>>, vector<1x64xf32>
      %45 = arith.mulf %32, %32 : vector<8x64xf32>
      %cst_38 = arith.constant dense<0.000000e+00> : vector<64xf32>
      %46 = vector.multi_reduction <add>, %45, %cst_38 [0] : vector<8x64xf32> to vector<64xf32>
      %47 = vector.shape_cast %46 : vector<64xf32> to vector<1x64xf32>
      %48 = arith.addf %44, %47 : vector<1x64xf32>
      %c1_39 = arith.constant 1 : index
      %c0_40 = arith.constant 0 : index
      %49 = vector.load %arg6[%c1_39, %c0_40] : memref<4x64xf32, #tpu.memory_space<vmem>>, vector<1x64xf32>
      tpu.vector_store %arg6[%c1_39, %c0_40], %48 {strides = array<i32>} : memref<4x64xf32, #tpu.memory_space<vmem>>, vector<1x64xf32>,
    } else {
    }
    %c1_i32 = arith.constant 1 : i32
    %36 = arith.cmpi eq, %arg0, %c1_i32 : i32
    %37 = arith.extui %36 : i1 to i32
    %c0_i32_30 = arith.constant 0 : i32
    %38 = arith.cmpi ne, %37, %c0_i32_30 : i32
    scf.if %38 {
      %c0_31 = arith.constant 0 : index
      %c0_32 = arith.constant 0 : index
      %39 = vector.load %arg6[%c0_31, %c0_32] : memref<4x64xf32, #tpu.memory_space<vmem>>, vector<1x64xf32>
      %cst_33 = arith.constant 6.250000e-02 : f32
      %40 = vector.broadcast %cst_33 : f32 to vector<1x64xf32>
      %41 = arith.mulf %39, %40 : vector<1x64xf32>
      %c1_34 = arith.constant 1 : index
      %c0_35 = arith.constant 0 : index
      %42 = vector.load %arg6[%c1_34, %c0_35] : memref<4x64xf32, #tpu.memory_space<vmem>>, vector<1x64xf32>
      %cst_36 = arith.constant 6.250000e-02 : f32
      %43 = vector.broadcast %cst_36 : f32 to vector<1x64xf32>
      %44 = arith.mulf %42, %43 : vector<1x64xf32>
      %45 = arith.mulf %41, %41 : vector<1x64xf32>
      %46 = arith.subf %44, %45 : vector<1x64xf32>
      %c2_37 = arith.constant 2 : index
      %c0_38 = arith.constant 0 : index
      %47 = vector.load %arg2[%c2_37, %c0_38] : memref<4x64xf32, #tpu.memory_space<vmem>>, vector<1x64xf32>
      %cst_39 = arith.constant 9.99999974E-6 : f32
      %48 = vector.broadcast %cst_39 : f32 to vector<1x64xf32>
      %49 = arith.addf %46, %48 : vector<1x64xf32>
      %50 = math.rsqrt %49 : vector<1x64xf32>
      %51 = arith.mulf %47, %50 : vector<1x64xf32>
      %c3_40 = arith.constant 3 : index
      %c0_41 = arith.constant 0 : index
      %52 = vector.load %arg2[%c3_40, %c0_41] : memref<4x64xf32, #tpu.memory_space<vmem>>, vector<1x64xf32>
      %53 = arith.mulf %41, %51 : vector<1x64xf32>
      %54 = arith.subf %52, %53 : vector<1x64xf32>
      %55 = vector.broadcast %51 : vector<1x64xf32> to vector<8x64xf32>
      %56 = arith.mulf %32, %55 : vector<8x64xf32>
      %57 = vector.broadcast %54 : vector<1x64xf32> to vector<8x64xf32>
      %58 = arith.addf %56, %57 : vector<8x64xf32>
      %cst_42 = arith.constant 0.000000e+00 : f32
      %59 = vector.broadcast %cst_42 : f32 to vector<8x64xf32>
      %60 = arith.maximumf %58, %59 : vector<8x64xf32>
      %c2_43 = arith.constant 2 : index
      %c0_44 = arith.constant 0 : index
      %61 = vector.load %arg7[%c2_43, %c0_44] : memref<12x64xf32, #tpu.memory_space<vmem>>, vector<8x64xf32>
      tpu.vector_store %arg7[%c2_43, %c0_44], %60 {strides = array<i32>} : memref<12x64xf32, #tpu.memory_space<vmem>>, vector<8x64xf32>,
      %c0_45 = arith.constant 0 : index
      %c0_46 = arith.constant 0 : index
      %62 = vector.load %arg7[%c0_45, %c0_46] : memref<12x64xf32, #tpu.memory_space<vmem>>, vector<8x64xf32>
      %c0_47 = arith.constant 0 : index
      %c0_48 = arith.constant 0 : index
      %c0_49 = arith.constant 0 : index
      %63 = vector.load %arg4[%c0_47, %c0_48, %c0_49] : memref<3x64x64xf32, #tpu.memory_space<vmem>>, vector<1x64x64xf32>
      %64 = vector.shape_cast %63 : vector<1x64x64xf32> to vector<64x64xf32>
      %cst_50 = arith.constant dense<0.000000e+00> : vector<8x64xf32>
      %65 = tpu.matmul %62, %64, %cst_50 {dimension_numbers = #tpu.dot_dimension_numbers<[1], [0], [0], [1], [0, 0, 1, 1], [], []>} : vector<8x64xf32>, vector<64x64xf32>, vector<8x64xf32> -> vector<8x64xf32>
      %c1_51 = arith.constant 1 : index
      %c0_52 = arith.constant 0 : index
      %c0_53 = arith.constant 0 : index
      %66 = vector.load %arg4[%c1_51, %c0_52, %c0_53] : memref<3x64x64xf32, #tpu.memory_space<vmem>>, vector<1x64x64xf32>
      %67 = vector.shape_cast %66 : vector<1x64x64xf32> to vector<64x64xf32>
      %cst_54 = arith.constant dense<0.000000e+00> : vector<8x64xf32>
      %68 = tpu.matmul %60, %67, %cst_54 {dimension_numbers = #tpu.dot_dimension_numbers<[1], [0], [0], [1], [0, 0, 1, 1], [], []>} : vector<8x64xf32>, vector<64x64xf32>, vector<8x64xf32> -> vector<8x64xf32>
      %69 = arith.addf %65, %68 : vector<8x64xf32>
      %c4 = arith.constant 4 : index
      %c0_55 = arith.constant 0 : index
      %70 = vector.load %arg7[%c4, %c0_55] : memref<12x64xf32, #tpu.memory_space<vmem>>, vector<8x64xf32>
      %c2_56 = arith.constant 2 : index
      %c0_57 = arith.constant 0 : index
      %c0_58 = arith.constant 0 : index
      %71 = vector.load %arg4[%c2_56, %c0_57, %c0_58] : memref<3x64x64xf32, #tpu.memory_space<vmem>>, vector<1x64x64xf32>
      %72 = vector.shape_cast %71 : vector<1x64x64xf32> to vector<64x64xf32>
      %cst_59 = arith.constant dense<0.000000e+00> : vector<8x64xf32>
      %73 = tpu.matmul %70, %72, %cst_59 {dimension_numbers = #tpu.dot_dimension_numbers<[1], [0], [0], [1], [0, 0, 1, 1], [], []>} : vector<8x64xf32>, vector<64x64xf32>, vector<8x64xf32> -> vector<8x64xf32>
      %74 = arith.addf %69, %73 : vector<8x64xf32>
      %c2_60 = arith.constant 2 : index
      %c0_61 = arith.constant 0 : index
      %75 = vector.load %arg6[%c2_60, %c0_61] : memref<4x64xf32, #tpu.memory_space<vmem>>, vector<1x64xf32>
      %cst_62 = arith.constant dense<0.000000e+00> : vector<64xf32>
      %76 = vector.multi_reduction <add>, %74, %cst_62 [0] : vector<8x64xf32> to vector<64xf32>
      %77 = vector.shape_cast %76 : vector<64xf32> to vector<1x64xf32>
      %78 = arith.addf %75, %77 : vector<1x64xf32>
      %c2_63 = arith.constant 2 : index
      %c0_64 = arith.constant 0 : index
      %79 = vector.load %arg6[%c2_63, %c0_64] : memref<4x64xf32, #tpu.memory_space<vmem>>, vector<1x64xf32>
      tpu.vector_store %arg6[%c2_63, %c0_64], %78 {strides = array<i32>} : memref<4x64xf32, #tpu.memory_space<vmem>>, vector<1x64xf32>,
      %c3_65 = arith.constant 3 : index
      %c0_66 = arith.constant 0 : index
      %80 = vector.load %arg6[%c3_65, %c0_66] : memref<4x64xf32, #tpu.memory_space<vmem>>, vector<1x64xf32>
      %81 = arith.mulf %74, %74 : vector<8x64xf32>
      %cst_67 = arith.constant dense<0.000000e+00> : vector<64xf32>
      %82 = vector.multi_reduction <add>, %81, %cst_67 [0] : vector<8x64xf32> to vector<64xf32>
      %83 = vector.shape_cast %82 : vector<64xf32> to vector<1x64xf32>
      %84 = arith.addf %80, %83 : vector<1x64xf32>
      %c3_68 = arith.constant 3 : index
      %c0_69 = arith.constant 0 : index
      %85 = vector.load %arg6[%c3_68, %c0_69] : memref<4x64xf32, #tpu.memory_space<vmem>>, vector<1x64xf32>
      tpu.vector_store %arg6[%c3_68, %c0_69], %84 {strides = array<i32>} : memref<4x64xf32, #tpu.memory_space<vmem>>, vector<1x64xf32>,
    } else {
    }
    return
  }
  func.func @transform_0(%arg0: i32, %arg1: i32) -> (i32, i32) {
    %c0_i32 = arith.constant 0 : i32
    %c0_i32_0 = arith.constant 0 : i32
    %c0_i32_1 = arith.constant 0 : i32
    return %c0_i32, %c0_i32_0 : i32, i32
  }
  func.func @transform_1(%arg0: i32, %arg1: i32) -> (i32, i32, i32) {
    %c0_i32 = arith.constant 0 : i32
    %c0_i32_0 = arith.constant 0 : i32
    %c0_i32_1 = arith.constant 0 : i32
    %c0_i32_2 = arith.constant 0 : i32
    return %c0_i32, %c0_i32_0, %c0_i32_1 : i32, i32, i32
  }
  func.func @transform_2(%arg0: i32, %arg1: i32) -> (i32, i32, i32) {
    %c0_i32 = arith.constant 0 : i32
    %c0_i32_0 = arith.constant 0 : i32
    %c0_i32_1 = arith.constant 0 : i32
    %c0_i32_2 = arith.constant 0 : i32
    return %c0_i32, %c0_i32_0, %c0_i32_1 : i32, i32, i32
  }
  func.func @transform_3(%arg0: i32, %arg1: i32) -> (i32, i32, i32) {
    %c0_i32 = arith.constant 0 : i32
    %c0_i32_0 = arith.constant 0 : i32
    %c0_i32_1 = arith.constant 0 : i32
    return %arg1, %c0_i32, %c0_i32_0 : i32, i32, i32
  }
  func.func @transform_4(%arg0: i32, %arg1: i32) -> (i32, i32) {
    %c0_i32 = arith.constant 0 : i32
    %c0_i32_0 = arith.constant 0 : i32
    %c0_i32_1 = arith.constant 0 : i32
    return %c0_i32, %c0_i32_0 : i32, i32
  }
}

module attributes {stable_mosaic.version = 11 : i64} {
  func.func @_conv_final_kernel(%arg0: i32, %arg1: memref<6x64xf32, #tpu.memory_space<vmem>>, %arg2: memref<3x64x64xf32, #tpu.memory_space<vmem>>, %arg3: memref<3x64x64xf32, #tpu.memory_space<vmem>>, %arg4: memref<3x64x10xf32, #tpu.memory_space<vmem>>, %arg5: memref<1x8x64xf32, #tpu.memory_space<vmem>>, %arg6: memref<1x10x8xf32, #tpu.memory_space<vmem>>, %arg7: memref<12x64xf32, #tpu.memory_space<vmem>>) attributes {dimension_semantics = [#tpu.dimension_semantics<parallel>], iteration_bounds = array<i64: 2>, scalar_prefetch = 0 : i64, scratch_operands = 1 : i64, tpu.core_type = #tpu.core_type<tc>, window_params = [{pipeline_mode = #tpu.pipeline_mode<synchronous>, transform_indices = @transform_0, window_bounds = array<i64: 6, 64>}, {pipeline_mode = #tpu.pipeline_mode<synchronous>, transform_indices = @transform_1, window_bounds = array<i64: 3, 64, 64>}, {pipeline_mode = #tpu.pipeline_mode<synchronous>, transform_indices = @transform_2, window_bounds = array<i64: 3, 64, 64>}, {pipeline_mode = #tpu.pipeline_mode<synchronous>, transform_indices = @transform_3, window_bounds = array<i64: 3, 64, 10>}, {transform_indices = @transform_4, window_bounds = array<i64: 1, 8, 64>}, {transform_indices = @transform_5, window_bounds = array<i64: 1, 10, 8>}]} {
    %cst = arith.constant 0.000000e+00 : f32
    %0 = vector.broadcast %cst : f32 to vector<2x64xf32>
    %c0 = arith.constant 0 : index
    %c0_0 = arith.constant 0 : index
    %1 = vector.load %arg7[%c0, %c0_0] : memref<12x64xf32, #tpu.memory_space<vmem>>, vector<2x64xf32>
    tpu.vector_store %arg7[%c0, %c0_0], %0 {strides = array<i32>} : memref<12x64xf32, #tpu.memory_space<vmem>>, vector<2x64xf32>,
    %cst_1 = arith.constant 0.000000e+00 : f32
    %2 = vector.broadcast %cst_1 : f32 to vector<2x64xf32>
    %c10 = arith.constant 10 : index
    %c0_2 = arith.constant 0 : index
    %3 = vector.load %arg7[%c10, %c0_2] : memref<12x64xf32, #tpu.memory_space<vmem>>, vector<2x64xf32>
    tpu.vector_store %arg7[%c10, %c0_2], %2 {strides = array<i32>} : memref<12x64xf32, #tpu.memory_space<vmem>>, vector<2x64xf32>,
    %c0_3 = arith.constant 0 : index
    %c0_4 = arith.constant 0 : index
    %c0_5 = arith.constant 0 : index
    %4 = vector.load %arg5[%c0_3, %c0_4, %c0_5] : memref<1x8x64xf32, #tpu.memory_space<vmem>>, vector<1x8x64xf32>
    %5 = vector.shape_cast %4 : vector<1x8x64xf32> to vector<8x64xf32>
    %c0_6 = arith.constant 0 : index
    %c0_7 = arith.constant 0 : index
    %6 = vector.load %arg1[%c0_6, %c0_7] : memref<6x64xf32, #tpu.memory_space<vmem>>, vector<1x64xf32>
    %7 = vector.broadcast %6 : vector<1x64xf32> to vector<8x64xf32>
    %8 = arith.mulf %5, %7 : vector<8x64xf32>
    %c1 = arith.constant 1 : index
    %c0_8 = arith.constant 0 : index
    %9 = vector.load %arg1[%c1, %c0_8] : memref<6x64xf32, #tpu.memory_space<vmem>>, vector<1x64xf32>
    %10 = vector.broadcast %9 : vector<1x64xf32> to vector<8x64xf32>
    %11 = arith.addf %8, %10 : vector<8x64xf32>
    %cst_9 = arith.constant 0.000000e+00 : f32
    %12 = vector.broadcast %cst_9 : f32 to vector<8x64xf32>
    %13 = arith.maximumf %11, %12 : vector<8x64xf32>
    %c2 = arith.constant 2 : index
    %c0_10 = arith.constant 0 : index
    %14 = vector.load %arg7[%c2, %c0_10] : memref<12x64xf32, #tpu.memory_space<vmem>>, vector<8x64xf32>
    tpu.vector_store %arg7[%c2, %c0_10], %13 {strides = array<i32>} : memref<12x64xf32, #tpu.memory_space<vmem>>, vector<8x64xf32>,
    %c1_11 = arith.constant 1 : index
    %c0_12 = arith.constant 0 : index
    %15 = vector.load %arg7[%c1_11, %c0_12] : memref<12x64xf32, #tpu.memory_space<vmem>>, vector<8x64xf32>
    %c0_13 = arith.constant 0 : index
    %c0_14 = arith.constant 0 : index
    %c0_15 = arith.constant 0 : index
    %16 = vector.load %arg2[%c0_13, %c0_14, %c0_15] : memref<3x64x64xf32, #tpu.memory_space<vmem>>, vector<1x64x64xf32>
    %17 = vector.shape_cast %16 : vector<1x64x64xf32> to vector<64x64xf32>
    %cst_16 = arith.constant dense<0.000000e+00> : vector<8x64xf32>
    %18 = tpu.matmul %15, %17, %cst_16 {dimension_numbers = #tpu.dot_dimension_numbers<[1], [0], [0], [1], [0, 0, 1, 1], [], []>} : vector<8x64xf32>, vector<64x64xf32>, vector<8x64xf32> -> vector<8x64xf32>
    %c1_17 = arith.constant 1 : index
    %c0_18 = arith.constant 0 : index
    %c0_19 = arith.constant 0 : index
    %19 = vector.load %arg2[%c1_17, %c0_18, %c0_19] : memref<3x64x64xf32, #tpu.memory_space<vmem>>, vector<1x64x64xf32>
    %20 = vector.shape_cast %19 : vector<1x64x64xf32> to vector<64x64xf32>
    %cst_20 = arith.constant dense<0.000000e+00> : vector<8x64xf32>
    %21 = tpu.matmul %13, %20, %cst_20 {dimension_numbers = #tpu.dot_dimension_numbers<[1], [0], [0], [1], [0, 0, 1, 1], [], []>} : vector<8x64xf32>, vector<64x64xf32>, vector<8x64xf32> -> vector<8x64xf32>
    %22 = arith.addf %18, %21 : vector<8x64xf32>
    %c3 = arith.constant 3 : index
    %c0_21 = arith.constant 0 : index
    %23 = vector.load %arg7[%c3, %c0_21] : memref<12x64xf32, #tpu.memory_space<vmem>>, vector<8x64xf32>
    %c2_22 = arith.constant 2 : index
    %c0_23 = arith.constant 0 : index
    %c0_24 = arith.constant 0 : index
    %24 = vector.load %arg2[%c2_22, %c0_23, %c0_24] : memref<3x64x64xf32, #tpu.memory_space<vmem>>, vector<1x64x64xf32>
    %25 = vector.shape_cast %24 : vector<1x64x64xf32> to vector<64x64xf32>
    %cst_25 = arith.constant dense<0.000000e+00> : vector<8x64xf32>
    %26 = tpu.matmul %23, %25, %cst_25 {dimension_numbers = #tpu.dot_dimension_numbers<[1], [0], [0], [1], [0, 0, 1, 1], [], []>} : vector<8x64xf32>, vector<64x64xf32>, vector<8x64xf32> -> vector<8x64xf32>
    %27 = arith.addf %22, %26 : vector<8x64xf32>
    %c2_26 = arith.constant 2 : index
    %c0_27 = arith.constant 0 : index
    %28 = vector.load %arg1[%c2_26, %c0_27] : memref<6x64xf32, #tpu.memory_space<vmem>>, vector<1x64xf32>
    %29 = vector.broadcast %28 : vector<1x64xf32> to vector<8x64xf32>
    %30 = arith.mulf %27, %29 : vector<8x64xf32>
    %c3_28 = arith.constant 3 : index
    %c0_29 = arith.constant 0 : index
    %31 = vector.load %arg1[%c3_28, %c0_29] : memref<6x64xf32, #tpu.memory_space<vmem>>, vector<1x64xf32>
    %32 = vector.broadcast %31 : vector<1x64xf32> to vector<8x64xf32>
    %33 = arith.addf %30, %32 : vector<8x64xf32>
    %cst_30 = arith.constant 0.000000e+00 : f32
    %34 = vector.broadcast %cst_30 : f32 to vector<8x64xf32>
    %35 = arith.maximumf %33, %34 : vector<8x64xf32>
    %c2_31 = arith.constant 2 : index
    %c0_32 = arith.constant 0 : index
    %36 = vector.load %arg7[%c2_31, %c0_32] : memref<12x64xf32, #tpu.memory_space<vmem>>, vector<8x64xf32>
    tpu.vector_store %arg7[%c2_31, %c0_32], %35 {strides = array<i32>} : memref<12x64xf32, #tpu.memory_space<vmem>>, vector<8x64xf32>,
    %c0_33 = arith.constant 0 : index
    %c0_34 = arith.constant 0 : index
    %37 = vector.load %arg7[%c0_33, %c0_34] : memref<12x64xf32, #tpu.memory_space<vmem>>, vector<8x64xf32>
    %c0_35 = arith.constant 0 : index
    %c0_36 = arith.constant 0 : index
    %c0_37 = arith.constant 0 : index
    %38 = vector.load %arg3[%c0_35, %c0_36, %c0_37] : memref<3x64x64xf32, #tpu.memory_space<vmem>>, vector<1x64x64xf32>
    %39 = vector.shape_cast %38 : vector<1x64x64xf32> to vector<64x64xf32>
    %cst_38 = arith.constant dense<0.000000e+00> : vector<8x64xf32>
    %40 = tpu.matmul %37, %39, %cst_38 {dimension_numbers = #tpu.dot_dimension_numbers<[1], [0], [0], [1], [0, 0, 1, 1], [], []>} : vector<8x64xf32>, vector<64x64xf32>, vector<8x64xf32> -> vector<8x64xf32>
    %c1_39 = arith.constant 1 : index
    %c0_40 = arith.constant 0 : index
    %c0_41 = arith.constant 0 : index
    %41 = vector.load %arg3[%c1_39, %c0_40, %c0_41] : memref<3x64x64xf32, #tpu.memory_space<vmem>>, vector<1x64x64xf32>
    %42 = vector.shape_cast %41 : vector<1x64x64xf32> to vector<64x64xf32>
    %cst_42 = arith.constant dense<0.000000e+00> : vector<8x64xf32>
    %43 = tpu.matmul %35, %42, %cst_42 {dimension_numbers = #tpu.dot_dimension_numbers<[1], [0], [0], [1], [0, 0, 1, 1], [], []>} : vector<8x64xf32>, vector<64x64xf32>, vector<8x64xf32> -> vector<8x64xf32>
    %44 = arith.addf %40, %43 : vector<8x64xf32>
    %c4 = arith.constant 4 : index
    %c0_43 = arith.constant 0 : index
    %45 = vector.load %arg7[%c4, %c0_43] : memref<12x64xf32, #tpu.memory_space<vmem>>, vector<8x64xf32>
    %c2_44 = arith.constant 2 : index
    %c0_45 = arith.constant 0 : index
    %c0_46 = arith.constant 0 : index
    %46 = vector.load %arg3[%c2_44, %c0_45, %c0_46] : memref<3x64x64xf32, #tpu.memory_space<vmem>>, vector<1x64x64xf32>
    %47 = vector.shape_cast %46 : vector<1x64x64xf32> to vector<64x64xf32>
    %cst_47 = arith.constant dense<0.000000e+00> : vector<8x64xf32>
    %48 = tpu.matmul %45, %47, %cst_47 {dimension_numbers = #tpu.dot_dimension_numbers<[1], [0], [0], [1], [0, 0, 1, 1], [], []>} : vector<8x64xf32>, vector<64x64xf32>, vector<8x64xf32> -> vector<8x64xf32>
    %49 = arith.addf %44, %48 : vector<8x64xf32>
    %c4_48 = arith.constant 4 : index
    %c0_49 = arith.constant 0 : index
    %50 = vector.load %arg1[%c4_48, %c0_49] : memref<6x64xf32, #tpu.memory_space<vmem>>, vector<1x64xf32>
    %51 = vector.broadcast %50 : vector<1x64xf32> to vector<8x64xf32>
    %52 = arith.mulf %49, %51 : vector<8x64xf32>
    %c5 = arith.constant 5 : index
    %c0_50 = arith.constant 0 : index
    %53 = vector.load %arg1[%c5, %c0_50] : memref<6x64xf32, #tpu.memory_space<vmem>>, vector<1x64xf32>
    %54 = vector.broadcast %53 : vector<1x64xf32> to vector<8x64xf32>
    %55 = arith.addf %52, %54 : vector<8x64xf32>
    %cst_51 = arith.constant 0.000000e+00 : f32
    %56 = vector.broadcast %cst_51 : f32 to vector<8x64xf32>
    %57 = arith.maximumf %55, %56 : vector<8x64xf32>
    %c2_52 = arith.constant 2 : index
    %c0_53 = arith.constant 0 : index
    %58 = vector.load %arg7[%c2_52, %c0_53] : memref<12x64xf32, #tpu.memory_space<vmem>>, vector<8x64xf32>
    tpu.vector_store %arg7[%c2_52, %c0_53], %57 {strides = array<i32>} : memref<12x64xf32, #tpu.memory_space<vmem>>, vector<8x64xf32>,
    %c0_54 = arith.constant 0 : index
    %c0_55 = arith.constant 0 : index
    %59 = vector.load %arg7[%c0_54, %c0_55] : memref<12x64xf32, #tpu.memory_space<vmem>>, vector<8x64xf32>
    %c0_56 = arith.constant 0 : index
    %c0_57 = arith.constant 0 : index
    %c0_58 = arith.constant 0 : index
    %60 = vector.load %arg4[%c0_56, %c0_57, %c0_58] : memref<3x64x10xf32, #tpu.memory_space<vmem>>, vector<1x64x10xf32>
    %61 = vector.shape_cast %60 : vector<1x64x10xf32> to vector<64x10xf32>
    %cst_59 = arith.constant dense<0.000000e+00> : vector<8x10xf32>
    %62 = tpu.matmul %59, %61, %cst_59 {dimension_numbers = #tpu.dot_dimension_numbers<[1], [0], [0], [1], [0, 0, 1, 1], [], []>} : vector<8x64xf32>, vector<64x10xf32>, vector<8x10xf32> -> vector<8x10xf32>
    %c1_60 = arith.constant 1 : index
    %c0_61 = arith.constant 0 : index
    %c0_62 = arith.constant 0 : index
    %63 = vector.load %arg4[%c1_60, %c0_61, %c0_62] : memref<3x64x10xf32, #tpu.memory_space<vmem>>, vector<1x64x10xf32>
    %64 = vector.shape_cast %63 : vector<1x64x10xf32> to vector<64x10xf32>
    %cst_63 = arith.constant dense<0.000000e+00> : vector<8x10xf32>
    %65 = tpu.matmul %57, %64, %cst_63 {dimension_numbers = #tpu.dot_dimension_numbers<[1], [0], [0], [1], [0, 0, 1, 1], [], []>} : vector<8x64xf32>, vector<64x10xf32>, vector<8x10xf32> -> vector<8x10xf32>
    %66 = arith.addf %62, %65 : vector<8x10xf32>
    %c4_64 = arith.constant 4 : index
    %c0_65 = arith.constant 0 : index
    %67 = vector.load %arg7[%c4_64, %c0_65] : memref<12x64xf32, #tpu.memory_space<vmem>>, vector<8x64xf32>
    %c2_66 = arith.constant 2 : index
    %c0_67 = arith.constant 0 : index
    %c0_68 = arith.constant 0 : index
    %68 = vector.load %arg4[%c2_66, %c0_67, %c0_68] : memref<3x64x10xf32, #tpu.memory_space<vmem>>, vector<1x64x10xf32>
    %69 = vector.shape_cast %68 : vector<1x64x10xf32> to vector<64x10xf32>
    %cst_69 = arith.constant dense<0.000000e+00> : vector<8x10xf32>
    %70 = tpu.matmul %67, %69, %cst_69 {dimension_numbers = #tpu.dot_dimension_numbers<[1], [0], [0], [1], [0, 0, 1, 1], [], []>} : vector<8x64xf32>, vector<64x10xf32>, vector<8x10xf32> -> vector<8x10xf32>
    %71 = arith.addf %66, %70 : vector<8x10xf32>
    %72 = tpu.transpose %71, [1, 0] : vector<8x10xf32> -> vector<10x8xf32>
    %c0_70 = arith.constant 0 : index
    %c0_71 = arith.constant 0 : index
    %c0_72 = arith.constant 0 : index
    %73 = vector.load %arg6[%c0_70, %c0_71, %c0_72] : memref<1x10x8xf32, #tpu.memory_space<vmem>>, vector<1x10x8xf32>
    %74 = vector.shape_cast %73 : vector<1x10x8xf32> to vector<10x8xf32>
    %75 = vector.shape_cast %72 : vector<10x8xf32> to vector<1x10x8xf32>
    tpu.vector_store %arg6[%c0_70, %c0_71, %c0_72], %75 {strides = array<i32>} : memref<1x10x8xf32, #tpu.memory_space<vmem>>, vector<1x10x8xf32>,
    return
  }
  func.func @transform_0(%arg0: i32) -> (i32, i32) {
    %c0_i32 = arith.constant 0 : i32
    %c0_i32_0 = arith.constant 0 : i32
    %c0_i32_1 = arith.constant 0 : i32
    return %c0_i32, %c0_i32_0 : i32, i32
  }
  func.func @transform_1(%arg0: i32) -> (i32, i32, i32) {
    %c0_i32 = arith.constant 0 : i32
    %c0_i32_0 = arith.constant 0 : i32
    %c0_i32_1 = arith.constant 0 : i32
    %c0_i32_2 = arith.constant 0 : i32
    return %c0_i32, %c0_i32_0, %c0_i32_1 : i32, i32, i32
  }
  func.func @transform_2(%arg0: i32) -> (i32, i32, i32) {
    %c0_i32 = arith.constant 0 : i32
    %c0_i32_0 = arith.constant 0 : i32
    %c0_i32_1 = arith.constant 0 : i32
    %c0_i32_2 = arith.constant 0 : i32
    return %c0_i32, %c0_i32_0, %c0_i32_1 : i32, i32, i32
  }
  func.func @transform_3(%arg0: i32) -> (i32, i32, i32) {
    %c0_i32 = arith.constant 0 : i32
    %c0_i32_0 = arith.constant 0 : i32
    %c0_i32_1 = arith.constant 0 : i32
    %c0_i32_2 = arith.constant 0 : i32
    return %c0_i32, %c0_i32_0, %c0_i32_1 : i32, i32, i32
  }
  func.func @transform_4(%arg0: i32) -> (i32, i32, i32) {
    %c0_i32 = arith.constant 0 : i32
    %c0_i32_0 = arith.constant 0 : i32
    %c0_i32_1 = arith.constant 0 : i32
    return %arg0, %c0_i32, %c0_i32_0 : i32, i32, i32
  }
  func.func @transform_5(%arg0: i32) -> (i32, i32, i32) {
    %c0_i32 = arith.constant 0 : i32
    %c0_i32_0 = arith.constant 0 : i32
    %c0_i32_1 = arith.constant 0 : i32
    return %arg0, %c0_i32, %c0_i32_0 : i32, i32, i32
  }
}

</mosaic_0001>

<bundles_post_ra>
// kernel: tile.23
= control target key start
LH: loop header
LB: loop body
LE: loop exit
PB: predicated region body
PF: predicated region fallthrough
CT: control target
= control target key end

     0   :  { %s28_s0 = inlined_call_operand.vmem [shape: f32[16], index: 0, kind: input, shape index: {}]   ;;  %s29_s1 = inlined_call_operand.vmem [shape: f32[12,16], index: 1, kind: output, shape index: {}]  }
   0x1   :  { %v4_v0 = vld [vmem:[%s28_s0] ss:$0 sm:$0xff] }
   0x2   :  { %5 = vst [vmem:[%s29_s1] sm:$0xff] %v4_v0 }
   0x3   :  { %8 = vst [vmem:[%s29_s1 + $0x8] sm:$0xff] %v4_v0 }

// kernel: tile.24
= control target key start
LH: loop header
LB: loop body
LE: loop exit
PB: predicated region body
PF: predicated region fallthrough
CT: control target
= control target key end

     0   :  { %s78_s10 = smov 112   ;;  %s79_s11 = smov 80   ;;  %vm4_vm0 = vcmask 130048   ;;  %vm10_vm1 = vcmask 1048448   ;;  %vm16_vm2 = vcmask 917248   ;;  %vm22_vm3 = vcmask 786048   ;;  %s125_s0 = inlined_call_operand.vmem [shape: f32[12,16], index: 0, kind: input, shape index: {}]   ;;  %s126_s1 = inlined_call_operand.vmem [shape: f32[1,192], index: 1, kind: output, shape index: {}]  }
   0x1   :  { %v63_v0 = vld [vmem:[%s125_s0 + $0x7] sm:$0x1]   ;;  %v65_v1 = vld [vmem:[%s125_s0 + $0x5] sm:$0x1]   ;;  %s31_s12 = smov 3  ;;  %s80_s15 = smov 48  }
   0x2   :  { %8 = vrot.lane.b32.xlu0 %v63_v0, %s78_s10  ;;  %20 = vrot.lane.b32.xlu1 %v65_v1, %s79_s11  ;;  %v67_v2 = vld [vmem:[%s125_s0 + $0x3] ss:$8 sm:%s31_s12]   ;;  %s38_s20 = smov 3  ;;  %s81_s21 = smov 96   ;;  %vm28_vm4 = vcmask 654848   ;;  %vm35_vm5 = vcmask 523648  }
   0x3   :  { %33 = vrot.lane.b32.xlu2 %v67_v2, %s80_s15  ;;  %v64_v3 = vld [vmem:[%s125_s0 + $0x6] sm:$0x1]   ;;  %v66_v4 = vld [vmem:[%s125_s0 + $0x4] sm:$0x1]   ;;  %s82_s22 = smov 64   ;;  %s45_s25 = smov 3 }
   0x4   :  { %v68_v5 = vld [vmem:[%s125_s0 + $0x2] ss:$8 sm:%s38_s20]   ;;  %s83_s26 = smov 32   ;;  %v69_v6 = vld [vmem:[%s125_s0 + $0x1] ss:$8 sm:%s45_s25]   ;;  %s84_s29 = smov 16  }
   0x5   :  { %s2_s30 = smov 3  ;;  %vm42_vm6 = vcmask 392448   ;;  %vm49_vm7 = vcmask 261248  }
   0x6   :  { %v3_v7 = vld [vmem:[%s125_s0] ss:$8 sm:%s2_s30]  }
   0x7   :  { %5 = vst.msk [vmem:[#allocation0] ss:$8 sm:$0x3] %vm4_vm0, %v3_v7  }
   0xa   :  { %14 = vrot.lane.b32.xlu0 %v64_v3, %s81_s21  ;;  %26 = vrot.lane.b32.xlu1 %v66_v4, %s82_s22 }
   0xb   :  { %40 = vrot.lane.b32.xlu2 %v68_v5, %s83_s26 }
  0x12   :  { %47 = vrot.lane.b32.xlu0 %v69_v6, %s84_s29 }
  0x5d   :  { %v34_v8 = vpop.permute.xlu2 %33  }
  0x65   :  { %v41_v9 = vpop.permute.xlu2 %40  }
  0x74   :  { %v9_v10 = vpop.permute.xlu0 %8   ;;  %v21_v11 = vpop.permute.xlu1 %20  }
  0x75   :  { %11 = vst.msk [vmem:[#allocation0] sm:$0x1] %vm10_vm1, %v9_v10  }
  0x7c   :  { %v15_v12 = vpop.permute.xlu0 %14   ;;  %v27_v13 = vpop.permute.xlu1 %26  }
  0x7d   :  { %17 = vst.msk [vmem:[#allocation0] sm:$0x1] %vm16_vm2, %v15_v12  }
  0x7e   :  { %23 = vst.msk [vmem:[#allocation0] sm:$0x1] %vm22_vm3, %v21_v11  }
  0x7f   :  { %29 = vst.msk [vmem:[#allocation0] sm:$0x1] %vm28_vm4, %v27_v13  }
  0x80   :  { %36 = vst.msk [vmem:[#allocation0] ss:$8 sm:$0x3] %vm35_vm5, %v34_v8  }
  0x81   :  { %43 = vst.msk [vmem:[#allocation0] ss:$8 sm:$0x3] %vm42_vm6, %v41_v9  }
  0x84   :  { %v48_v14 = vpop.permute.xlu0 %47  }
  0x85   :  { %50 = vst.msk [vmem:[#allocation0] ss:$8 sm:$0x3] %vm49_vm7, %v48_v14  }
  0x8c   :  { %v53_v15 = vld [vmem:[#allocation0] sm:$0x1]  ;;  %v58_v16 = vld [vmem:[#allocation0 + $0x8] sm:$0x1] }
  0x8d   :  { %56 = vst [vmem:[%s126_s1] sm:$0x1] %v53_v15 }
  0x8e   :  { %70 = vst [vmem:[%s126_s1 + $0x1] sm:$0x1] %v58_v16 }

// kernel: mul.41
= control target key start
LH: loop header
LB: loop body
LE: loop exit
PB: predicated region body
PF: predicated region fallthrough
CT: control target
= control target key end

     0   :  { %s71_s10 = smov 112   ;;  %s72_s11 = smov 80   ;;  %vm4_vm0 = vcmask 130048   ;;  %vm10_vm1 = vcmask 1048448   ;;  %vm16_vm2 = vcmask 917248   ;;  %vm22_vm3 = vcmask 786048   ;;  %s115_s0 = inlined_call_operand.vmem [shape: f32[12,16], index: 0, kind: input, shape index: {}]   ;;  %s116_s1 = inlined_call_operand.vmem [shape: f32[192], index: 1, kind: output, shape index: {}]  }
   0x1   :  { %v57_v0 = vld [vmem:[%s115_s0 + $0x7] sm:$0x1]   ;;  %v59_v1 = vld [vmem:[%s115_s0 + $0x5] sm:$0x1]   ;;  %s31_s12 = smov 3  ;;  %s73_s15 = smov 48  }
   0x2   :  { %8 = vrot.lane.b32.xlu0 %v57_v0, %s71_s10  ;;  %20 = vrot.lane.b32.xlu1 %v59_v1, %s72_s11  ;;  %v61_v2 = vld [vmem:[%s115_s0 + $0x3] ss:$8 sm:%s31_s12]   ;;  %s38_s20 = smov 3  ;;  %s74_s21 = smov 96   ;;  %vm28_vm4 = vcmask 654848   ;;  %vm35_vm5 = vcmask 523648  }
   0x3   :  { %33 = vrot.lane.b32.xlu2 %v61_v2, %s73_s15  ;;  %v58_v3 = vld [vmem:[%s115_s0 + $0x6] sm:$0x1]   ;;  %v60_v4 = vld [vmem:[%s115_s0 + $0x4] sm:$0x1]   ;;  %s75_s22 = smov 64   ;;  %s45_s25 = smov 3 }
   0x4   :  { %v62_v5 = vld [vmem:[%s115_s0 + $0x2] ss:$8 sm:%s38_s20]   ;;  %s76_s26 = smov 32   ;;  %v63_v6 = vld [vmem:[%s115_s0 + $0x1] ss:$8 sm:%s45_s25]   ;;  %s77_s29 = smov 16  }
   0x5   :  { %s2_s30 = smov 3  ;;  %vm42_vm6 = vcmask 392448   ;;  %vm49_vm7 = vcmask 261248  }
   0x6   :  { %v3_v7 = vld [vmem:[%s115_s0] ss:$8 sm:%s2_s30]  }
   0x7   :  { %5 = vst.msk [vmem:[#allocation0] sm:$0x3] %vm4_vm0, %v3_v7  }
   0xa   :  { %14 = vrot.lane.b32.xlu0 %v58_v3, %s74_s21  ;;  %26 = vrot.lane.b32.xlu1 %v60_v4, %s75_s22 }
   0xb   :  { %40 = vrot.lane.b32.xlu2 %v62_v5, %s76_s26 }
  0x12   :  { %47 = vrot.lane.b32.xlu0 %v63_v6, %s77_s29 }
  0x5d   :  { %v34_v8 = vpop.permute.xlu2 %33  }
  0x65   :  { %v41_v9 = vpop.permute.xlu2 %40  }
  0x74   :  { %v9_v10 = vpop.permute.xlu0 %8   ;;  %v21_v11 = vpop.permute.xlu1 %20  }
  0x75   :  { %11 = vst.msk [vmem:[#allocation0] sm:$0x1] %vm10_vm1, %v9_v10  }
  0x7c   :  { %v15_v12 = vpop.permute.xlu0 %14   ;;  %v27_v13 = vpop.permute.xlu1 %26  }
  0x7d   :  { %17 = vst.msk [vmem:[#allocation0] sm:$0x1] %vm16_vm2, %v15_v12  }
  0x7e   :  { %23 = vst.msk [vmem:[#allocation0] sm:$0x1] %vm22_vm3, %v21_v11  }
  0x7f   :  { %29 = vst.msk [vmem:[#allocation0] sm:$0x1] %vm28_vm4, %v27_v13  }
  0x80   :  { %36 = vst.msk [vmem:[#allocation0] sm:$0x3] %vm35_vm5, %v34_v8  }
  0x81   :  { %43 = vst.msk [vmem:[#allocation0] sm:$0x3] %vm42_vm6, %v41_v9  }
  0x84   :  { %v48_v14 = vpop.permute.xlu0 %47  }
  0x85   :  { %50 = vst.msk [vmem:[#allocation0] sm:$0x3] %vm49_vm7, %v48_v14  }
  0x8c   :  { %v53_v15 = vld [vmem:[#allocation0] sm:$0x3] }
  0x8d   :  { %56 = vst [vmem:[%s116_s1] sm:$0x3] %v53_v15 }

// kernel: auwgcn_forward.5
= control target key start
LH: loop header
LB: loop body
LE: loop exit
PB: predicated region body
PF: predicated region fallthrough
CT: control target
= control target key end

     0   :  { %s758_s18 = smov 0   ;;  %s1025_s0 = inlined_call_operand.vmem [shape: f32[6,64], index: 0, kind: input, shape index: {}]   ;;  %s1026_s1 = inlined_call_operand.vmem [shape: f32[3,64,64], index: 1, kind: input, shape index: {}]   ;;  %s1027_s2 = inlined_call_operand.vmem [shape: f32[3,64,64], index: 2, kind: input, shape index: {}]   ;;  %s1028_s3 = inlined_call_operand.vmem [shape: f32[3,64,10], index: 3, kind: input, shape index: {}]   ;;  %s1029_s4 = inlined_call_operand.vmem [shape: f32[2,8,64], index: 4, kind: input, shape index: {}]   ;;  %s1030_s5 = inlined_call_operand.vmem [shape: f32[2,10,8], index: 5, kind: output, shape index: {}]  }
   0x1 LB: > { %s636_s19 = sadd.s32 4294967295, %s725_s18   ;;  %p640_p0 = scmp.ge.s32.totalorder %s725_s18, 1  ;;  %s725_s18 = sphi %s758_s18, %s15_s18  }
   0x2   : > { %p186_p1 = scmp.lt.s32.totalorder %s725_s18, 3 }
   0x4   : > { %p187_p2 = pnand %p640_p0, %p186_p1 }
   0x5   : > { %p213_p3 = scmp.lt.s32.totalorder (!%p187_p2), %s636_s19, 1 }
   0x6   : > { %190 = sbr.rel (%p187_p2) target bundleno = 635 (0x27b), region = 40 }
   0xb   : > { %v661_v0 = vld [vmem:[%s1026_s1 + $0xb8] sm:$0xff]  ;;  %v660_v1 = vld [vmem:[%s1026_s1 + $0xb0] sm:$0xff]  ;;  %vm222_vm0 = vcmask 517120   ;;  %v727_v5 = vmov 0.0   ;;  %v659_v6 = vld [vmem:[%s1026_s1 + $0xa8] sm:$0xff]  ;;  %s1032_s19 = smov (!%p213_p3, %s636_s19), 1 }
   0xc   : > { %v651_v2 = vld [vmem:[%s1026_s1 + $0x78] sm:$0xff]  ;;  %320 = vmatpush.msra.mxu2 %v661_v0  ;;  %v650_v4 = vld [vmem:[%s1026_s1 + $0x70] sm:$0xff]  ;;  %224 = vst.msk [vmem:[#allocation2 + $0xa] sm:$0x3] %vm222_vm0, %v727_v5  ;;  %v649_v8 = vld [vmem:[%s1026_s1 + $0x68] sm:$0xff]  ;;  %s641_s17 = sshll.u32 %s1032_s19, 3 }
   0xd   : > { %264 = vmatpush.msra.mxu0 %v651_v2  ;;  %v243_v3 = vld [vmem:[%s1026_s1 + $0x38] sm:$0xff]  ;;  %v242_v7 = vld [vmem:[%s1026_s1 + $0x30] sm:$0xff]  ;;  %223 = vst.msk [vmem:[#allocation2] sm:$0x3] %vm222_vm0, %v727_v5  ;;  %v241_v9 = vld [vmem:[%s1026_s1 + $0x28] sm:$0xff]  ;;  %s216_s26 = scalar_lea.vmem %s1029_s4, %s641_s17  ;;  %vm233_vm1 = vcmask 523264  }
   0xe   : > { %287 = vmatpush.msra.mxu1 %v243_v3  ;;  %321 = vmatpush.msra.mxu2 %v660_v1  ;;  %v658_v10 = vld [vmem:[%s1026_s1 + $0xa0] sm:$0xff]  ;;  %v657_v12 = vld [vmem:[%s1026_s1 + $0x98] sm:$0xff]  ;;  %v656_v14 = vld [vmem:[%s1026_s1 + $0x90] sm:$0xff]  ;;  %s703_s17 = sshll.u32 %s1032_s19, 4  ;;  %vm577_vm2 = vcmask 64512   ;;  %vm579_vm3 = vcmask 58368  }
   0xf   : > { %265 = vmatpush.msra.mxu0 %v650_v4  ;;  %v648_v11 = vld [vmem:[%s1026_s1 + $0x60] sm:$0xff]  ;;  %v647_v15 = vld [vmem:[%s1026_s1 + $0x58] sm:$0xff]  ;;  %v655_v19 = vld [vmem:[%s1026_s1 + $0x88] sm:$0xff]  ;;  %s221_s22 = scalar_lea.vmem %s1030_s5, %s703_s17 }
  0x10   : > { %288 = vmatpush.msra.mxu1 %v242_v7  ;;  %322 = vmatpush.msra.mxu2 %v659_v6  ;;  %v240_v13 = vld [vmem:[%s1026_s1 + $0x20] sm:$0xff]  ;;  %v239_v16 = vld [vmem:[%s1026_s1 + $0x18] sm:$0xff]  ;;  %v646_v20 = vld [vmem:[%s1026_s1 + $0x50] sm:$0xff] }
  0x11   : > { %266 = vmatpush.msra.mxu0 %v649_v8  ;;  %v225_v17 = vld [vmem:[%s216_s26] sm:$0xff]  ;;  %v238_v22 = vld [vmem:[%s1026_s1 + $0x10] sm:$0xff]  ;;  %v645_v24 = vld [vmem:[%s1026_s1 + $0x48] sm:$0xff] }
  0x12   : > { %289 = vmatpush.msra.mxu1 %v241_v9  ;;  %323 = vmatpush.msra.mxu2 %v658_v10  ;;  %v713_v18 = vld [vmem:[%s1025_s0] ss:$0 sm:$0xff]  ;;  %v714_v21 = vld [vmem:[%s1025_s0 + $0x1] ss:$0 sm:$0xff]  ;;  %v670_v25 = vld [vmem:[%s1027_s2 + $0x78] sm:$0xff] }
  0x13   : > { %267 = vmatpush.msra.mxu0 %v648_v11  ;;  %v228_v23 = vmul.f32 %v713_v18, %v225_v17  ;;  %370 = vmatpush.msra.mxu3 %v670_v25  ;;  %v669_v26 = vld [vmem:[%s1027_s2 + $0x70] sm:$0xff]  ;;  %v237_v28 = vld [vmem:[%s1026_s1 + $0x8] sm:$0xff]  ;;  %v654_v29 = vld [vmem:[%s1026_s1 + $0x80] sm:$0xff] }
  0x14   : > { %290 = vmatpush.msra.mxu1 %v240_v13  ;;  %324 = vmatpush.msra.mxu2 %v657_v12  ;;  %v644_v30 = vld [vmem:[%s1026_s1 + $0x40] sm:$0xff]  ;;  %v668_v35 = vld [vmem:[%s1027_s2 + $0x68] sm:$0xff]  ;;  %v666_v37 = vld [vmem:[%s1027_s2 + $0x58] sm:$0xff] }
  0x15   : > { %268 = vmatpush.msra.mxu0 %v647_v15  ;;  %v231_v27 = vadd.f32 %v714_v21, %v228_v23  ;;  %371 = vmatpush.msra.mxu3 %v669_v26  ;;  %v236_v32 = vld [vmem:[%s1026_s1] sm:$0xff]  ;;  %v349_v38 = vld [vmem:[%s1027_s2 + $0x38] sm:$0xff]  ;;  %v665_v40 = vld [vmem:[%s1027_s2 + $0x50] sm:$0xff] }
  0x16   : > { %291 = vmatpush.msra.mxu1 %v239_v16  ;;  %325 = vmatpush.msra.mxu2 %v656_v14  ;;  %v667_v36 = vld [vmem:[%s1027_s2 + $0x60] sm:$0xff]  ;;  %v680_v39 = vld [vmem:[%s1027_s2 + $0xb8] sm:$0xff]  ;;  %v348_v41 = vld [vmem:[%s1027_s2 + $0x30] sm:$0xff] }
  0x17   : > { %269 = vmatpush.msra.mxu0 %v646_v20  ;;  %v232_v31 = vmax.f32 %v231_v27, 0.0  ;;  %372 = vmatpush.msra.mxu3 %v668_v35  ;;  %v679_v42 = vld [vmem:[%s1027_s2 + $0xb0] sm:$0xff]  ;;  %v664_v43 = vld [vmem:[%s1027_s2 + $0x48] sm:$0xff]  ;;  %v663_v46 = vld [vmem:[%s1027_s2 + $0x40] sm:$0xff] }
  0x18   : > { %292 = vmatpush.msra.mxu1 %v238_v22  ;;  %326 = vmatpush.msra.mxu2 %v655_v19  ;;  %v347_v44 = vld [vmem:[%s1027_s2 + $0x28] sm:$0xff]  ;;  %v346_v47 = vld [vmem:[%s1027_s2 + $0x20] sm:$0xff]  ;;  %v345_v49 = vld [vmem:[%s1027_s2 + $0x18] sm:$0xff] }
  0x19   : > { %270 = vmatpush.msra.mxu0 %v645_v24  ;;  %234 = vst.msk [vmem:[#allocation2 + $0x2] sm:$0xff] %vm233_vm1, %v232_v31  ;;  %373 = vmatpush.msra.mxu3 %v667_v36  ;;  %v678_v45 = vld [vmem:[%s1027_s2 + $0xa8] sm:$0xff]  ;;  %v677_v48 = vld [vmem:[%s1027_s2 + $0xa0] sm:$0xff]  ;;  %v676_v50 = vld [vmem:[%s1027_s2 + $0x98] sm:$0xff] }
  0x1a   : > { %293 = vmatpush.msra.mxu1 %v237_v28  ;;  %327 = vmatpush.msra.mxu2 %v654_v29  ;;  %v344_v51 = vld [vmem:[%s1027_s2 + $0x10] sm:$0xff]  ;;  %v343_v53 = vld [vmem:[%s1027_s2 + $0x8] sm:$0xff]  ;;  %v342_v55 = vld [vmem:[%s1027_s2] sm:$0xff] }
  0x1b   : > { %271 = vmatpush.msra.mxu0 %v644_v30  ;;  %374 = vmatpush.msra.mxu3 %v666_v37  ;;  %v675_v52 = vld [vmem:[%s1027_s2 + $0x90] sm:$0xff]  ;;  %v674_v54 = vld [vmem:[%s1027_s2 + $0x88] sm:$0xff]  ;;  %v673_v56 = vld [vmem:[%s1027_s2 + $0x80] sm:$0xff] }
  0x1c   : > { %294 = vmatpush.msra.mxu1 %v236_v32  ;;  %652 = vmatmul.msk.f32.vlgmr.msra.gmra.mxu0 %vm233_vm1, %v232_v31  ;;  %v689_v57 = vld [vmem:[%s1028_s3 + $0x78] sm:$0xff]  ;;  %v715_v61 = vld [vmem:[%s1025_s0 + $0x2] ss:$0 sm:$0xff]  ;;  %v716_v0 = vld [vmem:[%s1025_s0 + $0x3] ss:$0 sm:$0xff] }
  0x1d   : > { %393 = vmatpush.msrb.mxu0 %v349_v38  ;;  %375 = vmatpush.msra.mxu3 %v665_v40  ;;  %v688_v6 = vld [vmem:[%s1028_s3 + $0x70] sm:$0xff]  ;;  %v687_v7 = vld [vmem:[%s1028_s3 + $0x68] sm:$0xff]  ;;  %v686_v8 = vld [vmem:[%s1028_s3 + $0x60] sm:$0xff] }
  0x1e   : > { %426 = vmatpush.msrb.mxu1 %v680_v39  ;;  %476 = vmatpush.msrb.mxu2 %v689_v57  ;;  %v685_v9 = vld [vmem:[%s1028_s3 + $0x58] sm:$0xff]  ;;  %v684_v12 = vld [vmem:[%s1028_s3 + $0x50] sm:$0xff]  ;;  %v683_v15 = vld [vmem:[%s1028_s3 + $0x48] sm:$0xff] }
  0x1f   : > { %394 = vmatpush.msrb.mxu0 %v348_v41  ;;  %376 = vmatpush.msra.mxu3 %v664_v43  ;;  %v455_v10 = vld [vmem:[%s1028_s3 + $0x38] sm:$0xff]  ;;  %v454_v13 = vld [vmem:[%s1028_s3 + $0x30] sm:$0xff]  ;;  %v453_v16 = vld [vmem:[%s1028_s3 + $0x28] sm:$0xff] }
  0x20   : > { %v299_v33 = vld [vmem:[#allocation2 + $0x3] sm:$0xff]  ;;  %427 = vmatpush.msrb.mxu1 %v679_v42  ;;  %477 = vmatpush.msrb.mxu2 %v688_v6  ;;  %v699_v11 = vld [vmem:[%s1028_s3 + $0xb8] sm:$0xff]  ;;  %v698_v14 = vld [vmem:[%s1028_s3 + $0xb0] sm:$0xff] }
  0x21   : > { %v235_v34 = vld [vmem:[#allocation2 + $0x1] sm:$0xff]  ;;  %662 = vmatmul.msk.f32.vlgmr.msra.gmra.mxu2 %vm233_vm1, %v299_v33  ;;  %395 = vmatpush.msrb.mxu0 %v347_v44  ;;  %v451_v21 = vld [vmem:[%s1028_s3 + $0x18] sm:$0xff]  ;;  %v450_v23 = vld [vmem:[%s1028_s3 + $0x10] sm:$0xff] }
  0x22   : > { %653 = vmatmul.msk.f32.vlgmr.msra.gmra.mxu1 %vm233_vm1, %v235_v34  ;;  %377 = vmatpush.msra.mxu3 %v663_v46  ;;  %v697_v17 = vld [vmem:[%s1028_s3 + $0xa8] sm:$0xff]  ;;  %v682_v18 = vld [vmem:[%s1028_s3 + $0x40] sm:$0xff]  ;;  %v695_v22 = vld [vmem:[%s1028_s3 + $0x98] sm:$0xff] }
  0x23   : > { %428 = vmatpush.msrb.mxu1 %v678_v45  ;;  %396 = vmatpush.msrb.mxu0 %v346_v47  ;;  %v452_v19 = vld [vmem:[%s1028_s3 + $0x20] sm:$0xff]  ;;  %v694_v24 = vld [vmem:[%s1028_s3 + $0x90] sm:$0xff]  ;;  %v449_v25 = vld [vmem:[%s1028_s3 + $0x8] sm:$0xff] }
  0x24   : > { %478 = vmatpush.msrb.mxu2 %v687_v7  ;;  %499 = vmatpush.msrb.mxu3 %v455_v10  ;;  %v696_v20 = vld [vmem:[%s1028_s3 + $0xa0] sm:$0xff]  ;;  %v693_v26 = vld [vmem:[%s1028_s3 + $0x88] sm:$0xff] }
  0x25   : > { %429 = vmatpush.msrb.mxu1 %v677_v48  ;;  %397 = vmatpush.msrb.mxu0 %v345_v49  ;;  %v448_v27 = vld [vmem:[%s1028_s3] sm:$0xff] }
  0x26   : > { %479 = vmatpush.msrb.mxu2 %v686_v8  ;;  %500 = vmatpush.msrb.mxu3 %v454_v13  ;;  %v692_v28 = vld [vmem:[%s1028_s3 + $0x80] sm:$0xff] }
  0x27   : > { %430 = vmatpush.msrb.mxu1 %v676_v50  ;;  %398 = vmatpush.msrb.mxu0 %v344_v51  ;;  %v717_v32 = vld [vmem:[%s1025_s0 + $0x4] ss:$0 sm:$0xff]  ;;  %v718_v35 = vld [vmem:[%s1025_s0 + $0x5] ss:$0 sm:$0xff] }
  0x28   : > { %480 = vmatpush.msrb.mxu2 %v685_v9  ;;  %501 = vmatpush.msrb.mxu3 %v453_v16 }
  0x29   : > { %431 = vmatpush.msrb.mxu1 %v675_v52  ;;  %399 = vmatpush.msrb.mxu0 %v343_v53 }
  0x2a   : > { %481 = vmatpush.msrb.mxu2 %v684_v12  ;;  %502 = vmatpush.msrb.mxu3 %v452_v19 }
  0x2b   : > { %432 = vmatpush.msrb.mxu1 %v674_v54  ;;  %400 = vmatpush.msrb.mxu0 %v342_v55 }
  0x2c   : > { %482 = vmatpush.msrb.mxu2 %v683_v15  ;;  %503 = vmatpush.msrb.mxu3 %v451_v21 }
  0x2d   : > { %433 = vmatpush.msrb.mxu1 %v673_v56  ;;  %532 = vmatpush.msra.mxu0 %v699_v11 }
  0x2e   : > { %483 = vmatpush.msrb.mxu2 %v682_v18  ;;  %504 = vmatpush.msrb.mxu3 %v450_v23 }
  0x2f   : > { %533 = vmatpush.msra.mxu0 %v698_v14 }
  0x30   : > { %505 = vmatpush.msrb.mxu3 %v449_v25 }
  0x31   : > { %534 = vmatpush.msra.mxu0 %v697_v17 }
  0x32   : > { %506 = vmatpush.msrb.mxu3 %v448_v27 }
  0x33   : > { %535 = vmatpush.msra.mxu0 %v696_v20 }
  0x35   : > { %536 = vmatpush.msra.mxu0 %v695_v22 }
  0x37   : > { %537 = vmatpush.msra.mxu0 %v694_v24 }
  0x39   : > { %538 = vmatpush.msra.mxu0 %v693_v26 }
  0x3b   : > { %539 = vmatpush.msra.mxu0 %v692_v28 }
  0x99   : > { %v273_v58 = vpop.f32.mrf.mxu0 }
  0x9f   : > { %v296_v59 = vpop.f32.mrf.mxu1 }
  0xa0   : > { %v297_v60 = vadd.f32 %v296_v59, %v273_v58 }
  0xa4   : > { %v329_v62 = vpop.f32.mrf.mxu2 }
  0xa5   : > { %v332_v63 = vadd.f32 %v329_v62, %v297_v60 }
  0xa7   : > { %v335_v1 = vmul.f32 %v715_v61, %v332_v63 }
  0xa9   : > { %v338_v2 = vadd.f32 %v716_v0, %v335_v1 }
  0xab   : > { %v339_v3 = vmax.f32 %v338_v2, 0.0 }
  0xad   : > { %340 = vst.msk [vmem:[#allocation2 + $0x2] sm:$0xff] %vm233_vm1, %v339_v3  ;;  %671 = vmatmul.msk.f32.vlgmr.msra.gmra.mxu3 %vm233_vm1, %v339_v3 }
  0xb4   : > { %v341_v4 = vld [vmem:[#allocation2] sm:$0xff] }
  0xb5   : > { %v405_v5 = vld [vmem:[#allocation2 + $0x4] sm:$0xff]  ;;  %672 = vmatmul.msk.f32.vlgmr.msrb.gmra.mxu0 %vm233_vm1, %v341_v4 }
  0xb6   : > { %681 = vmatmul.msk.f32.vlgmr.msrb.gmra.mxu1 %vm233_vm1, %v405_v5 }
 0x130   : > { %v379_v29 = vpop.f32.mrf.mxu3 }
 0x132   : > { %v402_v30 = vpop.f32.mrf.mxu0 }
 0x133   : > { %v403_v31 = vadd.f32 %v402_v30, %v379_v29  ;;  %v435_v33 = vpop.f32.mrf.mxu1 }
 0x135   : > { %v438_v34 = vadd.f32 %v435_v33, %v403_v31 }
 0x137   : > { %v441_v36 = vmul.f32 %v717_v32, %v438_v34 }
 0x139   : > { %v444_v37 = vadd.f32 %v718_v35, %v441_v36 }
 0x13b   : > { %v445_v38 = vmax.f32 %v444_v37, 0.0 }
 0x13d   : > { %446 = vst.msk [vmem:[#allocation2 + $0x2] sm:$0xff] %vm233_vm1, %v445_v38  ;;  %690 = vmatmul.msk.f32.vlgmr.msrb.gmra.mxu2 %vm233_vm1, %v445_v38 }
 0x144   : > { %v447_v39 = vld [vmem:[#allocation2] sm:$0xff] }
 0x145   : > { %v511_v40 = vld [vmem:[#allocation2 + $0x4] sm:$0xff]  ;;  %691 = vmatmul.msk.f32.vlgmr.msrb.gmra.mxu3 %vm233_vm1, %v447_v39 }
 0x146   : > { %700 = vmatmul.msk.f32.vlgmr.msra.gmra.mxu0 %vm233_vm1, %v511_v40 }
 0x1c0   : > { %v485_v41 = vpop.f32.mrf.mxu2 }
 0x1c3   : > { %v541_v44 = vpop.f32.mrf.mxu0 }
 0x1c8   : > { %v508_v42 = vpop.f32.mrf.mxu3 }
 0x1c9   : > { %v509_v43 = vadd.f32 %v508_v42, %v485_v41 }
 0x1cb   : > { %v544_v45 = vadd.f32 %v541_v44, %v509_v43 }
 0x1cd   : > { %545 = vxpose.xlu0.b32.start.end [1/1] (short) (narrow) %v544_v45, 16 }
 0x271   : > { %v561_v46 = vpop.trf.xlu0 }
 0x272   : > { %578 = vst.msk [vmem:[%s221_s22] sm:$0xff] %vm577_vm2, %v561_v46 }
 0x279   : > { %v562_v47 = vpop.trf.xlu0 }
 0x27a   : > { %580 = vst.msk [vmem:[%s221_s22 + $0x8] sm:$0x3] %vm579_vm3, %v562_v47 }
 0x27b PF: > { %s15_s18 = sadd.s32 1, %s725_s18  }
 0x27c   : > { %p12_p4 = scmp.ge.s32.totalorder %s15_s18, 4  }
 0x27e   :  { %14 = sbr.rel (!%p12_p4) target bundleno = 1 (0x1), region = 76 }

// kernel: auwgcn_forward.4
= control target key start
LH: loop header
LB: loop body
LE: loop exit
PB: predicated region body
PF: predicated region fallthrough
CT: control target
= control target key end

     0   :  { %s687_s15 = smov 0   ;;  %s689_s16 = smov 0   ;;  %s950_s0 = inlined_call_operand.vmem [shape: f32[4,64], index: 0, kind: input, shape index: {}]   ;;  %s951_s1 = inlined_call_operand.vmem [shape: f32[3,64,64], index: 1, kind: input, shape index: {}]   ;;  %s952_s2 = inlined_call_operand.vmem [shape: f32[3,64,64], index: 2, kind: input, shape index: {}]   ;;  %s953_s3 = inlined_call_operand.vmem [shape: f32[2,8,64], index: 3, kind: input, shape index: {}]   ;;  %s954_s4 = inlined_call_operand.vmem [shape: f32[4,64], index: 4, kind: output, shape index: {}]  }
   0x1   :  { %s691_s17 = smov 0   ;;  %s693_s18 = smov 0  }
   0x2   :  { %s695_s19 = smov 0  }
   0x3 LB: > { %s23_s20 = sadd.s32 1, %s650_s17  ;;  %s26_s21 = sadd.s32 1, %s654_s18  ;;  %s658_s19 = sphi %s695_s19, %s14_s19   ;;  %s654_s18 = sphi %s693_s18, %s958_s18   ;;  %s650_s17 = sphi %s691_s17, %s957_s17   ;;  %s646_s16 = sphi %s689_s16, %s956_s16   ;;  %s642_s15 = sphi %s687_s15, %s955_s15  }
   0x4   : > { %p24_p0 = scmp.ge.s32.totalorder %s23_s20, 2  ;;  %p530_p1 = scmp.ge.s32.totalorder %s658_s19, 1 }
   0x5   : > { %p168_p2 = scmp.lt.s32.totalorder %s658_s19, 5 }
   0x6   : > { %s960_s20 = smov (%p24_p0, %s23_s20), 0  ;;  %s962_s21 = smov (!%p24_p0, %s26_s21), %s654_s18 }
   0x7   : > { %p169_p3 = pnand %p530_p1, %p168_p2  ;;  %p28_p4 = scmp.ge.s32.totalorder %s962_s21, 2 }
   0x8   : > { %p188_p5 = scmp.lt.s32.totalorder (!%p169_p3), %s642_s15, 1  ;;  %p192_p6 = scmp.eq.s32.totalorder (!%p169_p3), %s646_s16, 0 }
   0x9   : > { %s964_s21 = smov (%p28_p4, %s962_s21), 0  ;;  %172 = sbr.rel (%p169_p3) target bundleno = 407 (0x197), region = 36 }
   0xa   : > { %p193_p7 = scmp.eq.s32.totalorder (!%p169_p3), %s642_s15, 0 }
   0xc   : > { %p194_p8 = pnand (!%p169_p3), %p193_p7, %p192_p6 }
   0xe   : > { %s966_s15 = smov (!%p188_p5, %s642_s15), 1  ;;  %197 = sbr.rel (%p194_p8) target bundleno = 21 (0x15), region = 40 }
   0xf   : > { %s531_s22 = sshll.u32 %s966_s15, 3 }
  0x10   : > { %s723_s25 = scalar_lea.vmem %s953_s3, %s531_s22 }
  0x13   : > { %vm198_vm0 = vcmask 519168   ;;  %v660_v0 = vmov 0.0  }
  0x14   : > { %199 = vst.msk [vmem:[%s954_s4] sm:$0xf] %vm198_vm0, %v660_v0 }
  0x15 PF: > { %v549_v1 = vld [vmem:[%s951_s1 + $0xb8] sm:$0xff]  ;;  %v548_v2 = vld [vmem:[%s951_s1 + $0xb0] sm:$0xff]  ;;  %vm200_vm1 = vcmask 517120   ;;  %v661_v6 = vmov 0.0   ;;  %v547_v7 = vld [vmem:[%s951_s1 + $0xa8] sm:$0xff]  ;;  %vm211_vm2 = vcmask 523264  }
  0x16   : > { %v539_v3 = vld [vmem:[%s951_s1 + $0x78] sm:$0xff]  ;;  %298 = vmatpush.msra.mxu2 %v549_v1  ;;  %v538_v5 = vld [vmem:[%s951_s1 + $0x70] sm:$0xff]  ;;  %202 = vst.msk [vmem:[#allocation2 + $0xa] sm:$0x3] %vm200_vm1, %v661_v6  ;;  %v537_v9 = vld [vmem:[%s951_s1 + $0x68] sm:$0xff]  ;;  %p551_p9 = scmp.ne.s32.totalorder %s646_s16, 0 }
  0x17   : > { %242 = vmatpush.msra.mxu0 %v539_v3  ;;  %v221_v4 = vld [vmem:[%s951_s1 + $0x38] sm:$0xff]  ;;  %v220_v8 = vld [vmem:[%s951_s1 + $0x30] sm:$0xff]  ;;  %201 = vst.msk [vmem:[#allocation2] sm:$0x3] %vm200_vm1, %v661_v6  ;;  %v219_v10 = vld [vmem:[%s951_s1 + $0x28] sm:$0xff] }
  0x18   : > { %265 = vmatpush.msra.mxu1 %v221_v4  ;;  %299 = vmatpush.msra.mxu2 %v548_v2  ;;  %v546_v11 = vld [vmem:[%s951_s1 + $0xa0] sm:$0xff]  ;;  %v545_v13 = vld [vmem:[%s951_s1 + $0x98] sm:$0xff]  ;;  %v544_v19 = vld [vmem:[%s951_s1 + $0x90] sm:$0xff] }
  0x19   : > { %243 = vmatpush.msra.mxu0 %v538_v5  ;;  %v536_v12 = vld [vmem:[%s951_s1 + $0x60] sm:$0xff]  ;;  %v535_v15 = vld [vmem:[%s951_s1 + $0x58] sm:$0xff]  ;;  %v534_v20 = vld [vmem:[%s951_s1 + $0x50] sm:$0xff] }
  0x1a   : > { %266 = vmatpush.msra.mxu1 %v220_v8  ;;  %300 = vmatpush.msra.mxu2 %v547_v7  ;;  %v218_v14 = vld [vmem:[%s951_s1 + $0x20] sm:$0xff]  ;;  %v217_v16 = vld [vmem:[%s951_s1 + $0x18] sm:$0xff]  ;;  %v216_v22 = vld [vmem:[%s951_s1 + $0x10] sm:$0xff] }
  0x1b   : > { %244 = vmatpush.msra.mxu0 %v537_v9  ;;  %v203_v17 = vld [vmem:[%s723_s25] sm:$0xff]  ;;  %v543_v24 = vld [vmem:[%s951_s1 + $0x88] sm:$0xff] }
  0x1c   : > { %267 = vmatpush.msra.mxu1 %v219_v10  ;;  %301 = vmatpush.msra.mxu2 %v546_v11  ;;  %v616_v18 = vld [vmem:[%s950_s0] ss:$0 sm:$0xff]  ;;  %v617_v21 = vld [vmem:[%s950_s0 + $0x1] ss:$0 sm:$0xff]  ;;  %v533_v25 = vld [vmem:[%s951_s1 + $0x48] sm:$0xff] }
  0x1d   : > { %245 = vmatpush.msra.mxu0 %v536_v12  ;;  %v206_v23 = vmul.f32 %v616_v18, %v203_v17  ;;  %v215_v27 = vld [vmem:[%s951_s1 + $0x8] sm:$0xff]  ;;  %v542_v28 = vld [vmem:[%s951_s1 + $0x80] sm:$0xff] }
  0x1e   : > { %268 = vmatpush.msra.mxu1 %v218_v14  ;;  %302 = vmatpush.msra.mxu2 %v545_v13  ;;  %v532_v29 = vld [vmem:[%s951_s1 + $0x40] sm:$0xff] }
  0x1f   : > { %246 = vmatpush.msra.mxu0 %v535_v15  ;;  %v209_v26 = vadd.f32 %v617_v21, %v206_v23  ;;  %v214_v31 = vld [vmem:[%s951_s1] sm:$0xff] }
  0x20   : > { %269 = vmatpush.msra.mxu1 %v217_v16  ;;  %303 = vmatpush.msra.mxu2 %v544_v19 }
  0x21   : > { %247 = vmatpush.msra.mxu0 %v534_v20  ;;  %v210_v30 = vmax.f32 %v209_v26, 0.0 }
  0x22   : > { %270 = vmatpush.msra.mxu1 %v216_v22  ;;  %304 = vmatpush.msra.mxu2 %v543_v24 }
  0x23   : > { %248 = vmatpush.msra.mxu0 %v533_v25  ;;  %212 = vst.msk [vmem:[#allocation2 + $0x2] sm:$0xff] %vm211_vm2, %v210_v30 }
  0x24   : > { %271 = vmatpush.msra.mxu1 %v215_v27  ;;  %305 = vmatpush.msra.mxu2 %v542_v28 }
  0x25   : > { %249 = vmatpush.msra.mxu0 %v532_v29 }
  0x26   : > { %272 = vmatpush.msra.mxu1 %v214_v31  ;;  %540 = vmatmul.msk.f32.vlgmr.msra.gmra.mxu0 %vm211_vm2, %v210_v30 }
  0x2a   : > { %v277_v32 = vld [vmem:[#allocation2 + $0x3] sm:$0xff] }
  0x2b   : > { %v213_v33 = vld [vmem:[#allocation2 + $0x1] sm:$0xff]  ;;  %550 = vmatmul.msk.f32.vlgmr.msra.gmra.mxu2 %vm211_vm2, %v277_v32 }
  0x2c   : > { %541 = vmatmul.msk.f32.vlgmr.msra.gmra.mxu1 %vm211_vm2, %v213_v33 }
  0xa3   : > { %v251_v34 = vpop.f32.mrf.mxu0 }
  0xa9   : > { %v274_v35 = vpop.f32.mrf.mxu1 }
  0xaa   : > { %v275_v36 = vadd.f32 %v274_v35, %v251_v34 }
  0xab   : > { %313 = sbr.rel (%p551_p9) target bundleno = 195 (0xc3), region = 44 }
  0xae   : > { %v307_v37 = vpop.f32.mrf.mxu2 }
  0xaf   : > { %v811_v38 = vadd.f32 %v307_v37, %v275_v36 }
  0xb0   : > { %v314_v51 = vld [vmem:[%s954_s4] sm:$0x1]  ;;  %vm323_vm3 = vcmask 516096   ;;  %v325_v54 = vld [vmem:[%s954_s4 + $0x1] sm:$0x1] }
  0xb1   : > { %v315_v39 = vsel %vm211_vm2, %v811_v38, 0.0  ;;  %v326_v40 = vmul.f32 %v811_v38, %v811_v38 }
  0xb2   : > { %v316_v41 = vrot.slane %v315_v39, 4 }
  0xb3   : > { %v327_v42 = vsel %vm211_vm2, %v326_v40, 0.0 }
  0xb4   : > { %v317_v43 = vadd.f32 %v316_v41, %v315_v39  ;;  %v328_v44 = vrot.slane %v327_v42, 4 }
  0xb6   : > { %v318_v45 = vrot.slane %v317_v43, 2  ;;  %v329_v46 = vadd.f32 %v328_v44, %v327_v42 }
  0xb8   : > { %v319_v47 = vadd.f32 %v318_v45, %v317_v43  ;;  %v330_v48 = vrot.slane %v329_v46, 2 }
  0xba   : > { %v320_v49 = vrot.slane %v319_v47, 1  ;;  %v331_v50 = vadd.f32 %v330_v48, %v329_v46 }
  0xbc   : > { %v321_v52 = vadd.f32 %v320_v49, %v319_v47  ;;  %v332_v53 = vrot.slane %v331_v50, 1 }
  0xbe   : > { %v322_v55 = vadd.f32 %v321_v52, %v314_v51  ;;  %v333_v56 = vadd.f32 %v332_v53, %v331_v50 }
  0xc0   : > { %324 = vst.msk [vmem:[%s954_s4] sm:$0x1] %vm323_vm3, %v322_v55  ;;  %v334_v57 = vadd.f32 %v333_v56, %v325_v54 }
  0xc2   : > { %335 = vst.msk [vmem:[%s954_s4 + $0x1] sm:$0x1] %vm323_vm3, %v334_v57 }
  0xc3 PF: > { %p552_p10 = scmp.ne.s32.totalorder %s646_s16, 1 }
  0xc5   : > { %339 = sbr.rel (%p552_p10) target bundleno = 407 (0x197), region = 48 }
  0xca   : > { %v570_v58 = vld [vmem:[%s952_s2 + $0xb8] sm:$0xff]  ;;  %v569_v59 = vld [vmem:[%s952_s2 + $0xb0] sm:$0xff]  ;;  %v568_v63 = vld [vmem:[%s952_s2 + $0xa8] sm:$0xff]  ;;  %vm475_vm7 = vcmask 516096  }
  0xcb   : > { %v560_v60 = vld [vmem:[%s952_s2 + $0x78] sm:$0xff]  ;;  %453 = vmatpush.msra.mxu2 %v570_v58  ;;  %v559_v62 = vld [vmem:[%s952_s2 + $0x70] sm:$0xff]  ;;  %v558_v1 = vld [vmem:[%s952_s2 + $0x68] sm:$0xff] }
  0xcc   : > { %397 = vmatpush.msra.mxu0 %v560_v60  ;;  %v376_v61 = vld [vmem:[%s952_s2 + $0x38] sm:$0xff]  ;;  %v375_v0 = vld [vmem:[%s952_s2 + $0x30] sm:$0xff]  ;;  %v374_v2 = vld [vmem:[%s952_s2 + $0x28] sm:$0xff] }
  0xcd   : > { %420 = vmatpush.msra.mxu1 %v376_v61  ;;  %454 = vmatpush.msra.mxu2 %v569_v59  ;;  %v567_v3 = vld [vmem:[%s952_s2 + $0xa0] sm:$0xff]  ;;  %v566_v6 = vld [vmem:[%s952_s2 + $0x98] sm:$0xff]  ;;  %v565_v12 = vld [vmem:[%s952_s2 + $0x90] sm:$0xff] }
  0xce   : > { %398 = vmatpush.msra.mxu0 %v559_v62  ;;  %v557_v4 = vld [vmem:[%s952_s2 + $0x60] sm:$0xff]  ;;  %v556_v7 = vld [vmem:[%s952_s2 + $0x58] sm:$0xff]  ;;  %v555_v13 = vld [vmem:[%s952_s2 + $0x50] sm:$0xff] }
  0xcf   : > { %421 = vmatpush.msra.mxu1 %v375_v0  ;;  %455 = vmatpush.msra.mxu2 %v568_v63  ;;  %v373_v5 = vld [vmem:[%s952_s2 + $0x20] sm:$0xff]  ;;  %v372_v9 = vld [vmem:[%s952_s2 + $0x18] sm:$0xff]  ;;  %v371_v15 = vld [vmem:[%s952_s2 + $0x10] sm:$0xff] }
  0xd0   : > { %399 = vmatpush.msra.mxu0 %v558_v1  ;;  %v340_v8 = vld [vmem:[%s954_s4] sm:$0x1]  ;;  %v342_v11 = vld [vmem:[%s954_s4 + $0x1] sm:$0x1]  ;;  %v564_v17 = vld [vmem:[%s952_s2 + $0x88] sm:$0xff] }
  0xd1   : > { %422 = vmatpush.msra.mxu1 %v374_v2  ;;  %456 = vmatpush.msra.mxu2 %v567_v3  ;;  %v341_v10 = vmul.f32 0.0625, %v340_v8  ;;  %v343_v14 = vmul.f32 0.0625, %v342_v11  ;;  %v563_v19 = vld [vmem:[%s952_s2 + $0x80] sm:$0xff]  ;;  %v554_v22 = vld [vmem:[%s952_s2 + $0x48] sm:$0xff] }
  0xd2   : > { %400 = vmatpush.msra.mxu0 %v557_v4  ;;  %v370_v23 = vld [vmem:[%s952_s2 + $0x8] sm:$0xff]  ;;  %v553_v24 = vld [vmem:[%s952_s2 + $0x40] sm:$0xff] }
  0xd3   : > { %423 = vmatpush.msra.mxu1 %v373_v5  ;;  %457 = vmatpush.msra.mxu2 %v566_v6  ;;  %v344_v16 = vmul.f32 %v341_v10, %v341_v10  ;;  %v369_v26 = vld [vmem:[%s952_s2] sm:$0xff] }
  0xd4   : > { %401 = vmatpush.msra.mxu0 %v556_v7  ;;  %v346_v30 = vld [vmem:[%s950_s0 + $0x2] sm:$0x1]  ;;  %v359_v34 = vld [vmem:[%s950_s0 + $0x3] sm:$0x1] }
  0xd5   : > { %424 = vmatpush.msra.mxu1 %v372_v9  ;;  %458 = vmatpush.msra.mxu2 %v565_v12  ;;  %v345_v18 = vsub.f32 %v343_v14, %v344_v16  ;;  %v466_v61 = vld [vmem:[%s954_s4 + $0x2] sm:$0x1]  ;;  %v477_v0 = vld [vmem:[%s954_s4 + $0x3] sm:$0x1] }
  0xd6   : > { %402 = vmatpush.msra.mxu0 %v555_v13 }
  0xd7   : > { %425 = vmatpush.msra.mxu1 %v371_v15  ;;  %459 = vmatpush.msra.mxu2 %v564_v17  ;;  %v347_v20 = vadd.f32 1e-05, %v345_v18 }
  0xd8   : > { %403 = vmatpush.msra.mxu0 %v554_v22 }
  0xd9   : > { %460 = vmatpush.msra.mxu2 %v563_v19  ;;  %618 = vrsqrt.f32 %v347_v20  ;;  %426 = vmatpush.msra.mxu1 %v370_v23  ;;  %vm354_vm4 = vweird.f32 %v347_v20 }
  0xda   : > { %404 = vmatpush.msra.mxu0 %v553_v24 }
  0xdb   : > { %427 = vmatpush.msra.mxu1 %v369_v26 }
  0xdf   : > { %v619_v21 = vpop.eup %618 }
  0xe0   : > { %v349_v25 = vmul.f32 %v619_v21, %v347_v20  ;;  %vm355_vm5 = vweird.f32 %v619_v21 }
  0xe1   : > { %vm356_vm6 = vmor %vm354_vm4, %vm355_vm5 }
  0xe2   : > { %v350_v27 = vmul.f32 %v619_v21, %v349_v25 }
  0xe4   : > { %v351_v28 = vmul.f32 0.5, %v350_v27 }
  0xe6   : > { %v352_v29 = vsub.f32 1.5, %v351_v28 }
  0xe8   : > { %v353_v31 = vmul.f32 %v619_v21, %v352_v29 }
  0xea   : > { %v357_v32 = vsel %vm356_vm6, %v619_v21, %v353_v31 }
  0xeb   : > { %v358_v33 = vmul.f32 %v357_v32, %v346_v30 }
  0xed   : > { %v360_v35 = vmul.f32 %v358_v33, %v341_v10  ;;  %v362_v36 = vperm.slane %v358_v33, 0 }
  0xef   : > { %v361_v37 = vsub.f32 %v359_v34, %v360_v35  ;;  %v363_v39 = vmul.f32 %v362_v36, %v811_v38 }
  0xf1   : > { %v364_v40 = vperm.slane %v361_v37, 0 }
  0xf3   : > { %v365_v41 = vadd.f32 %v364_v40, %v363_v39 }
  0xf5   : > { %v366_v42 = vmax.f32 %v365_v41, 0.0 }
  0xf7   : > { %367 = vst.msk [vmem:[#allocation2 + $0x2] sm:$0xff] %vm211_vm2, %v366_v42  ;;  %561 = vmatmul.msk.f32.vlgmr.msra.gmra.mxu0 %vm211_vm2, %v366_v42 }
  0xfe   : > { %v432_v43 = vld [vmem:[#allocation2 + $0x4] sm:$0xff] }
  0xff   : > { %v368_v44 = vld [vmem:[#allocation2] sm:$0xff]  ;;  %571 = vmatmul.msk.f32.vlgmr.msra.gmra.mxu2 %vm211_vm2, %v432_v43 }
 0x100   : > { %562 = vmatmul.msk.f32.vlgmr.msra.gmra.mxu1 %vm211_vm2, %v368_v44 }
 0x174   : > { %v406_v45 = vpop.f32.mrf.mxu0 }
 0x17d   : > { %v429_v46 = vpop.f32.mrf.mxu1 }
 0x17e   : > { %v430_v47 = vadd.f32 %v429_v46, %v406_v45 }
 0x182   : > { %v462_v48 = vpop.f32.mrf.mxu2 }
 0x183   : > { %v465_v49 = vadd.f32 %v462_v48, %v430_v47 }
 0x185   : > { %v467_v38 = vsel %vm211_vm2, %v465_v49, 0.0  ;;  %v478_v50 = vmul.f32 %v465_v49, %v465_v49 }
 0x186   : > { %v468_v51 = vrot.slane %v467_v38, 4 }
 0x187   : > { %v479_v52 = vsel %vm211_vm2, %v478_v50, 0.0 }
 0x188   : > { %v469_v53 = vadd.f32 %v468_v51, %v467_v38  ;;  %v480_v54 = vrot.slane %v479_v52, 4 }
 0x18a   : > { %v470_v55 = vrot.slane %v469_v53, 2  ;;  %v481_v56 = vadd.f32 %v480_v54, %v479_v52 }
 0x18c   : > { %v471_v57 = vadd.f32 %v470_v55, %v469_v53  ;;  %v482_v58 = vrot.slane %v481_v56, 2 }
 0x18e   : > { %v472_v59 = vrot.slane %v471_v57, 1  ;;  %v483_v60 = vadd.f32 %v482_v58, %v481_v56 }
 0x190   : > { %v473_v62 = vadd.f32 %v472_v59, %v471_v57  ;;  %v484_v63 = vrot.slane %v483_v60, 1 }
 0x192   : > { %v474_v1 = vadd.f32 %v473_v62, %v466_v61  ;;  %v485_v2 = vadd.f32 %v484_v63, %v483_v60 }
 0x194   : > { %476 = vst.msk [vmem:[%s954_s4 + $0x2] sm:$0x1] %vm475_vm7, %v474_v1  ;;  %v486_v3 = vadd.f32 %v485_v2, %v477_v0 }
 0x196   : > { %487 = vst.msk [vmem:[%s954_s4 + $0x3] sm:$0x1] %vm475_vm7, %v486_v3 }
 0x197 PF: > { %s14_s19 = sadd.s32 1, %s658_s19   ;;  %s955_s15 = smov %s650_s17 }
 0x198   : > { %p11_p11 = scmp.ge.s32.totalorder %s14_s19, 6   ;;  %s956_s16 = smov %s654_s18 }
 0x199   : > { %s957_s17 = smov %s960_s20  ;;  %s958_s18 = smov %s964_s21 }
 0x19a   :  { %13 = sbr.rel (!%p11_p11) target bundleno = 3 (0x3), region = 78 }

// kernel: auwgcn_forward.3
= control target key start
LH: loop header
LB: loop body
LE: loop exit
PB: predicated region body
PF: predicated region fallthrough
CT: control target
= control target key end

     0   :  { %vm51_vm0 = vcmask 195584   ;;  %vm156_vm1 = vcmask 523264   ;;  %vm411_vm2 = vcmask 1043456   ;;  %vm420_vm3 = vcmask 97280   ;;  %s2378_s23 = smov 116   ;;  %s2380_s26 = smov 112   ;;  %s3327_s1 = inlined_call_operand.vmem [shape: f32[24,192], index: 1, kind: input, shape index: {}]   ;;  %s3328_s0 = inlined_call_operand.vmem [shape: f32[16,24], index: 0, kind: input, shape index: {}]   ;;  %s3329_s3 = inlined_call_operand.vmem [shape: f32[192,192], index: 3, kind: input, shape index: {}]   ;;  %s3330_s4 = inlined_call_operand.vmem [shape: f32[192,24], index: 4, kind: input, shape index: {}]   ;;  %s3331_s2 = inlined_call_operand.vmem [shape: f32[1,192], index: 2, kind: input, shape index: {}]   ;;  %s3332_s5 = inlined_call_operand.vmem [shape: f32[24,144], index: 5, kind: input, shape index: {}]   ;;  %s3333_s6 = inlined_call_operand.vmem [shape: f32[144,12], index: 6, kind: input, shape index: {}]   ;;  %s3334_s7 = inlined_call_operand.vmem [shape: f32[12,192], index: 7, kind: input, shape index: {}]   ;;  %s3335_s8 = inlined_call_operand.vmem [shape: f32[16,192], index: 8, kind: input, shape index: {}]   ;;  %s3336_s9 = inlined_call_operand.vmem [shape: f32[192,64], index: 9, kind: input, shape index: {}]   ;;  %s3337_s10 = inlined_call_operand.vmem [shape: f32[16,64], index: 10, kind: output, shape index: {0}]   ;;  %s3338_s11 = inlined_call_operand.vmem [shape: f32[1,2,64], index: 11, kind: output, shape index: {1}]  }
   0x1   :  { %v43_v0 = vld [vmem:[%s3327_s1 + $0x20] sm:$0xff]  ;;  %v41_v1 = vld [vmem:[%s3327_s1 + $0x10] sm:$0xff]  ;;  %v44_v2 = vld [vmem:[%s3327_s1 + $0x28] sm:$0xff]  ;;  %vm527_vm12 = vcmask 130048   ;;  %s2382_s27 = smov 96   ;;  %s2383_s28 = smov 68  }
   0x2   :  { %71 = vmatpush.msra.mxu3 %v43_v0  ;;  %v42_v3 = vld [vmem:[%s3327_s1 + $0x18] sm:$0xff]  ;;  %v39_v4 = vld [vmem:[%s3327_s1] sm:$0xff]  ;;  %94 = vmatpush.msra.mxu1 %v44_v2  ;;  %v138_v6 = vld [vmem:[%s3329_s3 + $0xf0] sm:$0xff]  ;;  %s2384_s29 = smov 104   ;;  %s2388_s30 = smov 16  }
   0x3   :  { %v37_v5 = vld [vmem:[%s3328_s0] sm:$0xff]  ;;  %v40_v7 = vld [vmem:[%s3327_s1 + $0x8] sm:$0xff]  ;;  %163 = vmatpush.msra.mxu2 %v138_v6  ;;  %v139_v8 = vld [vmem:[%s3329_s3 + $0xf8] sm:$0xff]  ;;  %s2390_s12 = smov 8   ;;  %s2391_s13 = smov 124  }
   0x4   :  { %72 = vmatpush.msra.mxu3 %v41_v1  ;;  %v136_v9 = vld [vmem:[%s3329_s3 + $0xe0] sm:$0xff]  ;;  %95 = vmatpush.msra.mxu1 %v42_v3  ;;  %v137_v10 = vld [vmem:[%s3329_s3 + $0xe8] sm:$0xff]  ;;  %v134_v11 = vld [vmem:[%s3329_s3 + $0xd0] sm:$0xff]  ;;  %s2393_s14 = smov 20  }
   0x5   :  { %209 = vmatpush.msra.mxu0 %v139_v8  ;;  %164 = vmatpush.msra.mxu2 %v136_v9  ;;  %v135_v12 = vld [vmem:[%s3329_s3 + $0xd8] sm:$0xff]  ;;  %v132_v13 = vld [vmem:[%s3329_s3 + $0xc0] sm:$0xff]  ;;  %v133_v14 = vld [vmem:[%s3329_s3 + $0xc8] sm:$0xff] }
   0x6   :  { %73 = vmatpush.msra.mxu3 %v39_v4  ;;  %96 = vmatpush.msra.mxu1 %v40_v7  ;;  %v154_v15 = vld [vmem:[%s3329_s3 + $0x170] sm:$0xff]  ;;  %v155_v17 = vld [vmem:[%s3329_s3 + $0x178] sm:$0xff]  ;;  %v152_v18 = vld [vmem:[%s3329_s3 + $0x160] sm:$0xff] }
   0x7   :  { %2197 = vmatmul.msk.f32.vlgmr.msra.gmra.mxu3 %vm51_vm0, %v37_v5  ;;  %2199 = vmatmul.msk.f32.vlgmr.msra.gmra.mxu1 %vm51_vm0, %v37_v5  ;;  %v130_v16 = vld [vmem:[%s3329_s3 + $0xb0] sm:$0xff]  ;;  %v131_v19 = vld [vmem:[%s3329_s3 + $0xb8] sm:$0xff]  ;;  %v153_v20 = vld [vmem:[%s3329_s3 + $0x168] sm:$0xff] }
   0x8   :  { %210 = vmatpush.msra.mxu0 %v137_v10  ;;  %165 = vmatpush.msra.mxu2 %v134_v11  ;;  %v150_v21 = vld [vmem:[%s3329_s3 + $0x150] sm:$0xff]  ;;  %v38_v22 = vld [vmem:[%s3328_s0 + $0x8] sm:$0xff]  ;;  %v128_v23 = vld [vmem:[%s3329_s3 + $0xa0] sm:$0xff]  ;;  %s2385_s0 = smov 32  }
   0x9   :  { %194 = vmatpush.msrb.mxu3 %v154_v15  ;;  %240 = vmatpush.msrb.mxu1 %v155_v17  ;;  %v129_v24 = vld [vmem:[%s3329_s3 + $0xa8] sm:$0xff]  ;;  %v126_v25 = vld [vmem:[%s3329_s3 + $0x90] sm:$0xff]  ;;  %v151_v26 = vld [vmem:[%s3329_s3 + $0x158] sm:$0xff] }
   0xa   :  { %211 = vmatpush.msra.mxu0 %v135_v12  ;;  %166 = vmatpush.msra.mxu2 %v132_v13  ;;  %v127_v27 = vld [vmem:[%s3329_s3 + $0x98] sm:$0xff]  ;;  %v148_v28 = vld [vmem:[%s3329_s3 + $0x140] sm:$0xff]  ;;  %v149_v30 = vld [vmem:[%s3329_s3 + $0x148] sm:$0xff] }
   0xb   :  { %195 = vmatpush.msrb.mxu3 %v152_v18  ;;  %241 = vmatpush.msrb.mxu1 %v153_v20  ;;  %v124_v29 = vld [vmem:[%s3329_s3 + $0x80] sm:$0xff]  ;;  %v125_v31 = vld [vmem:[%s3329_s3 + $0x88] sm:$0xff]  ;;  %v146_v32 = vld [vmem:[%s3329_s3 + $0x130] sm:$0xff] }
   0xc   :  { %212 = vmatpush.msra.mxu0 %v133_v14  ;;  %167 = vmatpush.msra.mxu2 %v130_v16  ;;  %v122_v33 = vld [vmem:[%s3329_s3 + $0x70] sm:$0xff]  ;;  %v147_v34 = vld [vmem:[%s3329_s3 + $0x138] sm:$0xff]  ;;  %v144_v36 = vld [vmem:[%s3329_s3 + $0x120] sm:$0xff] }
   0xd   :  { %196 = vmatpush.msrb.mxu3 %v150_v21  ;;  %242 = vmatpush.msrb.mxu1 %v151_v26  ;;  %v123_v35 = vld [vmem:[%s3329_s3 + $0x78] sm:$0xff]  ;;  %v120_v37 = vld [vmem:[%s3329_s3 + $0x60] sm:$0xff]  ;;  %v121_v38 = vld [vmem:[%s3329_s3 + $0x68] sm:$0xff] }
   0xe   :  { %213 = vmatpush.msra.mxu0 %v131_v19  ;;  %168 = vmatpush.msra.mxu2 %v128_v23  ;;  %v118_v39 = vld [vmem:[%s3329_s3 + $0x50] sm:$0xff]  ;;  %v119_v40 = vld [vmem:[%s3329_s3 + $0x58] sm:$0xff]  ;;  %v116_v41 = vld [vmem:[%s3329_s3 + $0x40] sm:$0xff] }
   0xf   :  { %2198 = vmatmul.msk.f32.gmra.mxu3 %vm51_vm0, %v38_v22  ;;  %2200 = vmatmul.msk.f32.gmra.mxu1 %vm51_vm0, %v38_v22  ;;  %v117_v42 = vld [vmem:[%s3329_s3 + $0x48] sm:$0xff]  ;;  %v114_v43 = vld [vmem:[%s3329_s3 + $0x30] sm:$0xff]  ;;  %v115_v44 = vld [vmem:[%s3329_s3 + $0x38] sm:$0xff] }
  0x10   :  { %214 = vmatpush.msra.mxu0 %v129_v24  ;;  %169 = vmatpush.msra.mxu2 %v126_v25  ;;  %v112_v45 = vld [vmem:[%s3329_s3 + $0x20] sm:$0xff]  ;;  %v113_v46 = vld [vmem:[%s3329_s3 + $0x28] sm:$0xff]  ;;  %v142_v48 = vld [vmem:[%s3329_s3 + $0x110] sm:$0xff] }
  0x11   :  { %197 = vmatpush.msrb.mxu3 %v148_v28  ;;  %243 = vmatpush.msrb.mxu1 %v149_v30  ;;  %v145_v47 = vld [vmem:[%s3329_s3 + $0x128] sm:$0xff]  ;;  %v110_v49 = vld [vmem:[%s3329_s3 + $0x10] sm:$0xff]  ;;  %v111_v50 = vld [vmem:[%s3329_s3 + $0x18] sm:$0xff] }
  0x12   :  { %215 = vmatpush.msra.mxu0 %v127_v27  ;;  %170 = vmatpush.msra.mxu2 %v124_v29  ;;  %v143_v51 = vld [vmem:[%s3329_s3 + $0x118] sm:$0xff]  ;;  %v140_v52 = vld [vmem:[%s3329_s3 + $0x100] sm:$0xff]  ;;  %v109_v54 = vld [vmem:[%s3329_s3 + $0x8] sm:$0xff] }
  0x13   :  { %198 = vmatpush.msrb.mxu3 %v146_v32  ;;  %244 = vmatpush.msrb.mxu1 %v147_v34  ;;  %v108_v53 = vld [vmem:[%s3329_s3] sm:$0xff]  ;;  %v141_v55 = vld [vmem:[%s3329_s3 + $0x108] sm:$0xff]  ;;  %v270_v56 = vld [vmem:[%s3330_s4 + $0x78] sm:$0xff]  ;;  %s2392_s3 = smov 44  }
  0x14   :  { %216 = vmatpush.msra.mxu0 %v125_v31  ;;  %171 = vmatpush.msra.mxu2 %v122_v33  ;;  %v269_v57 = vld [vmem:[%s3330_s4 + $0x70] sm:$0xff]  ;;  %v268_v58 = vld [vmem:[%s3330_s4 + $0x68] sm:$0xff]  ;;  %v278_v59 = vld [vmem:[%s3330_s4 + $0xb8] sm:$0xff] }
  0x15   :  { %199 = vmatpush.msrb.mxu3 %v144_v36  ;;  %245 = vmatpush.msrb.mxu1 %v145_v47  ;;  %v277_v60 = vld [vmem:[%s3330_s4 + $0xb0] sm:$0xff]  ;;  %v267_v61 = vld [vmem:[%s3330_s4 + $0x60] sm:$0xff]  ;;  %v276_v62 = vld [vmem:[%s3330_s4 + $0xa8] sm:$0xff] }
  0x16   :  { %217 = vmatpush.msra.mxu0 %v123_v35  ;;  %172 = vmatpush.msra.mxu2 %v120_v37  ;;  %v266_v63 = vld [vmem:[%s3330_s4 + $0x58] sm:$0xff]  ;;  %v275_v0 = vld [vmem:[%s3330_s4 + $0xa0] sm:$0xff]  ;;  %v265_v2 = vld [vmem:[%s3330_s4 + $0x50] sm:$0xff] }
  0x17   :  { %200 = vmatpush.msrb.mxu3 %v142_v48  ;;  %246 = vmatpush.msrb.mxu1 %v143_v51  ;;  %v45_v1 = vld [vmem:[%s3331_s2] sm:$0x3]  ;;  %v274_v3 = vld [vmem:[%s3330_s4 + $0x98] sm:$0xff]  ;;  %v264_v4 = vld [vmem:[%s3330_s4 + $0x48] sm:$0xff]  ;;  %s2389_s2 = smov 48  }
  0x18   :  { %218 = vmatpush.msra.mxu0 %v121_v38  ;;  %173 = vmatpush.msra.mxu2 %v118_v39  ;;  %v273_v5 = vld [vmem:[%s3330_s4 + $0x90] sm:$0xff]  ;;  %v48_v6 = vperm.slane %v45_v1, 1  ;;  %v263_v7 = vld [vmem:[%s3330_s4 + $0x40] sm:$0xff]  ;;  %v262_v9 = vld [vmem:[%s3330_s4 + $0x38] sm:$0xff]  ;;  %v47_v11 = vperm.slane %v45_v1, 0 }
  0x19   :  { %201 = vmatpush.msrb.mxu3 %v140_v52  ;;  %247 = vmatpush.msrb.mxu1 %v141_v55  ;;  %v261_v13 = vld [vmem:[%s3330_s4 + $0x30] sm:$0xff]  ;;  %v260_v15 = vld [vmem:[%s3330_s4 + $0x28] sm:$0xff]  ;;  %v259_v24 = vld [vmem:[%s3330_s4 + $0x20] sm:$0xff] }
  0x1a   :  { %219 = vmatpush.msra.mxu0 %v119_v40  ;;  %174 = vmatpush.msra.mxu2 %v116_v41  ;;  %v272_v25 = vld [vmem:[%s3330_s4 + $0x88] sm:$0xff]  ;;  %v258_v26 = vld [vmem:[%s3330_s4 + $0x18] sm:$0xff]  ;;  %v271_v27 = vld [vmem:[%s3330_s4 + $0x80] sm:$0xff] }
  0x1b   :  { %285 = vmatpush.msra.mxu3 %v270_v56  ;;  %316 = vmatpush.msra.mxu1 %v278_v59  ;;  %v257_v28 = vld [vmem:[%s3330_s4 + $0x10] sm:$0xff]  ;;  %v256_v29 = vld [vmem:[%s3330_s4 + $0x8] sm:$0xff]  ;;  %v255_v30 = vld [vmem:[%s3330_s4] sm:$0xff]  ;;  %s2387_s4 = smov 80  }
  0x1c   :  { %220 = vmatpush.msra.mxu0 %v117_v42  ;;  %175 = vmatpush.msra.mxu2 %v114_v43  ;;  %v335_v43 = vld [vmem:[%s3332_s5 + $0x20] sm:$0xff]  ;;  %v332_v48 = vld [vmem:[%s3332_s5 + $0x8] sm:$0xff] }
  0x1d   :  { %286 = vmatpush.msra.mxu3 %v269_v57  ;;  %317 = vmatpush.msra.mxu1 %v277_v60  ;;  %v331_v47 = vld [vmem:[%s3332_s5] sm:$0xff] }
  0x1e   :  { %221 = vmatpush.msra.mxu0 %v115_v44  ;;  %176 = vmatpush.msra.mxu2 %v112_v45  ;;  %v336_v44 = vld [vmem:[%s3332_s5 + $0x28] sm:$0xff]  ;;  %v333_v45 = vld [vmem:[%s3332_s5 + $0x10] sm:$0xff] }
  0x1f   :  { %287 = vmatpush.msra.mxu3 %v268_v58  ;;  %318 = vmatpush.msra.mxu1 %v276_v62  ;;  %v416_v55 = vrot.slane %v336_v44, 4 }
  0x20   :  { %222 = vmatpush.msra.mxu0 %v113_v46  ;;  %177 = vmatpush.msra.mxu2 %v110_v49  ;;  %v334_v46 = vld [vmem:[%s3332_s5 + $0x18] sm:$0xff]  ;;  %v413_v49 = vrot.slane %v335_v43, 4 }
  0x21   :  { %288 = vmatpush.msra.mxu3 %v267_v61  ;;  %319 = vmatpush.msra.mxu1 %v275_v0 }
  0x22   :  { %223 = vmatpush.msra.mxu0 %v111_v50  ;;  %178 = vmatpush.msra.mxu2 %v108_v53  ;;  %v401_v50 = vld [vmem:[%s3332_s5 + $0x10] sm:$0xf0]  ;;  %v402_v53 = vld [vmem:[%s3332_s5 + $0x18] sm:$0xf0] }
  0x23   :  { %289 = vmatpush.msra.mxu3 %v266_v63  ;;  %320 = vmatpush.msra.mxu1 %v274_v3  ;;  %v412_v51 = vrot.slane %v401_v50, 4  ;;  %v415_v57 = vrot.slane %v402_v53, 4  ;;  %v523_v3 = vld [vmem:[%s3333_s6 + $0x70] sm:$0xff] }
  0x24   :  { %224 = vmatpush.msra.mxu0 %v109_v54  ;;  %356 = vmatpush.msrb.mxu2 %v335_v43 }
  0x25   :  { %290 = vmatpush.msra.mxu3 %v265_v2  ;;  %321 = vmatpush.msra.mxu1 %v273_v5  ;;  %v414_v52 = vsel %vm411_vm2, %v412_v51, %v413_v49  ;;  %v417_v60 = vsel %vm411_vm2, %v415_v57, %v416_v55  ;;  %v524_v2 = vld [vmem:[%s3333_s6 + $0x78] sm:$0xff] }
  0x26   :  { %379 = vmatpush.msrb.mxu0 %v336_v44  ;;  %357 = vmatpush.msrb.mxu2 %v333_v45 }
  0x27   :  { %291 = vmatpush.msra.mxu3 %v264_v4  ;;  %322 = vmatpush.msra.mxu1 %v272_v25  ;;  %v522_v4 = vld [vmem:[%s3333_s6 + $0x68] sm:$0xff] }
  0x28   :  { %380 = vmatpush.msrb.mxu0 %v334_v46  ;;  %358 = vmatpush.msrb.mxu2 %v331_v47 }
  0x29   :  { %292 = vmatpush.msra.mxu3 %v263_v7  ;;  %323 = vmatpush.msra.mxu1 %v271_v27  ;;  %v520_v7 = vld [vmem:[%s3333_s6 + $0x58] sm:$0xff] }
  0x2a   :  { %381 = vmatpush.msrb.mxu0 %v332_v48 }
  0x2b   :  { %293 = vmatpush.msra.mxu3 %v262_v9  ;;  %v518_v9 = vld [vmem:[%s3333_s6 + $0x48] sm:$0xff] }
  0x2d   :  { %294 = vmatpush.msra.mxu3 %v261_v13  ;;  %v514_v13 = vld [vmem:[%s3333_s6 + $0x28] sm:$0xff] }
  0x2f   :  { %295 = vmatpush.msra.mxu3 %v260_v15 }
  0x31   :  { %296 = vmatpush.msra.mxu3 %v259_v24 }
  0x33   :  { %297 = vmatpush.msra.mxu3 %v258_v26 }
  0x35   :  { %298 = vmatpush.msra.mxu3 %v257_v28  ;;  %v2816_v28 = vld [vmem:[%s3334_s7 + $0x10] sm:$0xf] }
  0x37   :  { %299 = vmatpush.msra.mxu3 %v256_v29  ;;  %v2821_v29 = vld [vmem:[%s3334_s7] sm:$0xff] }
  0x39   :  { %300 = vmatpush.msra.mxu3 %v255_v30 }
  0x84   :  { %v98_v8 = vpop.f32.mrf.mxu1 }
  0x85   :  { %v99_v10 = vadd.f32 %v98_v8, %v48_v6  ;;  %v519_v8 = vld [vmem:[%s3333_s6 + $0x50] sm:$0xff] }
  0x87   :  { %v105_v12 = vmax.f32 %v99_v10, 0.0  ;;  %v517_v10 = vld [vmem:[%s3333_s6 + $0x40] sm:$0xff] }
  0x89   :  { %2201 = vmatmul.msk.f32.vlgmr.msrb.gmra.mxu3 %vm156_vm1, %v105_v12  ;;  %2203 = vmatmul.msk.f32.vlgmr.msrb.gmra.mxu1 %vm156_vm1, %v105_v12  ;;  %v515_v12 = vld [vmem:[%s3333_s6 + $0x30] sm:$0xff] }
  0x8a   :  { %v75_v14 = vpop.f32.mrf.mxu3  ;;  %2211 = vmatpush.msk.msrb.mxu1 %vm411_vm2, %v413_v49  ;;  %534 = vmatpush.msrb.mxu3 %v524_v2 }
  0x8b   :  { %v76_v16 = vadd.f32 %v75_v14, %v47_v11  ;;  %v513_v14 = vld [vmem:[%s3333_s6 + $0x20] sm:$0xff] }
  0x8c   :  { %v101_v18 = vpop.f32.mrf.mxu1  ;;  %444 = vmatpush.msrb.mxu1 %v414_v52  ;;  %535 = vmatpush.msrb.mxu3 %v523_v3 }
  0x8d   :  { %v104_v17 = vmax.f32 %v76_v16, 0.0  ;;  %v102_v19 = vadd.f32 %v101_v18, %v48_v6  ;;  %v521_v6 = vld [vmem:[%s3333_s6 + $0x60] sm:$0xff]  ;;  %v512_v16 = vld [vmem:[%s3333_s6 + $0x18] sm:$0xff]  ;;  %v510_v18 = vld [vmem:[%s3333_s6 + $0x8] sm:$0xff] }
  0x8e   :  { %536 = vmatpush.msrb.mxu3 %v522_v4 }
  0x8f   :  { %179 = vmatmul.f32.vlgmr.msra.gmra.mxu2 %v104_v17  ;;  %225 = vmatmul.f32.vlgmr.msra.gmra.mxu0 %v104_v17  ;;  %v107_v20 = vmax.f32 %v102_v19, 0.0  ;;  %v511_v17 = vld [vmem:[%s3333_s6 + $0x10] sm:$0xff]  ;;  %v509_v19 = vld [vmem:[%s3333_s6] sm:$0xff] }
  0x90   :  { %2347 = vmatpush.msra.mxu2 %v336_v44  ;;  %537 = vmatpush.msrb.mxu3 %v521_v6  ;;  %v2865_v6 = vld [vmem:[%s3334_s7 + $0x8] sm:$0xff] }
  0x91   :  { %2202 = vmatmul.msk.f32.gmra.mxu3 %vm156_vm1, %v107_v20  ;;  %2204 = vmatmul.msk.f32.gmra.mxu1 %vm156_vm1, %v107_v20 }
  0x92   :  { %v78_v21 = vpop.f32.mrf.mxu3  ;;  %2348 = vmatpush.msra.mxu2 %v334_v46  ;;  %538 = vmatpush.msrb.mxu3 %v520_v7 }
  0x93   :  { %v79_v22 = vadd.f32 %v78_v21, %v47_v11  ;;  %v516_v11 = vld [vmem:[%s3333_s6 + $0x38] sm:$0xff]  ;;  %v526_v21 = vld [vmem:[%s3333_s6 + $0x88] sm:$0xff] }
  0x94   :  { %2349 = vmatpush.msra.mxu2 %v332_v48  ;;  %539 = vmatpush.msrb.mxu3 %v519_v8 }
  0x95   :  { %v106_v23 = vmax.f32 %v79_v22, 0.0  ;;  %571 = vmatpush.msra.mxu0 %v526_v21  ;;  %v525_v22 = vld [vmem:[%s3333_s6 + $0x80] sm:$0xff]  ;;  %s2379_s6 = smov 92  }
  0x96   :  { %540 = vmatpush.msrb.mxu3 %v518_v9 }
  0x97   :  { %182 = vmatmul.f32.gmra.mxu2 %v106_v23  ;;  %228 = vmatmul.f32.gmra.mxu0 %v106_v23 }
  0x98   :  { %541 = vmatpush.msrb.mxu3 %v517_v10  ;;  %572 = vmatpush.msra.mxu0 %v525_v22 }
  0x9a   :  { %542 = vmatpush.msrb.mxu3 %v516_v11 }
  0x9c   :  { %543 = vmatpush.msrb.mxu3 %v515_v12 }
  0x9e   :  { %544 = vmatpush.msrb.mxu3 %v514_v13 }
  0xa0   :  { %545 = vmatpush.msrb.mxu3 %v513_v14 }
  0xa2   :  { %546 = vmatpush.msrb.mxu3 %v512_v16 }
  0xa4   :  { %547 = vmatpush.msrb.mxu3 %v511_v17 }
  0xa6   :  { %548 = vmatpush.msrb.mxu3 %v510_v18 }
  0xa8   :  { %549 = vmatpush.msrb.mxu3 %v509_v19 }
 0x106   :  { %v249_v31 = vpop.f32.mrf.mxu1 }
 0x10c   :  { %v226_v32 = vpop.f32.mrf.mxu0  ;;  %v203_v34 = vpop.f32.mrf.mxu3 }
 0x10d   :  { %v2705_v33 = vadd.f32 %v249_v31, %v226_v32 }
 0x10e   :  { %v252_v36 = vpop.f32.mrf.mxu1 }
 0x10f   :  { %2205 = vmatmul.msk.f32.vlgmr.msra.gmra.mxu1 %vm156_vm1, %v2705_v33 }
 0x110   :  { %2219 = vmatpush.msk.msra.mxu1 %vm411_vm2, %v2816_v28 }
 0x112   :  { %v180_v35 = vpop.f32.mrf.mxu2  ;;  %641 = vmatpush.msra.mxu1 %v2821_v29 }
 0x113   :  { %v2709_v37 = vadd.f32 %v203_v34, %v180_v35 }
 0x114   :  { %v229_v38 = vpop.f32.mrf.mxu0  ;;  %v206_v40 = vpop.f32.mrf.mxu3 }
 0x115   :  { %v2711_v39 = vadd.f32 %v252_v36, %v229_v38  ;;  %301 = vmatmul.f32.vlgmr.msra.gmra.mxu3 %v2709_v37 }
 0x117   :  { %2206 = vmatmul.msk.f32.gmra.mxu1 %vm156_vm1, %v2711_v39 }
 0x11a   :  { %v183_v41 = vpop.f32.mrf.mxu2 }
 0x11b   :  { %v2716_v42 = vadd.f32 %v206_v40, %v183_v41 }
 0x11d   :  { %304 = vmatmul.f32.gmra.mxu3 %v2716_v42 }
 0x18c   :  { %v325_v54 = vpop.f32.mrf.mxu1 }
 0x194   :  { %v328_v61 = vpop.f32.mrf.mxu1 }
 0x198   :  { %v302_v56 = vpop.f32.mrf.mxu3 }
 0x199   :  { %v326_v58 = vadd.f32 %v325_v54, %v302_v56 }
 0x19b   :  { %403 = vrot.lane.b32.xlu0 %v326_v58, %s2378_s23  ;;  %2207 = vmatmul.msk.f32.vlgmr.msrb.gmra.mxu2 %vm51_vm0, %v326_v58  ;;  %v475_v59 = vsel %vm420_vm3, %v326_v58, -inf }
 0x19c   :  { %2209 = vmatmul.msk.f32.vlgmr.msrb.gmra.mxu0 %vm51_vm0, %v326_v58  ;;  %476 = vmax.xlane.f32.xlu1 %v475_v59 }
 0x19d   :  { %2214 = vmatpush.msk.msrb.mxu2 %vm411_vm2, %v416_v55  ;;  %2225 = vmatpush.msk.msrb.mxu0 %vm411_vm2, %v2816_v28 }
 0x19f   :  { %467 = vmatpush.msrb.mxu2 %v417_v60  ;;  %697 = vmatpush.msrb.mxu0 %v2821_v29 }
 0x1a0   :  { %v305_v62 = vpop.f32.mrf.mxu3 }
 0x1a1   :  { %v329_v63 = vadd.f32 %v328_v61, %v305_v62 }
 0x1a3   :  { %405 = vrot.lane.b32.xlu0 %v329_v63, %s2378_s23  ;;  %2208 = vmatmul.msk.f32.gmra.mxu2 %vm51_vm0, %v329_v63  ;;  %v478_v0 = vsel %vm420_vm3, %v329_v63, -inf }
 0x1a4   :  { %479 = vmax.xlane.f32.xlu1 %v478_v0 }
 0x1ab   :  { %2210 = vmatmul.msk.f32.vlgmr.msra.gmra.mxu2 %vm51_vm0, %v329_v63 }
 0x20d   :  { %v404_v1 = vpop.permute.xlu0 %403 }
 0x20e   :  { %2212 = vmatmul.msk.f32.vlgmr.msrb.gmra.mxu1 %vm420_vm3, %v404_v1  ;;  %2215 = vmatmul.msk.f32.vlgmr.msrb.gmra.mxu2 %vm420_vm3, %v404_v1 }
 0x20f   :  { %v477_v23 = vpop.xlane.xlu1 %476 }
 0x215   :  { %v406_v5 = vpop.permute.xlu0 %405 }
 0x216   :  { %2213 = vmatmul.msk.f32.gmra.mxu1 %vm420_vm3, %v406_v5  ;;  %2216 = vmatmul.msk.f32.gmra.mxu2 %vm420_vm3, %v406_v5  ;;  %v2860_v5 = vld [vmem:[%s3334_s7 + $0x18] sm:$0xf] }
 0x217   :  { %v480_v41 = vpop.xlane.xlu1 %479  ;;  %2222 = vmatpush.msk.msra.mxu2 %vm411_vm2, %v2860_v5  ;;  %2228 = vmatpush.msk.msrb.mxu1 %vm411_vm2, %v2860_v5 }
 0x219   :  { %v383_v31 = vpop.f32.mrf.mxu0  ;;  %664 = vmatpush.msra.mxu2 %v2865_v6  ;;  %720 = vmatpush.msrb.mxu1 %v2865_v6 }
 0x21a   :  { %v394_v38 = vmul.f32 0.01, %v383_v31  ;;  %vm390_vm6 = vcmp.gt.f32.partialorder %v383_v31, 0.0 }
 0x21c   :  { %v398_v48 = vsel %vm390_vm6, %v383_v31, %v394_v38  ;;  %v2895_v38 = vld [vmem:[%s3335_s8 + $0x18] sm:$0xff] }
 0x21d   :  { %775 = vmatpush.msra.mxu3 %v2895_v38 }
 0x21e   :  { %v360_v15 = vpop.f32.mrf.mxu2 }
 0x21f   :  { %v393_v26 = vmul.f32 0.01, %v360_v15  ;;  %vm389_vm4 = vcmp.gt.f32.partialorder %v360_v15, 0.0 }
 0x221   :  { %v397_v32 = vsel %vm389_vm4, %v360_v15, %v393_v26 }
 0x226   :  { %v363_v20 = vpop.f32.mrf.mxu2 }
 0x227   :  { %v395_v45 = vmul.f32 0.01, %v363_v20  ;;  %vm391_vm8 = vcmp.gt.f32.partialorder %v363_v20, 0.0 }
 0x229   :  { %v399_v52 = vsel %vm391_vm8, %v363_v20, %v395_v45 }
 0x22e   :  { %v386_v24 = vpop.f32.mrf.mxu2 }
 0x22f   :  { %v396_v57 = vmul.f32 0.01, %v386_v24  ;;  %vm392_vm10 = vcmp.gt.f32.partialorder %v386_v24, 0.0 }
 0x231   :  { %v400_v62 = vsel %vm392_vm10, %v386_v24, %v396_v57 }
 0x28b   :  { %v446_v25 = vpop.f32.mrf.mxu1 }
 0x28c   :  { %v481_v27 = vadd.f32 %v477_v23, %v446_v25 }
 0x28e   :  { %vm485_vm5 = vcmp.gt.f32.partialorder %v481_v27, 0.0  ;;  %v489_v30 = vmul.f32 0.01, %v481_v27 }
 0x290   :  { %v493_v34 = vsel %vm485_vm5, %v481_v27, %v489_v30 }
 0x291   :  { %v497_v35 = vsub.f32 %v397_v32, %v493_v34  ;;  %v469_v36 = vpop.f32.mrf.mxu2 }
 0x292   :  { %v482_v40 = vadd.f32 %v477_v23, %v469_v36  ;;  %v2890_v36 = vld [vmem:[%s3335_s8 + $0x10] sm:$0xff] }
 0x293   :  { %v501_v43 = vmul.f32 1.442695, %v497_v35  ;;  %v449_v44 = vpop.f32.mrf.mxu1  ;;  %752 = vmatpush.msrb.mxu2 %v2890_v36 }
 0x294   :  { %vm486_vm7 = vcmp.gt.f32.partialorder %v482_v40, 0.0  ;;  %v490_v46 = vmul.f32 0.01, %v482_v40  ;;  %v483_v47 = vadd.f32 %v480_v41, %v449_v44 }
 0x295   :  { %2366 = vpow2.f32 %v501_v43 }
 0x296   :  { %v494_v49 = vsel %vm486_vm7, %v482_v40, %v490_v46  ;;  %vm487_vm9 = vcmp.gt.f32.partialorder %v483_v47, 0.0  ;;  %v491_v50 = vmul.f32 0.01, %v483_v47  ;;  %v2902_v40 = vld [vmem:[%s3335_s8] sm:$0xff] }
 0x297   :  { %v498_v51 = vsub.f32 %v398_v48, %v494_v49  ;;  %753 = vmatpush.msrb.mxu2 %v2902_v40 }
 0x298   :  { %v495_v53 = vsel %vm487_vm9, %v483_v47, %v491_v50 }
 0x299   :  { %v503_v54 = vmul.f32 1.442695, %v498_v51  ;;  %v499_v55 = vsub.f32 %v399_v52, %v495_v53  ;;  %v472_v56 = vpop.f32.mrf.mxu2 }
 0x29a   :  { %v484_v58 = vadd.f32 %v480_v41, %v472_v56  ;;  %v2907_v41 = vld [vmem:[%s3335_s8 + $0x8] sm:$0xff]  ;;  %s2381_s8 = smov 64  }
 0x29b   :  { %v2829_v59 = vpop.eup %2366  ;;  %2368 = vpow2.f32 %v503_v54  ;;  %v505_v60 = vmul.f32 1.442695, %v499_v55  ;;  %776 = vmatpush.msra.mxu3 %v2907_v41 }
 0x29c   :  { %vm488_vm11 = vcmp.gt.f32.partialorder %v484_v58, 0.0  ;;  %v492_v61 = vmul.f32 0.01, %v484_v58  ;;  %550 = vmatmul.f32.vlgmr.msrb.gmra.mxu3 %v2829_v59 }
 0x29d   :  { %2370 = vpow2.f32 %v505_v60  ;;  %891 = vmatpush.msrb.mxu3 %v2895_v38 }
 0x29e   :  { %v496_v63 = vsel %vm488_vm11, %v484_v58, %v492_v61 }
 0x29f   :  { %v500_v0 = vsub.f32 %v400_v62, %v496_v63  ;;  %892 = vmatpush.msrb.mxu3 %v2907_v41 }
 0x2a1   :  { %v2832_v1 = vpop.eup %2368  ;;  %v507_v2 = vmul.f32 1.442695, %v500_v0 }
 0x2a2   :  { %2217 = vmatmul.msk.f32.vlgmr.msra.gmra.mxu0 %vm527_vm12, %v2832_v1 }
 0x2a3   :  { %v2836_v3 = vpop.eup %2370  ;;  %2372 = vpow2.f32 %v507_v2  ;;  %2235 = vmatpush.msk.msra.mxu0 %vm411_vm2, %v2816_v28 }
 0x2a4   :  { %794 = vrot.lane.b32.xlu1 %v2836_v3, %s2378_s23  ;;  %553 = vmatmul.f32.gmra.mxu3 %v2836_v3 }
 0x2a5   :  { %815 = vmatpush.msra.mxu0 %v2821_v29 }
 0x2a9   :  { %v2844_v4 = vpop.eup %2372 }
 0x2aa   :  { %2218 = vmatmul.msk.f32.gmra.mxu0 %vm527_vm12, %v2844_v4 }
 0x2ac   :  { %1026 = vrot.lane.b32.xlu1 %v2836_v3, %s2379_s6 }
 0x2b2   :  { %2226 = vmatmul.msk.f32.vlgmr.msrb.gmra.mxu0 %vm420_vm3, %v2829_v59 }
 0x2b3   :  { %2245 = vmatpush.msk.msrb.mxu0 %vm411_vm2, %v2816_v28 }
 0x2b5   :  { %931 = vmatpush.msrb.mxu0 %v2821_v29 }
 0x2ba   :  { %2227 = vmatmul.msk.f32.gmra.mxu0 %vm420_vm3, %v2836_v3 }
 0x316   :  { %v795_v49 = vpop.permute.xlu1 %794 }
 0x31e   :  { %v1027_v58 = vpop.permute.xlu1 %1026 }
 0x31f   :  { %v551_v7 = vpop.f32.mrf.mxu3  ;;  %v574_v8 = vpop.f32.mrf.mxu0 }
 0x320   :  { %v575_v9 = vadd.f32 %v574_v8, %v551_v7 }
 0x322   :  { %2374 = vrcp.f32 %v575_v9  ;;  %v591_v16 = vand.u32 2147483648, %v575_v9  ;;  %v589_v18 = vand.u32 2147483647, %v575_v9  ;;  %vm585_vm14 = vweird.f32 %v575_v9 }
 0x324   :  { %v592_v21 = vor.u32 1.1754944e-38, %v591_v16  ;;  %vm590_vm0 = vcmp.eq.f32.partialorder %v589_v18, 8.507059e+37 }
 0x327   :  { %v554_v10 = vpop.f32.mrf.mxu3  ;;  %v577_v11 = vpop.f32.mrf.mxu0 }
 0x328   :  { %v2375_v12 = vpop.eup %2374  ;;  %v578_v13 = vadd.f32 %v577_v11, %v554_v10 }
 0x329   :  { %v581_v14 = vmul.f32 %v2375_v12, %v575_v9  ;;  %vm586_vm13 = vweird.f32 %v2375_v12 }
 0x32a   :  { %2376 = vrcp.f32 %v578_v13  ;;  %vm587_vm15 = vmor %vm585_vm14, %vm586_vm13  ;;  %v606_v26 = vand.u32 2147483648, %v578_v13  ;;  %v604_v30 = vand.u32 2147483647, %v578_v13  ;;  %vm600_vm5 = vweird.f32 %v578_v13 }
 0x32b   :  { %v582_v15 = vsub.f32 1.0, %v581_v14 }
 0x32c   :  { %v607_v32 = vor.u32 1.1754944e-38, %v606_v26  ;;  %vm605_vm7 = vcmp.eq.f32.partialorder %v604_v30, 8.507059e+37 }
 0x32d   :  { %v583_v17 = vmul.f32 %v2375_v12, %v582_v15 }
 0x32f   :  { %v584_v19 = vadd.f32 %v2375_v12, %v583_v17  ;;  %v699_v11 = vpop.f32.mrf.mxu0 }
 0x330   :  { %v2377_v20 = vpop.eup %2376 }
 0x331   :  { %v588_v22 = vsel %vm587_vm15, %v2375_v12, %v584_v19  ;;  %v596_v23 = vmul.f32 %v2377_v20, %v578_v13  ;;  %vm601_vm4 = vweird.f32 %v2377_v20 }
 0x332   :  { %v593_v24 = vsel %vm590_vm0, %v592_v21, %v588_v22  ;;  %vm602_vm6 = vmor %vm600_vm5, %vm601_vm4 }
 0x333   :  { %2220 = vmatmul.msk.f32.vlgmr.msra.gmra.mxu1 %vm420_vm3, %v593_v24  ;;  %2223 = vmatmul.msk.f32.vlgmr.msra.gmra.mxu2 %vm420_vm3, %v593_v24  ;;  %v597_v25 = vsub.f32 1.0, %v596_v23 }
 0x334   :  { %2238 = vmatpush.msk.msra.mxu1 %vm411_vm2, %v2860_v5  ;;  %868 = vmatpush.msra.mxu2 %v2890_v36 }
 0x335   :  { %v598_v27 = vmul.f32 %v2377_v20, %v597_v25 }
 0x336   :  { %838 = vmatpush.msra.mxu1 %v2865_v6  ;;  %869 = vmatpush.msra.mxu2 %v2902_v40 }
 0x337   :  { %v599_v31 = vadd.f32 %v2377_v20, %v598_v27  ;;  %v3107_v17 = vpop.f32.mrf.mxu0 }
 0x339   :  { %v603_v34 = vsel %vm602_vm6, %v2377_v20, %v599_v31 }
 0x33a   :  { %v608_v35 = vsel %vm605_vm7, %v607_v32, %v603_v34 }
 0x33b   :  { %2221 = vmatmul.msk.f32.gmra.mxu1 %vm420_vm3, %v608_v35  ;;  %2224 = vmatmul.msk.f32.gmra.mxu2 %vm420_vm3, %v608_v35 }
 0x343   :  { %2229 = vmatmul.msk.f32.vlgmr.msrb.gmra.mxu1 %vm420_vm3, %v2829_v59 }
 0x344   :  { %2248 = vmatpush.msk.msrb.mxu1 %vm411_vm2, %v2860_v5 }
 0x346   :  { %954 = vmatpush.msrb.mxu1 %v2865_v6 }
 0x34b   :  { %2230 = vmatmul.msk.f32.gmra.mxu1 %vm420_vm3, %v2836_v3 }
 0x3b0   :  { %v643_v43 = vpop.f32.mrf.mxu1 }
 0x3b1   :  { %v672_v44 = vmul.f32 %v643_v43, %v2709_v37 }
 0x3b3   :  { %846 = vrot.lane.b32.xlu2 %v672_v44, %s2380_s26  ;;  %2231 = vmatmul.msk.f32.vlgmr.msrb.gmra.mxu2 %vm527_vm12, %v672_v44 }
 0x3b4   :  { %2233 = vmatmul.msk.f32.vlgmr.msra.gmra.mxu3 %vm527_vm12, %v672_v44  ;;  %984 = vmatpush.msrb.mxu2 %v2890_v36 }
 0x3b5   :  { %1007 = vmatpush.msra.mxu3 %v2895_v38 }
 0x3b6   :  { %985 = vmatpush.msrb.mxu2 %v2902_v40  ;;  %v666_v37 = vpop.f32.mrf.mxu2 }
 0x3b7   :  { %1008 = vmatpush.msra.mxu3 %v2907_v41 }
 0x3b8   :  { %v646_v45 = vpop.f32.mrf.mxu1 }
 0x3b9   :  { %v674_v46 = vmul.f32 %v646_v45, %v2716_v42 }
 0x3bb   :  { %792 = vrot.lane.b32.xlu2 %v2829_v59, %s2378_s23  ;;  %1196 = vrot.lane.b32.xlu1 %v674_v46, %s2381_s8  ;;  %s2386_s23 = smov 56  }
 0x3bc   :  { %848 = vrot.lane.b32.xlu0 %v674_v46, %s2380_s26  ;;  %2232 = vmatmul.msk.f32.gmra.mxu2 %vm527_vm12, %v674_v46 }
 0x3bd   :  { %2234 = vmatmul.msk.f32.gmra.mxu3 %vm527_vm12, %v674_v46 }
 0x3be   :  { %v669_v42 = vpop.f32.mrf.mxu2 }
 0x3bf   :  { %v2947_v47 = vmul.f32 %v669_v42, %v2711_v39  ;;  %v2963_v39 = vmul.f32 %v666_v37, %v2705_v33 }
 0x3c0   :  { %v722_v12 = vpop.f32.mrf.mxu1 }
 0x3c3   :  { %962 = vrot.lane.b32.xlu2 %v672_v44, %s2382_s27  ;;  %1256 = vrot.lane.b32.xlu1 %v2829_v59, %s2383_s28 }
 0x3c4   :  { %908 = vrot.lane.b32.xlu0 %v2829_v59, %s2384_s29 }
 0x3c8   :  { %v3109_v18 = vpop.f32.mrf.mxu1 }
 0x3cb   :  { %1426 = vrot.lane.b32.xlu1 %v672_v44, %s2385_s0  ;;  %964 = vrot.lane.b32.xlu2 %v674_v46, %s2382_s27 }
 0x3cc   :  { %910 = vrot.lane.b32.xlu0 %v2836_v3, %s2384_s29 }
 0x3d3   :  { %1374 = vrot.lane.b32.xlu1 %v2836_v3, %s2386_s23  ;;  %1078 = vrot.lane.b32.xlu2 %v672_v44, %s2387_s4 }
 0x3d4   :  { %1024 = vrot.lane.b32.xlu0 %v2829_v59, %s2379_s6 }
 0x3db   :  { %1544 = vrot.lane.b32.xlu1 %v674_v46, %s2388_s30  ;;  %1080 = vrot.lane.b32.xlu2 %v674_v46, %s2387_s4 }
 0x3dc   :  { %1194 = vrot.lane.b32.xlu0 %v672_v44, %s2381_s8 }
 0x3e3   :  { %1606 = vrot.lane.b32.xlu1 %v2836_v3, %s2385_s0  ;;  %1140 = vrot.lane.b32.xlu2 %v2829_v59, %s2387_s4 }
 0x3e4   :  { %1142 = vrot.lane.b32.xlu0 %v2836_v3, %s2387_s4 }
 0x3eb   :  { %1774 = vrot.lane.b32.xlu1 %v2947_v47, %s2380_s26  ;;  %1310 = vrot.lane.b32.xlu2 %v672_v44, %s2389_s2 }
 0x3ec   :  { %1312 = vrot.lane.b32.xlu0 %v674_v46, %s2389_s2 }
 0x3f3   :  { %1834 = vrot.lane.b32.xlu1 %v2829_v59, %s2390_s12  ;;  %1258 = vrot.lane.b32.xlu2 %v2836_v3, %s2383_s28 }
 0x3f4   :  { %1372 = vrot.lane.b32.xlu0 %v2829_v59, %s2386_s23 }
 0x3fb   :  { %1838 = vrot.lane.b32.xlu1 %v2836_v3, %s2390_s12  ;;  %1428 = vrot.lane.b32.xlu2 %v674_v46, %s2385_s0 }
 0x3fc   :  { %1542 = vrot.lane.b32.xlu0 %v672_v44, %s2388_s30 }
 0x403   :  { %1957 = vrot.lane.b32.xlu1 %v2832_v1, %s2391_s13  ;;  %1488 = vrot.lane.b32.xlu2 %v2829_v59, %s2392_s3 }
 0x404   :  { %1490 = vrot.lane.b32.xlu0 %v2836_v3, %s2392_s3 }
 0x40b   :  { %1604 = vrot.lane.b32.xlu2 %v2829_v59, %s2385_s0 }
 0x40c   :  { %1772 = vrot.lane.b32.xlu0 %v2963_v39, %s2380_s26 }
 0x40d   :  { %v847_v48 = vpop.permute.xlu2 %846 }
 0x40e   :  { %2241 = vmatmul.msk.f32.vlgmr.msra.gmra.mxu2 %vm527_vm12, %v847_v48  ;;  %2243 = vmatmul.msk.f32.vlgmr.msrb.gmra.mxu3 %vm527_vm12, %v847_v48 }
 0x40f   :  { %1100 = vmatpush.msra.mxu2 %v2890_v36  ;;  %1123 = vmatpush.msrb.mxu3 %v2895_v38 }
 0x411   :  { %1101 = vmatpush.msra.mxu2 %v2902_v40  ;;  %1124 = vmatpush.msrb.mxu3 %v2907_v41 }
 0x413   :  { %1718 = vrot.lane.b32.xlu2 %v2829_v59, %s2393_s14 }
 0x414   :  { %1720 = vrot.lane.b32.xlu0 %v2836_v3, %s2393_s14 }
 0x415   :  { %v793_v33 = vpop.permute.xlu2 %792 }
 0x416   :  { %2236 = vmatmul.msk.f32.vlgmr.msra.gmra.mxu0 %vm420_vm3, %v793_v33  ;;  %2239 = vmatmul.msk.f32.vlgmr.msra.gmra.mxu1 %vm420_vm3, %v793_v33 }
 0x417   :  { %2255 = vmatpush.msk.msra.mxu0 %vm411_vm2, %v2816_v28  ;;  %2258 = vmatpush.msk.msra.mxu1 %vm411_vm2, %v2860_v5 }
 0x419   :  { %1047 = vmatpush.msra.mxu0 %v2821_v29  ;;  %1070 = vmatpush.msra.mxu1 %v2865_v6 }
 0x41b   :  { %1895 = vrot.lane.b32.xlu2 %v2963_v39, %s2382_s27 }
 0x41c   :  { %1836 = vrot.lane.b32.xlu0 %v2832_v1, %s2390_s12 }
 0x41d   :  { %v963_v50 = vpop.permute.xlu2 %962 }
 0x41e   :  { %2237 = vmatmul.msk.f32.gmra.mxu0 %vm420_vm3, %v795_v49  ;;  %2240 = vmatmul.msk.f32.gmra.mxu1 %vm420_vm3, %v795_v49 }
 0x423   :  { %1897 = vrot.lane.b32.xlu2 %v2947_v47, %s2382_s27 }
 0x424   :  { %1840 = vrot.lane.b32.xlu0 %v2844_v4, %s2390_s12 }
 0x425   :  { %v965_v53 = vpop.permute.xlu2 %964 }
 0x42b   :  { %2011 = vrot.lane.b32.xlu2 %v2963_v39, %s2387_s4 }
 0x42c   :  { %2013 = vrot.lane.b32.xlu0 %v2947_v47, %s2387_s4 }
 0x42d   :  { %v1079_v55 = vpop.permute.xlu2 %1078  ;;  %v1197_v61 = vpop.permute.xlu1 %1196 }
 0x42e   :  { %v849_v51 = vpop.permute.xlu0 %848 }
 0x42f   :  { %2242 = vmatmul.msk.f32.gmra.mxu2 %vm527_vm12, %v849_v51  ;;  %2244 = vmatmul.msk.f32.gmra.mxu3 %vm527_vm12, %v849_v51 }
 0x433   :  { %1959 = vrot.lane.b32.xlu2 %v2844_v4, %s2391_s13 }
 0x435   :  { %v1081_v57 = vpop.permute.xlu2 %1080  ;;  %v1257_v0 = vpop.permute.xlu1 %1256 }
 0x436   :  { %v909_v52 = vpop.permute.xlu0 %908  ;;  %v755_v9 = vpop.f32.mrf.mxu2 }
 0x437   :  { %2246 = vmatmul.msk.f32.vlgmr.msrb.gmra.mxu0 %vm420_vm3, %v909_v52  ;;  %2249 = vmatmul.msk.f32.vlgmr.msrb.gmra.mxu1 %vm420_vm3, %v909_v52  ;;  %v778_v10 = vpop.f32.mrf.mxu3  ;;  %v784_v25 = vmul.f32 %v755_v9, %v699_v11 }
 0x438   :  { %2251 = vmatmul.msk.f32.vlgmr.msrb.gmra.mxu2 %vm527_vm12, %v963_v50  ;;  %2253 = vmatmul.msk.f32.vlgmr.msra.gmra.mxu3 %vm527_vm12, %v963_v50  ;;  %v785_v26 = vmul.f32 %v778_v10, %v722_v12 }
 0x439   :  { %1216 = vmatpush.msrb.mxu2 %v2890_v36  ;;  %1239 = vmatpush.msra.mxu3 %v2895_v38 }
 0x43a   :  { %2265 = vmatpush.msk.msrb.mxu0 %vm411_vm2, %v2816_v28  ;;  %2268 = vmatpush.msk.msrb.mxu1 %vm411_vm2, %v2860_v5 }
 0x43b   :  { %1217 = vmatpush.msrb.mxu2 %v2902_v40  ;;  %1240 = vmatpush.msra.mxu3 %v2907_v41 }
 0x43c   :  { %1163 = vmatpush.msrb.mxu0 %v2821_v29  ;;  %1186 = vmatpush.msrb.mxu1 %v2865_v6 }
 0x43d   :  { %v1141_v60 = vpop.permute.xlu2 %1140  ;;  %v1427_v3 = vpop.permute.xlu1 %1426 }
 0x43e   :  { %v911_v54 = vpop.permute.xlu0 %910 }
 0x43f   :  { %2247 = vmatmul.msk.f32.gmra.mxu0 %vm420_vm3, %v911_v54  ;;  %2250 = vmatmul.msk.f32.gmra.mxu1 %vm420_vm3, %v911_v54  ;;  %v3099_v15 = vpop.f32.mrf.mxu2 }
 0x440   :  { %2252 = vmatmul.msk.f32.gmra.mxu2 %vm527_vm12, %v965_v53  ;;  %2254 = vmatmul.msk.f32.gmra.mxu3 %vm527_vm12, %v965_v53  ;;  %v3101_v16 = vpop.f32.mrf.mxu3 }
 0x445   :  { %v1311_v63 = vpop.permute.xlu2 %1310  ;;  %v1375_v8 = vpop.permute.xlu1 %1374 }
 0x446   :  { %v1025_v56 = vpop.permute.xlu0 %1024 }
 0x447   :  { %2256 = vmatmul.msk.f32.vlgmr.msra.gmra.mxu0 %vm420_vm3, %v1025_v56  ;;  %2259 = vmatmul.msk.f32.vlgmr.msra.gmra.mxu1 %vm420_vm3, %v1025_v56 }
 0x448   :  { %2261 = vmatmul.msk.f32.vlgmr.msra.gmra.mxu2 %vm527_vm12, %v1079_v55  ;;  %2263 = vmatmul.msk.f32.vlgmr.msrb.gmra.mxu3 %vm527_vm12, %v1079_v55 }
 0x449   :  { %1332 = vmatpush.msra.mxu2 %v2890_v36  ;;  %1355 = vmatpush.msrb.mxu3 %v2895_v38 }
 0x44a   :  { %2275 = vmatpush.msk.msra.mxu0 %vm411_vm2, %v2816_v28  ;;  %2278 = vmatpush.msk.msra.mxu1 %vm411_vm2, %v2860_v5 }
 0x44b   :  { %1333 = vmatpush.msra.mxu2 %v2902_v40  ;;  %1356 = vmatpush.msrb.mxu3 %v2907_v41 }
 0x44c   :  { %1279 = vmatpush.msra.mxu0 %v2821_v29  ;;  %1302 = vmatpush.msra.mxu1 %v2865_v6 }
 0x44d   :  { %v1259_v2 = vpop.permute.xlu2 %1258  ;;  %v1545_v20 = vpop.permute.xlu1 %1544 }
 0x44e   :  { %v1195_v59 = vpop.permute.xlu0 %1194 }
 0x44f   :  { %2257 = vmatmul.msk.f32.gmra.mxu0 %vm420_vm3, %v1027_v58  ;;  %2260 = vmatmul.msk.f32.gmra.mxu1 %vm420_vm3, %v1027_v58 }
 0x450   :  { %2262 = vmatmul.msk.f32.gmra.mxu2 %vm527_vm12, %v1081_v57  ;;  %2264 = vmatmul.msk.f32.gmra.mxu3 %vm527_vm12, %v1081_v57 }
 0x455   :  { %v1429_v7 = vpop.permute.xlu2 %1428  ;;  %v1607_v35 = vpop.permute.xlu1 %1606 }
 0x456   :  { %v1143_v62 = vpop.permute.xlu0 %1142 }
 0x457   :  { %2266 = vmatmul.msk.f32.vlgmr.msrb.gmra.mxu0 %vm420_vm3, %v1141_v60  ;;  %2269 = vmatmul.msk.f32.vlgmr.msrb.gmra.mxu1 %vm420_vm3, %v1141_v60  ;;  %v787_v60 = vmul.f32 %v3101_v16, %v3109_v18 }
 0x458   :  { %2271 = vmatmul.msk.f32.vlgmr.msrb.gmra.mxu2 %vm527_vm12, %v1195_v59  ;;  %2273 = vmatmul.msk.f32.vlgmr.msra.gmra.mxu3 %vm527_vm12, %v1195_v59  ;;  %v786_v59 = vmul.f32 %v3099_v15, %v3107_v17 }
 0x459   :  { %1448 = vmatpush.msrb.mxu2 %v2890_v36  ;;  %1471 = vmatpush.msra.mxu3 %v2895_v38 }
 0x45a   :  { %2285 = vmatpush.msk.msrb.mxu0 %vm411_vm2, %v2816_v28  ;;  %2288 = vmatpush.msk.msrb.mxu1 %vm411_vm2, %v2860_v5 }
 0x45b   :  { %1449 = vmatpush.msrb.mxu2 %v2902_v40  ;;  %1472 = vmatpush.msra.mxu3 %v2907_v41 }
 0x45c   :  { %1395 = vmatpush.msrb.mxu0 %v2821_v29  ;;  %1418 = vmatpush.msrb.mxu1 %v2865_v6 }
 0x45d   :  { %v1489_v14 = vpop.permute.xlu2 %1488  ;;  %v1775_v45 = vpop.permute.xlu1 %1774 }
 0x45e   :  { %v1313_v1 = vpop.permute.xlu0 %1312 }
 0x45f   :  { %2267 = vmatmul.msk.f32.gmra.mxu0 %vm420_vm3, %v1143_v62  ;;  %2270 = vmatmul.msk.f32.gmra.mxu1 %vm420_vm3, %v1143_v62 }
 0x460   :  { %2272 = vmatmul.msk.f32.gmra.mxu2 %vm527_vm12, %v1197_v61  ;;  %2274 = vmatmul.msk.f32.gmra.mxu3 %vm527_vm12, %v1197_v61 }
 0x465   :  { %v1605_v31 = vpop.permute.xlu2 %1604 }
 0x466   :  { %v1373_v4 = vpop.permute.xlu0 %1372 }
 0x467   :  { %2276 = vmatmul.msk.f32.vlgmr.msra.gmra.mxu0 %vm420_vm3, %v1257_v0  ;;  %2279 = vmatmul.msk.f32.vlgmr.msra.gmra.mxu1 %vm420_vm3, %v1257_v0 }
 0x468   :  { %2281 = vmatmul.msk.f32.vlgmr.msra.gmra.mxu2 %vm527_vm12, %v1311_v63  ;;  %2283 = vmatmul.msk.f32.vlgmr.msrb.gmra.mxu3 %vm527_vm12, %v1311_v63 }
 0x469   :  { %1564 = vmatpush.msra.mxu2 %v2890_v36  ;;  %1587 = vmatpush.msrb.mxu3 %v2895_v38 }
 0x46a   :  { %2295 = vmatpush.msk.msra.mxu0 %vm411_vm2, %v2816_v28  ;;  %2298 = vmatpush.msk.msra.mxu1 %vm411_vm2, %v2860_v5 }
 0x46b   :  { %1565 = vmatpush.msra.mxu2 %v2902_v40  ;;  %1588 = vmatpush.msrb.mxu3 %v2907_v41 }
 0x46c   :  { %1511 = vmatpush.msra.mxu0 %v2821_v29  ;;  %1534 = vmatpush.msra.mxu1 %v2865_v6 }
 0x46d   :  { %v1719_v44 = vpop.permute.xlu2 %1718 }
 0x46e   :  { %v1543_v13 = vpop.permute.xlu0 %1542 }
 0x46f   :  { %2277 = vmatmul.msk.f32.gmra.mxu0 %vm420_vm3, %v1259_v2  ;;  %2280 = vmatmul.msk.f32.gmra.mxu1 %vm420_vm3, %v1259_v2 }
 0x470   :  { %2282 = vmatmul.msk.f32.gmra.mxu2 %vm527_vm12, %v1313_v1  ;;  %2284 = vmatmul.msk.f32.gmra.mxu3 %vm527_vm12, %v1313_v1 }
 0x476   :  { %v1491_v19 = vpop.permute.xlu0 %1490 }
 0x477   :  { %2286 = vmatmul.msk.f32.vlgmr.msrb.gmra.mxu0 %vm420_vm3, %v1373_v4  ;;  %2289 = vmatmul.msk.f32.vlgmr.msrb.gmra.mxu1 %vm420_vm3, %v1373_v4 }
 0x478   :  { %2291 = vmatmul.msk.f32.vlgmr.msrb.gmra.mxu2 %vm527_vm12, %v1427_v3  ;;  %2293 = vmatmul.msk.f32.vlgmr.msra.gmra.mxu3 %vm527_vm12, %v1427_v3 }
 0x479   :  { %1678 = vmatpush.msrb.mxu2 %v2890_v36  ;;  %1701 = vmatpush.msra.mxu3 %v2895_v38 }
 0x47a   :  { %2305 = vmatpush.msk.msrb.mxu0 %vm411_vm2, %v2816_v28  ;;  %2308 = vmatpush.msk.msrb.mxu1 %vm411_vm2, %v2860_v5 }
 0x47b   :  { %1679 = vmatpush.msrb.mxu2 %v2902_v40  ;;  %1702 = vmatpush.msra.mxu3 %v2907_v41 }
 0x47c   :  { %1627 = vmatpush.msrb.mxu0 %v2821_v29  ;;  %1650 = vmatpush.msrb.mxu1 %v2865_v6 }
 0x47e   :  { %v1773_v43 = vpop.permute.xlu0 %1772 }
 0x47f   :  { %2287 = vmatmul.msk.f32.gmra.mxu0 %vm420_vm3, %v1375_v8  ;;  %2290 = vmatmul.msk.f32.gmra.mxu1 %vm420_vm3, %v1375_v8 }
 0x480   :  { %2292 = vmatmul.msk.f32.gmra.mxu2 %vm527_vm12, %v1429_v7  ;;  %2294 = vmatmul.msk.f32.gmra.mxu3 %vm527_vm12, %v1429_v7 }
 0x486   :  { %v1721_v46 = vpop.permute.xlu0 %1720 }
 0x487   :  { %2296 = vmatmul.msk.f32.vlgmr.msra.gmra.mxu0 %vm420_vm3, %v1489_v14  ;;  %2299 = vmatmul.msk.f32.vlgmr.msra.gmra.mxu1 %vm420_vm3, %v1489_v14 }
 0x488   :  { %2301 = vmatmul.msk.f32.vlgmr.msra.gmra.mxu2 %vm527_vm12, %v1543_v13  ;;  %2303 = vmatmul.msk.f32.vlgmr.msrb.gmra.mxu3 %vm527_vm12, %v1543_v13 }
 0x489   :  { %1794 = vmatpush.msra.mxu2 %v2890_v36  ;;  %1817 = vmatpush.msrb.mxu3 %v2895_v38 }
 0x48a   :  { %2315 = vmatpush.msk.msra.mxu0 %vm411_vm2, %v2816_v28  ;;  %2318 = vmatpush.msk.msra.mxu1 %vm411_vm2, %v2860_v5 }
 0x48b   :  { %1795 = vmatpush.msra.mxu2 %v2902_v40  ;;  %1818 = vmatpush.msrb.mxu3 %v2907_v41 }
 0x48c   :  { %1741 = vmatpush.msra.mxu0 %v2821_v29  ;;  %1764 = vmatpush.msra.mxu1 %v2865_v6 }
 0x48f   :  { %2297 = vmatmul.msk.f32.gmra.mxu0 %vm420_vm3, %v1491_v19  ;;  %2300 = vmatmul.msk.f32.gmra.mxu1 %vm420_vm3, %v1491_v19 }
 0x490   :  { %2302 = vmatmul.msk.f32.gmra.mxu2 %vm527_vm12, %v1545_v20  ;;  %2304 = vmatmul.msk.f32.gmra.mxu3 %vm527_vm12, %v1545_v20 }
 0x491   :  { %v871_v21 = vpop.f32.mrf.mxu2  ;;  %v894_v22 = vpop.f32.mrf.mxu3 }
 0x493   :  { %v817_v23 = vpop.f32.mrf.mxu0  ;;  %v840_v24 = vpop.f32.mrf.mxu1 }
 0x494   :  { %v900_v27 = vmul.f32 %v871_v21, %v817_v23  ;;  %v901_v30 = vmul.f32 %v894_v22, %v840_v24 }
 0x496   :  { %v3119_v32 = vadd.f32 %v900_v27, %v784_v25  ;;  %v3121_v34 = vadd.f32 %v901_v30, %v785_v26 }
 0x497   :  { %2306 = vmatmul.msk.f32.vlgmr.msrb.gmra.mxu0 %vm420_vm3, %v1605_v31  ;;  %2309 = vmatmul.msk.f32.vlgmr.msrb.gmra.mxu1 %vm420_vm3, %v1605_v31 }
 0x498   :  { %2311 = vmatmul.msk.f32.vlgmr.msrb.gmra.mxu2 %vm527_vm12, %v2963_v39  ;;  %2313 = vmatmul.msk.f32.vlgmr.msra.gmra.mxu3 %vm527_vm12, %v2963_v39 }
 0x499   :  { %1917 = vmatpush.msrb.mxu2 %v2890_v36  ;;  %1940 = vmatpush.msra.mxu3 %v2895_v38 }
 0x49a   :  { %2325 = vmatpush.msk.msrb.mxu0 %vm411_vm2, %v2816_v28  ;;  %2328 = vmatpush.msk.msrb.mxu1 %vm411_vm2, %v2860_v5 }
 0x49b   :  { %1918 = vmatpush.msrb.mxu2 %v2902_v40  ;;  %1941 = vmatpush.msra.mxu3 %v2907_v41  ;;  %v820_v37 = vpop.f32.mrf.mxu0  ;;  %v843_v42 = vpop.f32.mrf.mxu1 }
 0x49c   :  { %1864 = vmatpush.msrb.mxu0 %v2821_v29  ;;  %1887 = vmatpush.msrb.mxu1 %v2865_v6 }
 0x49f   :  { %2307 = vmatmul.msk.f32.gmra.mxu0 %vm420_vm3, %v1607_v35  ;;  %2310 = vmatmul.msk.f32.gmra.mxu1 %vm420_vm3, %v1607_v35 }
 0x4a0   :  { %2312 = vmatmul.msk.f32.gmra.mxu2 %vm527_vm12, %v2947_v47  ;;  %2314 = vmatmul.msk.f32.gmra.mxu3 %vm527_vm12, %v2947_v47  ;;  %v1896_v47 = vpop.permute.xlu2 %1895 }
 0x4a7   :  { %2316 = vmatmul.msk.f32.vlgmr.msra.gmra.mxu0 %vm420_vm3, %v1719_v44  ;;  %2319 = vmatmul.msk.f32.vlgmr.msra.gmra.mxu1 %vm420_vm3, %v1719_v44 }
 0x4a8   :  { %2321 = vmatmul.msk.f32.vlgmr.msra.gmra.mxu2 %vm527_vm12, %v1773_v43  ;;  %2323 = vmatmul.msk.f32.vlgmr.msrb.gmra.mxu3 %vm527_vm12, %v1773_v43  ;;  %v1898_v48 = vpop.permute.xlu2 %1897 }
 0x4a9   :  { %2033 = vmatpush.msra.mxu2 %v2890_v36  ;;  %2056 = vmatpush.msrb.mxu3 %v2895_v38  ;;  %v1835_v36 = vpop.permute.xlu1 %1834 }
 0x4aa   :  { %2335 = vmatpush.msk.msra.mxu0 %vm411_vm2, %v2816_v28  ;;  %2338 = vmatpush.msk.msra.mxu1 %vm411_vm2, %v2860_v5  ;;  %v1837_v28 = vpop.permute.xlu0 %1836  ;;  %vm1842_vm2 = vcmask 64512  }
 0x4ab   :  { %2034 = vmatpush.msra.mxu2 %v2902_v40  ;;  %2057 = vmatpush.msrb.mxu3 %v2907_v41 }
 0x4ac   :  { %1980 = vmatpush.msra.mxu0 %v2821_v29  ;;  %2003 = vmatpush.msra.mxu1 %v2865_v6  ;;  %v1843_v6 = vsel %vm1842_vm2, %v1835_v36, %v1837_v28 }
 0x4af   :  { %2317 = vmatmul.msk.f32.gmra.mxu0 %vm420_vm3, %v1721_v46  ;;  %2320 = vmatmul.msk.f32.gmra.mxu1 %vm420_vm3, %v1721_v46 }
 0x4b0   :  { %2322 = vmatmul.msk.f32.gmra.mxu2 %vm527_vm12, %v1775_v45  ;;  %2324 = vmatmul.msk.f32.gmra.mxu3 %vm527_vm12, %v1775_v45  ;;  %v2012_v61 = vpop.permute.xlu2 %2011 }
 0x4b1   :  { %v1839_v33 = vpop.permute.xlu1 %1838 }
 0x4b2   :  { %v874_v5 = vpop.f32.mrf.mxu2  ;;  %v897_v38 = vpop.f32.mrf.mxu3 }
 0x4b3   :  { %v902_v40 = vmul.f32 %v874_v5, %v820_v37  ;;  %v903_v41 = vmul.f32 %v897_v38, %v843_v42  ;;  %v1841_v49 = vpop.permute.xlu0 %1840 }
 0x4b4   :  { %v933_v39 = vpop.f32.mrf.mxu0  ;;  %v956_v29 = vpop.f32.mrf.mxu1  ;;  %v1844_v56 = vsel %vm1842_vm2, %v1839_v33, %v1841_v49 }
 0x4b5   :  { %v906_v0 = vadd.f32 %v902_v40, %v786_v59  ;;  %v907_v1 = vadd.f32 %v903_v41, %v787_v60 }
 0x4b7   :  { %2326 = vmatmul.msk.f32.vlgmr.msrb.gmra.mxu0 %vm420_vm3, %v1843_v6  ;;  %2329 = vmatmul.msk.f32.vlgmr.msrb.gmra.mxu1 %vm420_vm3, %v1843_v6 }
 0x4b8   :  { %2331 = vmatmul.msk.f32.vlgmr.msrb.gmra.mxu2 %vm527_vm12, %v1896_v47  ;;  %2333 = vmatmul.msk.f32.vlgmr.msra.gmra.mxu3 %vm527_vm12, %v1896_v47  ;;  %v1960_v17 = vpop.permute.xlu2 %1959 }
 0x4b9   :  { %v1958_v8 = vpop.permute.xlu1 %1957 }
 0x4bb   :  { %v987_v50 = vpop.f32.mrf.mxu2  ;;  %v1010_v51 = vpop.f32.mrf.mxu3 }
 0x4bc   :  { %v1016_v52 = vmul.f32 %v987_v50, %v933_v39  ;;  %v1017_v53 = vmul.f32 %v1010_v51, %v956_v29  ;;  %v936_v54 = vpop.f32.mrf.mxu0  ;;  %v959_v55 = vpop.f32.mrf.mxu1 }
 0x4bd   :  { %v2014_v20 = vpop.permute.xlu0 %2013 }
 0x4be   :  { %v1020_v57 = vadd.f32 %v1016_v52, %v3119_v32  ;;  %v1021_v58 = vadd.f32 %v1017_v53, %v3121_v34 }
 0x4bf   :  { %2327 = vmatmul.msk.f32.gmra.mxu0 %vm420_vm3, %v1844_v56  ;;  %2330 = vmatmul.msk.f32.gmra.mxu1 %vm420_vm3, %v1844_v56 }
 0x4c0   :  { %2332 = vmatmul.msk.f32.gmra.mxu2 %vm527_vm12, %v1898_v48  ;;  %2334 = vmatmul.msk.f32.gmra.mxu3 %vm527_vm12, %v1898_v48 }
 0x4c3   :  { %v990_v62 = vpop.f32.mrf.mxu2  ;;  %v1013_v63 = vpop.f32.mrf.mxu3 }
 0x4c4   :  { %v1018_v2 = vmul.f32 %v990_v62, %v936_v54  ;;  %v1019_v3 = vmul.f32 %v1013_v63, %v959_v55  ;;  %v1049_v4 = vpop.f32.mrf.mxu0  ;;  %v1072_v7 = vpop.f32.mrf.mxu1 }
 0x4c6   :  { %v1022_v9 = vadd.f32 %v1018_v2, %v906_v0  ;;  %v1023_v10 = vadd.f32 %v1019_v3, %v907_v1 }
 0x4c7   :  { %2336 = vmatmul.msk.f32.vlgmr.msra.gmra.mxu0 %vm420_vm3, %v1958_v8  ;;  %2339 = vmatmul.msk.f32.vlgmr.msra.gmra.mxu1 %vm420_vm3, %v1958_v8 }
 0x4c8   :  { %2341 = vmatmul.msk.f32.vlgmr.msra.gmra.mxu2 %vm527_vm12, %v2012_v61  ;;  %2343 = vmatmul.msk.f32.vlgmr.msrb.gmra.mxu3 %vm527_vm12, %v2012_v61 }
 0x4cb   :  { %v1103_v11 = vpop.f32.mrf.mxu2  ;;  %v1126_v12 = vpop.f32.mrf.mxu3 }
 0x4cc   :  { %v1132_v13 = vmul.f32 %v1103_v11, %v1049_v4  ;;  %v1133_v14 = vmul.f32 %v1126_v12, %v1072_v7  ;;  %v1052_v15 = vpop.f32.mrf.mxu0  ;;  %v1075_v16 = vpop.f32.mrf.mxu1 }
 0x4ce   :  { %v1136_v18 = vadd.f32 %v1132_v13, %v1020_v57  ;;  %v1137_v19 = vadd.f32 %v1133_v14, %v1021_v58 }
 0x4cf   :  { %2337 = vmatmul.msk.f32.gmra.mxu0 %vm420_vm3, %v1960_v17  ;;  %2340 = vmatmul.msk.f32.gmra.mxu1 %vm420_vm3, %v1960_v17  ;;  %v2088_v17 = vld [vmem:[%s3336_s9 + $0x78] sm:$0xff]  ;;  %vm2175_vm3 = vcmask 516096  }
 0x4d0   :  { %2342 = vmatmul.msk.f32.gmra.mxu2 %vm527_vm12, %v2014_v20  ;;  %2344 = vmatmul.msk.f32.gmra.mxu3 %vm527_vm12, %v2014_v20 }
 0x4d1   :  { %2103 = vmatpush.msrb.mxu0 %v2088_v17 }
 0x4d3   :  { %v1106_v21 = vpop.f32.mrf.mxu2  ;;  %v1129_v22 = vpop.f32.mrf.mxu3 }
 0x4d4   :  { %v1134_v23 = vmul.f32 %v1106_v21, %v1052_v15  ;;  %v1135_v24 = vmul.f32 %v1129_v22, %v1075_v16  ;;  %v1165_v25 = vpop.f32.mrf.mxu0  ;;  %v1188_v26 = vpop.f32.mrf.mxu1 }
 0x4d6   :  { %v1138_v27 = vadd.f32 %v1134_v23, %v1022_v9  ;;  %v1139_v30 = vadd.f32 %v1135_v24, %v1023_v10  ;;  %v2086_v23 = vld [vmem:[%s3336_s9 + $0x68] sm:$0xff]  ;;  %v2085_v24 = vld [vmem:[%s3336_s9 + $0x60] sm:$0xff] }
 0x4db   :  { %v1219_v31 = vpop.f32.mrf.mxu2  ;;  %v1242_v32 = vpop.f32.mrf.mxu3 }
 0x4dc   :  { %v1248_v34 = vmul.f32 %v1219_v31, %v1165_v25  ;;  %v1249_v35 = vmul.f32 %v1242_v32, %v1188_v26  ;;  %v1168_v43 = vpop.f32.mrf.mxu0  ;;  %v1191_v44 = vpop.f32.mrf.mxu1  ;;  %v2084_v25 = vld [vmem:[%s3336_s9 + $0x58] sm:$0xff]  ;;  %v2083_v26 = vld [vmem:[%s3336_s9 + $0x50] sm:$0xff] }
 0x4de   :  { %v1252_v45 = vadd.f32 %v1248_v34, %v1136_v18  ;;  %v1253_v46 = vadd.f32 %v1249_v35, %v1137_v19  ;;  %v2087_v18 = vld [vmem:[%s3336_s9 + $0x70] sm:$0xff]  ;;  %v2082_v34 = vld [vmem:[%s3336_s9 + $0x48] sm:$0xff]  ;;  %v2081_v35 = vld [vmem:[%s3336_s9 + $0x40] sm:$0xff] }
 0x4df   :  { %2104 = vmatpush.msrb.mxu0 %v2087_v18 }
 0x4e1   :  { %2105 = vmatpush.msrb.mxu0 %v2086_v23 }
 0x4e3   :  { %v1222_v37 = vpop.f32.mrf.mxu2  ;;  %v1245_v42 = vpop.f32.mrf.mxu3  ;;  %2106 = vmatpush.msrb.mxu0 %v2085_v24 }
 0x4e4   :  { %v1250_v47 = vmul.f32 %v1222_v37, %v1168_v43  ;;  %v1251_v36 = vmul.f32 %v1245_v42, %v1191_v44  ;;  %v1281_v28 = vpop.f32.mrf.mxu0  ;;  %v1304_v5 = vpop.f32.mrf.mxu1  ;;  %v2096_v43 = vld [vmem:[%s3336_s9 + $0xb8] sm:$0xff] }
 0x4e5   :  { %2107 = vmatpush.msrb.mxu0 %v2084_v25  ;;  %v2080_v44 = vld [vmem:[%s3336_s9 + $0x38] sm:$0xff]  ;;  %2134 = vmatpush.msrb.mxu1 %v2096_v43 }
 0x4e6   :  { %v1254_v38 = vadd.f32 %v1250_v47, %v1138_v27  ;;  %v1255_v40 = vadd.f32 %v1251_v36, %v1139_v30 }
 0x4e7   :  { %2108 = vmatpush.msrb.mxu0 %v2083_v26 }
 0x4e9   :  { %2109 = vmatpush.msrb.mxu0 %v2082_v34 }
 0x4eb   :  { %v1335_v41 = vpop.f32.mrf.mxu2  ;;  %v1358_v39 = vpop.f32.mrf.mxu3  ;;  %2110 = vmatpush.msrb.mxu0 %v2081_v35 }
 0x4ec   :  { %v1364_v29 = vmul.f32 %v1335_v41, %v1281_v28  ;;  %v1365_v6 = vmul.f32 %v1358_v39, %v1304_v5  ;;  %v1284_v48 = vpop.f32.mrf.mxu0  ;;  %v1307_v33 = vpop.f32.mrf.mxu1  ;;  %v2094_v28 = vld [vmem:[%s3336_s9 + $0xa8] sm:$0xff]  ;;  %v2092_v41 = vld [vmem:[%s3336_s9 + $0x98] sm:$0xff] }
 0x4ed   :  { %2111 = vmatpush.msrb.mxu0 %v2080_v44  ;;  %v2078_v5 = vld [vmem:[%s3336_s9 + $0x28] sm:$0xff]  ;;  %v2076_v39 = vld [vmem:[%s3336_s9 + $0x18] sm:$0xff] }
 0x4ee   :  { %v1368_v49 = vadd.f32 %v1364_v29, %v1252_v45  ;;  %v1369_v50 = vadd.f32 %v1365_v6, %v1253_v46  ;;  %v2095_v45 = vld [vmem:[%s3336_s9 + $0xb0] sm:$0xff] }
 0x4ef   :  { %2135 = vmatpush.msrb.mxu1 %v2095_v45  ;;  %v2079_v46 = vld [vmem:[%s3336_s9 + $0x30] sm:$0xff] }
 0x4f0   :  { %2112 = vmatpush.msrb.mxu0 %v2079_v46  ;;  %v2091_v29 = vld [vmem:[%s3336_s9 + $0x90] sm:$0xff] }
 0x4f1   :  { %2136 = vmatpush.msrb.mxu1 %v2094_v28  ;;  %v2075_v6 = vld [vmem:[%s3336_s9 + $0x10] sm:$0xff] }
 0x4f2   :  { %2113 = vmatpush.msrb.mxu0 %v2078_v5 }
 0x4f3   :  { %v1338_v51 = vpop.f32.mrf.mxu2  ;;  %v1361_v52 = vpop.f32.mrf.mxu3 }
 0x4f4   :  { %v1366_v53 = vmul.f32 %v1338_v51, %v1284_v48  ;;  %v1367_v54 = vmul.f32 %v1361_v52, %v1307_v33  ;;  %v1397_v55 = vpop.f32.mrf.mxu0  ;;  %v1420_v56 = vpop.f32.mrf.mxu1  ;;  %v2090_v51 = vld [vmem:[%s3336_s9 + $0x88] sm:$0xff] }
 0x4f5   :  { %v2074_v52 = vld [vmem:[%s3336_s9 + $0x8] sm:$0xff] }
 0x4f6   :  { %v1370_v57 = vadd.f32 %v1366_v53, %v1254_v38  ;;  %v1371_v58 = vadd.f32 %v1367_v54, %v1255_v40  ;;  %v2093_v38 = vld [vmem:[%s3336_s9 + $0xa0] sm:$0xff] }
 0x4f7   :  { %v2077_v40 = vld [vmem:[%s3336_s9 + $0x20] sm:$0xff]  ;;  %2137 = vmatpush.msrb.mxu1 %v2093_v38 }
 0x4f8   :  { %2114 = vmatpush.msrb.mxu0 %v2077_v40  ;;  %v2089_v53 = vld [vmem:[%s3336_s9 + $0x80] sm:$0xff] }
 0x4f9   :  { %2138 = vmatpush.msrb.mxu1 %v2092_v41  ;;  %v2073_v54 = vld [vmem:[%s3336_s9] sm:$0xff] }
 0x4fa   :  { %2115 = vmatpush.msrb.mxu0 %v2076_v39 }
 0x4fb   :  { %v1451_v59 = vpop.f32.mrf.mxu2  ;;  %v1474_v60 = vpop.f32.mrf.mxu3  ;;  %2139 = vmatpush.msrb.mxu1 %v2091_v29 }
 0x4fc   :  { %v1480_v61 = vmul.f32 %v1451_v59, %v1397_v55  ;;  %v1481_v62 = vmul.f32 %v1474_v60, %v1420_v56  ;;  %v1400_v63 = vpop.f32.mrf.mxu0  ;;  %v1423_v0 = vpop.f32.mrf.mxu1  ;;  %2116 = vmatpush.msrb.mxu0 %v2075_v6 }
 0x4fd   :  { %2140 = vmatpush.msrb.mxu1 %v2090_v51 }
 0x4fe   :  { %v3187_v1 = vadd.f32 %v1480_v61, %v1368_v49  ;;  %v3189_v2 = vadd.f32 %v1481_v62, %v1369_v50  ;;  %2117 = vmatpush.msrb.mxu0 %v2074_v52 }
 0x4ff   :  { %2141 = vmatpush.msrb.mxu1 %v2089_v53 }
 0x500   :  { %2118 = vmatpush.msrb.mxu0 %v2073_v54 }
 0x503   :  { %v1454_v3 = vpop.f32.mrf.mxu2  ;;  %v1477_v4 = vpop.f32.mrf.mxu3 }
 0x504   :  { %v1482_v7 = vmul.f32 %v1454_v3, %v1400_v63  ;;  %v1483_v8 = vmul.f32 %v1477_v4, %v1423_v0  ;;  %v3191_v9 = vpop.f32.mrf.mxu0  ;;  %v3193_v10 = vpop.f32.mrf.mxu1 }
 0x506   :  { %v3195_v11 = vadd.f32 %v1482_v7, %v1370_v57  ;;  %v3197_v12 = vadd.f32 %v1483_v8, %v1371_v58 }
 0x50b   :  { %v3199_v13 = vpop.f32.mrf.mxu2  ;;  %v3201_v14 = vpop.f32.mrf.mxu3 }
 0x50c   :  { %v3203_v15 = vpop.f32.mrf.mxu0  ;;  %v3205_v16 = vpop.f32.mrf.mxu1  ;;  %v1596_v63 = vmul.f32 %v3199_v13, %v3191_v9  ;;  %v1597_v0 = vmul.f32 %v3201_v14, %v3193_v10 }
 0x50e   :  { %v1600_v17 = vadd.f32 %v1596_v63, %v3187_v1  ;;  %v1601_v18 = vadd.f32 %v1597_v0, %v3189_v2 }
 0x513   :  { %v3213_v19 = vpop.f32.mrf.mxu2  ;;  %v3215_v20 = vpop.f32.mrf.mxu3 }
 0x514   :  { %v3217_v21 = vpop.f32.mrf.mxu0  ;;  %v3219_v22 = vpop.f32.mrf.mxu1  ;;  %v1598_v10 = vmul.f32 %v3213_v19, %v3203_v15  ;;  %v1599_v14 = vmul.f32 %v3215_v20, %v3205_v16 }
 0x51b   :  { %v1681_v27 = vpop.f32.mrf.mxu2  ;;  %v1704_v30 = vpop.f32.mrf.mxu3 }
 0x51c   :  { %v3233_v31 = vpop.f32.mrf.mxu0  ;;  %v3235_v32 = vpop.f32.mrf.mxu1  ;;  %v1710_v7 = vmul.f32 %v1681_v27, %v3217_v21  ;;  %v1711_v8 = vmul.f32 %v1704_v30, %v3219_v22 }
 0x51e   :  { %v1714_v25 = vadd.f32 %v1710_v7, %v1600_v17  ;;  %v1715_v26 = vadd.f32 %v1711_v8, %v1601_v18 }
 0x523   :  { %v1684_v37 = vpop.f32.mrf.mxu2  ;;  %v1707_v42 = vpop.f32.mrf.mxu3 }
 0x524   :  { %v1743_v47 = vpop.f32.mrf.mxu0  ;;  %v1766_v36 = vpop.f32.mrf.mxu1  ;;  %v1712_v1 = vmul.f32 %v1684_v37, %v3233_v31  ;;  %v1713_v2 = vmul.f32 %v1707_v42, %v3235_v32 }
 0x52b   :  { %v1797_v48 = vpop.f32.mrf.mxu2  ;;  %v1820_v33 = vpop.f32.mrf.mxu3 }
 0x52c   :  { %v1746_v49 = vpop.f32.mrf.mxu0  ;;  %v1769_v50 = vpop.f32.mrf.mxu1  ;;  %v1826_v23 = vmul.f32 %v1797_v48, %v1743_v47  ;;  %v1827_v24 = vmul.f32 %v1820_v33, %v1766_v36  ;;  %v1602_v47 = vadd.f32 %v1598_v10, %v3195_v11  ;;  %v1603_v36 = vadd.f32 %v1599_v14, %v3197_v12 }
 0x52e   :  { %v1830_v21 = vadd.f32 %v1826_v23, %v1714_v25  ;;  %v1831_v22 = vadd.f32 %v1827_v24, %v1715_v26  ;;  %v1716_v20 = vadd.f32 %v1712_v1, %v1602_v47  ;;  %v1717_v5 = vadd.f32 %v1713_v2, %v1603_v36 }
 0x533   :  { %v1800_v55 = vpop.f32.mrf.mxu2  ;;  %v1823_v56 = vpop.f32.mrf.mxu3 }
 0x534   :  { %v1866_v57 = vpop.f32.mrf.mxu0  ;;  %v1889_v58 = vpop.f32.mrf.mxu1  ;;  %v1828_v15 = vmul.f32 %v1800_v55, %v1746_v49  ;;  %v1829_v19 = vmul.f32 %v1823_v56, %v1769_v50 }
 0x536   :  { %v1832_v32 = vadd.f32 %v1828_v15, %v1716_v20  ;;  %v1833_v37 = vadd.f32 %v1829_v19, %v1717_v5 }
 0x53b   :  { %v1920_v59 = vpop.f32.mrf.mxu2  ;;  %v1943_v60 = vpop.f32.mrf.mxu3 }
 0x53c   :  { %v1869_v61 = vpop.f32.mrf.mxu0  ;;  %v1892_v62 = vpop.f32.mrf.mxu1  ;;  %v1949_v34 = vmul.f32 %v1920_v59, %v1866_v57  ;;  %v1950_v35 = vmul.f32 %v1943_v60, %v1889_v58 }
 0x53e   :  { %v1953_v43 = vadd.f32 %v1949_v34, %v1830_v21  ;;  %v1954_v44 = vadd.f32 %v1950_v35, %v1831_v22 }
 0x543   :  { %v1923_v3 = vpop.f32.mrf.mxu2  ;;  %v1946_v4 = vpop.f32.mrf.mxu3 }
 0x544   :  { %v1982_v9 = vpop.f32.mrf.mxu0  ;;  %v2005_v13 = vpop.f32.mrf.mxu1  ;;  %v1951_v38 = vmul.f32 %v1923_v3, %v1869_v61  ;;  %v1952_v31 = vmul.f32 %v1946_v4, %v1892_v62 }
 0x546   :  { %v1955_v11 = vadd.f32 %v1951_v38, %v1832_v32  ;;  %v1956_v29 = vadd.f32 %v1952_v31, %v1833_v37 }
 0x54b   :  { %v2036_v27 = vpop.f32.mrf.mxu2  ;;  %v2059_v30 = vpop.f32.mrf.mxu3 }
 0x54c   :  { %v2065_v45 = vmul.f32 %v2036_v27, %v1982_v9  ;;  %v2066_v46 = vmul.f32 %v2059_v30, %v2005_v13  ;;  %v1985_v42 = vpop.f32.mrf.mxu0  ;;  %v2008_v40 = vpop.f32.mrf.mxu1 }
 0x54e   :  { %v2069_v28 = vadd.f32 %v2065_v45, %v1953_v43  ;;  %v2070_v16 = vadd.f32 %v2066_v46, %v1954_v44 }
 0x550   :  { %2119 = vmatmul.f32.vlgmr.msrb.gmra.mxu0 %v2069_v28  ;;  %2345 = vmatmul.msk.f32.vlgmr.msrb.gmra.mxu1 %vm156_vm1, %v2070_v16 }
 0x553   :  { %v2039_v41 = vpop.f32.mrf.mxu2  ;;  %v2062_v39 = vpop.f32.mrf.mxu3 }
 0x554   :  { %v2067_v12 = vmul.f32 %v2039_v41, %v1985_v42  ;;  %v2068_v6 = vmul.f32 %v2062_v39, %v2008_v40 }
 0x556   :  { %v2071_v48 = vadd.f32 %v2067_v12, %v1955_v11  ;;  %v2072_v33 = vadd.f32 %v2068_v6, %v1956_v29 }
 0x558   :  { %2122 = vmatmul.f32.gmra.mxu0 %v2071_v48  ;;  %2346 = vmatmul.msk.f32.gmra.mxu1 %vm156_vm1, %v2072_v33 }
 0x5cd   :  { %v2120_v49 = vpop.f32.mrf.mxu0  ;;  %v2143_v50 = vpop.f32.mrf.mxu1 }
 0x5ce   :  { %v2144_v51 = vadd.f32 %v2143_v50, %v2120_v49 }
 0x5d0   :  { %2149 = vst.msk [vmem:[%s3337_s10] sm:$0xff] %vm156_vm1, %v2144_v51  ;;  %v2177_v54 = vmul.f32 %v2144_v51, %v2144_v51  ;;  %v2166_v56 = vsel %vm156_vm1, %v2144_v51, 0.0 }
 0x5d2   :  { %v2179_v60 = vsel %vm156_vm1, %v2177_v54, 0.0 }
 0x5d5   :  { %v2123_v52 = vpop.f32.mrf.mxu0  ;;  %v2146_v53 = vpop.f32.mrf.mxu1 }
 0x5d6   :  { %v2147_v55 = vadd.f32 %v2146_v53, %v2123_v52 }
 0x5d8   :  { %2150 = vst.msk [vmem:[%s3337_s10 + $0x8] sm:$0xff] %vm156_vm1, %v2147_v55  ;;  %v2167_v57 = vsel %vm156_vm1, %v2147_v55, 0.0  ;;  %v2178_v58 = vmul.f32 %v2147_v55, %v2147_v55 }
 0x5d9   :  { %v2168_v59 = vadd.f32 %v2167_v57, %v2166_v56 }
 0x5da   :  { %v2180_v61 = vsel %vm156_vm1, %v2178_v58, 0.0 }
 0x5db   :  { %v2169_v62 = vrot.slane %v2168_v59, 4  ;;  %v2181_v63 = vadd.f32 %v2180_v61, %v2179_v60 }
 0x5dd   :  { %v2170_v0 = vadd.f32 %v2169_v62, %v2168_v59  ;;  %v2182_v3 = vrot.slane %v2181_v63, 4 }
 0x5df   :  { %v2171_v4 = vrot.slane %v2170_v0, 2  ;;  %v2183_v7 = vadd.f32 %v2182_v3, %v2181_v63 }
 0x5e1   :  { %v2172_v8 = vadd.f32 %v2171_v4, %v2170_v0  ;;  %v2184_v17 = vrot.slane %v2183_v7, 2 }
 0x5e3   :  { %v2173_v18 = vrot.slane %v2172_v8, 1  ;;  %v2185_v23 = vadd.f32 %v2184_v17, %v2183_v7 }
 0x5e5   :  { %v2174_v24 = vadd.f32 %v2173_v18, %v2172_v8  ;;  %v2186_v25 = vrot.slane %v2185_v23, 1 }
 0x5e7   :  { %2176 = vst.msk [vmem:[%s3338_s11] sm:$0x1] %vm2175_vm3, %v2174_v24  ;;  %v2187_v26 = vadd.f32 %v2186_v25, %v2185_v23 }
 0x5e9   :  { %2188 = vst.msk [vmem:[%s3338_s11 + $0x1] sm:$0x1] %vm2175_vm3, %v2187_v26 }

</bundles_post_ra>
